<compile_context>
chip_gen: v6e
topology: v6e:2x2x1
jax: 0.10.0
libtpu: 0.0.40
codegen_flags: <defaults>
</compile_context>

<pallas_src>
import functools

import jax
import jax.numpy as jnp
from jax import lax
from jax.experimental import pallas as pl
from jax.experimental.pallas import tpu as pltpu


# ----------------------------------------------------------------------------
# Pallas kernels
# ----------------------------------------------------------------------------
def _fc_kernel(x_ref, w_ref, b_ref, o_ref):
    """o = leaky_relu(x @ w + b). w is bf16 (columns pre-permuted), acc in f32."""
    x = x_ref[...].astype(jnp.bfloat16)
    acc = jnp.dot(x, w_ref[...], preferred_element_type=jnp.float32) + b_ref[...]
    o_ref[...] = jnp.where(acc > 0, acc, 0.01 * acc).astype(o_ref.dtype)


def _softplus_f32(x):
    # numerically stable softplus; the where-guard avoids log(1+t) losing
    # precision for very negative inputs.
    t = jnp.exp(-jnp.abs(x))
    log_term = jnp.where(t > 1e-4, jnp.log(1.0 + t), t)
    return jnp.maximum(x, 0.0) + log_term


def _deconv_phase_kernel(x_ref, w_ref, b_ref, *rest, H, W, Cin, Cout,
                         layer_norm, softplus_cols):
    """Polyphase ConvTranspose2d(k=3, s=2, p=1, op=1) for ONE sample.

    x_ref : (1, H*W + W + 1, Cin)  NHWC rows (h*W + w), zero rows appended
    w_ref : (9, Cin, Cout)         bf16 taps, index = ky*3 + kx
    b_ref : (1, Cout)              f32
    rest  : [gamma, beta,] out     gamma/beta: (4, H*W, Cout) phase-major
    out   : (1, H*W, 4*Cout)       columns = (dy, dx, cout)
    """
    if layer_norm:
        g_ref, bt_ref, o_ref = rest
    else:
        (o_ref,) = rest

    HW = H * W
    xf = x_ref[0].astype(jnp.bfloat16)          # (HW + W + 1, Cin)

    # shifted neighbours (zero padding rows cover the bottom boundary; the
    # right boundary is masked explicitly).
    x = xf[0:HW]
    x_r = xf[1:HW + 1]                          # in[m, n+1]
    x_d = xf[W:HW + W]                          # in[m+1, n]
    x_dr = xf[W + 1:HW + W + 1]                 # in[m+1, n+1]

    rid = lax.broadcasted_iota(jnp.int32, (HW, Cin), 0)
    has_r = (rid % W) < (W - 1)
    zero = jnp.zeros((HW, Cin), xf.dtype)
    x_r = jnp.where(has_r, x_r, zero)
    x_dr = jnp.where(has_r, x_dr, zero)

    def mm(a, tap):
        return jnp.dot(a, w_ref[tap], preferred_element_type=jnp.float32)

    bias = b_ref[...]                           # (1, Cout) f32
    # output phase (dy, dx); tap index = ky*3 + kx
    phases = [
        mm(x, 4) + bias,                                              # (0, 0)
        mm(x_r, 3) + mm(x, 5) + bias,                                 # (0, 1)
        mm(x_d, 1) + mm(x, 7) + bias,                                 # (1, 0)
        mm(x_dr, 0) + mm(x_d, 2) + mm(x_r, 6) + mm(x, 8) + bias,      # (1, 1)
    ]

    if layer_norm:
        # LayerNorm over the whole (Cout, 2H, 2W) sample = all 4 phase slabs.
        inv_n = 1.0 / float(4 * HW * Cout)
        tot = jnp.zeros((1, 1), jnp.float32)
        for p in phases:
            tot = tot + jnp.sum(jnp.sum(p, axis=1, keepdims=True),
                                axis=0, keepdims=True)
        mean = tot * inv_n                                            # (1, 1)
        vtot = jnp.zeros((1, 1), jnp.float32)
        for p in phases:
            d = p - mean
            vtot = vtot + jnp.sum(jnp.sum(d * d, axis=1, keepdims=True),
                                  axis=0, keepdims=True)
        inv = lax.rsqrt(vtot * inv_n + 1e-5)                          # (1, 1)
        for k, p in enumerate(phases):
            y = (p - mean) * inv * g_ref[k] + bt_ref[k]
            y = jnp.where(y > 0, y, 0.01 * y)                         # LeakyReLU
            o_ref[0, :, pl.ds(k * Cout, Cout)] = y.astype(o_ref.dtype)
    else:
        if softplus_cols is not None:
            lo, hi = softplus_cols
            cid = lax.broadcasted_iota(jnp.int32, (HW, Cout), 1)
            sp_mask = (cid >= lo) & (cid < hi)
        for k, p in enumerate(phases):
            if softplus_cols is not None:
                p = jnp.where(sp_mask, _softplus_f32(p), p)
            o_ref[0, :, pl.ds(k * Cout, Cout)] = p.astype(o_ref.dtype)


# ----------------------------------------------------------------------------
# Pallas wrappers
# ----------------------------------------------------------------------------
def _fc_call(x, w, b):
    B, K = x.shape
    N = w.shape[1]
    return pl.pallas_call(
        _fc_kernel,
        out_shape=jax.ShapeDtypeStruct((B, N), jnp.bfloat16),
        grid=(1,),
        in_specs=[pl.BlockSpec((B, K), lambda i: (0, 0)),
                  pl.BlockSpec((K, N), lambda i: (0, 0)),
                  pl.BlockSpec((1, N), lambda i: (0, 0))],
        out_specs=pl.BlockSpec((B, N), lambda i: (0, 0)),
    )(x, w, b)


def _deconv_call(x_pad, w_taps, bias, gamma, beta, *, H, W, Cin, Cout,
                 layer_norm, softplus_cols, out_dtype):
    B = x_pad.shape[0]
    HWp = H * W + W + 1
    kernel = functools.partial(_deconv_phase_kernel, H=H, W=W, Cin=Cin,
                               Cout=Cout, layer_norm=layer_norm,
                               softplus_cols=softplus_cols)
    in_specs = [
        pl.BlockSpec((1, HWp, Cin), lambda i: (i, 0, 0)),
        pl.BlockSpec((9, Cin, Cout), lambda i: (0, 0, 0)),
        pl.BlockSpec((1, Cout), lambda i: (0, 0)),
    ]
    args = [x_pad, w_taps, bias]
    if layer_norm:
        in_specs += [pl.BlockSpec((4, H * W, Cout), lambda i: (0, 0, 0)),
                     pl.BlockSpec((4, H * W, Cout), lambda i: (0, 0, 0))]
        args += [gamma, beta]
    return pl.pallas_call(
        kernel,
        out_shape=jax.ShapeDtypeStruct((B, H * W, 4 * Cout), out_dtype),
        grid=(B,),
        in_specs=in_specs,
        out_specs=pl.BlockSpec((1, H * W, 4 * Cout), lambda i: (i, 0, 0)),
        compiler_params=pltpu.CompilerParams(dimension_semantics=("parallel",)),
    )(*args)


def _pad_rows(x, W):
    """(B, H*W, C) -> (B, H*W + W + 1, C), zero rows appended (bottom halo)."""
    return jnp.pad(x, ((0, 0), (0, W + 1), (0, 0)))


def _deinterleave(y, H, W, Cout):
    """(B, H*W, 4*Cout) phase layout -> (B, 2H, 2W, Cout) NHWC."""
    B = y.shape[0]
    return (y.reshape(B, H, W, 2, 2, Cout)
             .transpose(0, 1, 3, 2, 4, 5)
             .reshape(B, 2 * H, 2 * W, Cout))


# ----------------------------------------------------------------------------
# Parameter construction (deterministic, synthetic — mirrors module __init__)
# ----------------------------------------------------------------------------
def compute_conv2d_output_size(size, kernel_size, stride, padding):
    return tuple((s + 2 * padding - kernel_size) // stride + 1 for s in size)


def init_params(key, image_size, image_channels, a_dim):
    conv_output_size = image_size
    for _ in range(3):
        conv_output_size = compute_conv2d_output_size(
            conv_output_size, kernel_size=3, stride=2, padding=1)
    h0, w0 = conv_output_size
    fc_out = 128 * h0 * w0

    keys = jax.random.split(key, 10)
    gain = (2.0 / (1.0 + 0.01 ** 2)) ** 0.5  # kaiming gain for leaky_relu

    def kaiming(k, shape, fan_out):
        return gain / (fan_out ** 0.5) * jax.random.normal(k, shape, jnp.float32)

    def uniform_bias(k, shape, fan_in):
        bound = 1.0 / (fan_in ** 0.5)
        return jax.random.uniform(k, shape, jnp.float32, -bound, bound)

    C = image_channels
    # --- raw PyTorch-layout weights ------------------------------------
    fc_w = kaiming(keys[0], (a_dim, fc_out), fc_out)           # forward: x @ W
    fc_b = uniform_bias(keys[5], (fc_out,), a_dim)
    dc1_w = kaiming(keys[1], (128, 64, 3, 3), 128 * 9)         # (Cin, Cout, 3, 3)
    dc1_b = uniform_bias(keys[6], (64,), 64 * 9)
    dc2_w = kaiming(keys[2], (64, 32, 3, 3), 64 * 9)
    dc2_b = uniform_bias(keys[7], (32,), 32 * 9)
    dc3m_w = kaiming(keys[3], (32, C, 3, 3), 32 * 9)
    dc3m_b = uniform_bias(keys[8], (C,), C * 9)
    dc3s_w = kaiming(keys[4], (32, C, 3, 3), 32 * 9)
    dc3s_b = uniform_bias(keys[9], (C,), C * 9)
    ln1_g = jnp.ones((64, 2 * h0, 2 * w0), jnp.float32)
    ln1_b = jnp.zeros((64, 2 * h0, 2 * w0), jnp.float32)
    ln2_g = jnp.ones((32, 4 * h0, 4 * w0), jnp.float32)
    ln2_b = jnp.zeros((32, 4 * h0, 4 * w0), jnp.float32)

    # --- one-time re-layout to kernel-friendly forms --------------------
    # fc: permute output features (c, m, n) -> (m, n, c) so the matmul result
    # is already NHWC row-major; store matmul operands in bf16.
    fc_w_p = (fc_w.reshape(a_dim, 128, h0, w0)
              .transpose(0, 2, 3, 1).reshape(a_dim, fc_out)).astype(jnp.bfloat16)
    fc_b_p = fc_b.reshape(128, h0, w0).transpose(1, 2, 0).reshape(1, fc_out)

    def taps(w_t):  # (Cin, Cout, 3, 3) -> (9, Cin, Cout), tap = ky*3+kx, bf16
        cin, cout = w_t.shape[0], w_t.shape[1]
        return w_t.transpose(2, 3, 0, 1).reshape(9, cin, cout).astype(jnp.bfloat16)

    def phase_affine(g, H, W):  # (C, 2H, 2W) -> (4, H*W, C) phase-major
        c = g.shape[0]
        return (g.reshape(c, H, 2, W, 2)
                 .transpose(2, 4, 1, 3, 0).reshape(4, H * W, c))

    # fused mean/std head: concatenate along Cout and zero-pad the channel dim
    # so the kernel output slab (H*W, 4*Cp) is lane-dense (4*Cp % 128 == 0).
    Cp = -(-2 * C // 32) * 32                                   # 6 -> 32
    dc3_w = jnp.concatenate([dc3m_w, dc3s_w], axis=1)           # (32, 2C, 3, 3)
    dc3_w = jnp.pad(dc3_w, ((0, 0), (0, Cp - 2 * C), (0, 0), (0, 0)))
    dc3_b = jnp.concatenate([dc3m_b, dc3s_b], axis=0)           # (2C,)
    dc3_b = jnp.pad(dc3_b, (0, Cp - 2 * C)).reshape(1, Cp)

    params = {
        "fc_w": fc_w_p, "fc_b": fc_b_p,
        "dc1_w": taps(dc1_w), "dc1_b": dc1_b.reshape(1, 64),
        "ln1_g": phase_affine(ln1_g, h0, w0),
        "ln1_b": phase_affine(ln1_b, h0, w0),
        "dc2_w": taps(dc2_w), "dc2_b": dc2_b.reshape(1, 32),
        "ln2_g": phase_affine(ln2_g, 2 * h0, 2 * w0),
        "ln2_b": phase_affine(ln2_b, 2 * h0, 2 * w0),
        "dc3_w": taps(dc3_w),
        "dc3_b": dc3_b,
    }
    return params, conv_output_size


# ----------------------------------------------------------------------------
# Forward pass (returns (mean, std) of the Normal distribution)
# ----------------------------------------------------------------------------
def make_image_decoder_forward(conv_output_size, image_channels):
    h0, w0 = int(conv_output_size[0]), int(conv_output_size[1])

    @jax.jit
    def forward(params, x):
        B = x.shape[0]
        C = image_channels
        Cp = params["dc3_w"].shape[-1]      # padded head width (static shape)

        # fc + leaky_relu -> (B, h0*w0, 128) NHWC rows (weights pre-permuted)
        h = _fc_call(x, params["fc_w"], params["fc_b"])
        h = h.reshape(B, h0 * w0, 128)

        # deconv1 + LayerNorm([64, 2h0, 2w0]) + LeakyReLU
        y = _deconv_call(_pad_rows(h, w0), params["dc1_w"], params["dc1_b"],
                         params["ln1_g"], params["ln1_b"],
                         H=h0, W=w0, Cin=128, Cout=64,
                         layer_norm=True, softplus_cols=None,
                         out_dtype=jnp.bfloat16)
        h = _deinterleave(y, h0, w0, 64).reshape(B, (2 * h0) * (2 * w0), 64)

        # deconv2 + LayerNorm([32, 4h0, 4w0]) + LeakyReLU
        y = _deconv_call(_pad_rows(h, 2 * w0), params["dc2_w"], params["dc2_b"],
                         params["ln2_g"], params["ln2_b"],
                         H=2 * h0, W=2 * w0, Cin=64, Cout=32,
                         layer_norm=True, softplus_cols=None,
                         out_dtype=jnp.bfloat16)
        h = _deinterleave(y, 2 * h0, 2 * w0, 32).reshape(
            B, (4 * h0) * (4 * w0), 32)

        # fused mean/std heads (softplus on the std columns inside the kernel)
        y = _deconv_call(_pad_rows(h, 4 * w0), params["dc3_w"], params["dc3_b"],
                         None, None,
                         H=4 * h0, W=4 * w0, Cin=32, Cout=Cp,
                         layer_norm=False, softplus_cols=(C, 2 * C),
                         out_dtype=jnp.float32)
        out = _deinterleave(y, 4 * h0, 4 * w0, Cp)      # (B, 8h0, 8w0, Cp)

        x_mean = out[..., :C].transpose(0, 3, 1, 2)
        x_std = out[..., C:2 * C].transpose(0, 3, 1, 2)
        # TODO(synk): torch.distributions.Normal has no Pallas/JAX kernel
        # equivalent; we return its (loc, scale) parameters instead.
        return x_mean, x_std

    return forward


# ----------------------------------------------------------------------------
if __name__ == "__main__":
    B = 2
    image_size = (16, 16)
    image_channels = 3
    a_dim = 32

    key = jax.random.PRNGKey(0)
    pkey, xkey = jax.random.split(key)
    params, conv_out = init_params(pkey, image_size, image_channels, a_dim)
    forward = make_image_decoder_forward(conv_out, image_channels)

    x = jax.random.normal(xkey, (B, a_dim), jnp.float32)
    mean, std = forward(params, x)
    jax.block_until_ready((mean, std))

    assert mean.shape == (B, image_channels, *image_size)
    assert std.shape == (B, image_channels, *image_size)
    assert bool(jnp.all(jnp.isfinite(mean)))
    assert bool(jnp.all(std > 0))
    print("KERNEL_OK")
</pallas_src>

<mosaic_0001>
module attributes {stable_mosaic.version = 11 : i64} {
  func.func @_fc_kernel(%arg0: i32, %arg1: memref<2x32xf32, #tpu.memory_space<vmem>>, %arg2: memref<32x512xbf16, #tpu.memory_space<vmem>>, %arg3: memref<1x512xf32, #tpu.memory_space<vmem>>, %arg4: memref<2x512xbf16, #tpu.memory_space<vmem>>) attributes {dimension_semantics = [#tpu.dimension_semantics<arbitrary>], iteration_bounds = array<i64: 1>, scalar_prefetch = 0 : i64, scratch_operands = 0 : i64, tpu.core_type = #tpu.core_type<tc>, window_params = [{pipeline_mode = #tpu.pipeline_mode<synchronous>, transform_indices = @transform_0, window_bounds = array<i64: 2, 32>}, {pipeline_mode = #tpu.pipeline_mode<synchronous>, transform_indices = @transform_1, window_bounds = array<i64: 32, 512>}, {pipeline_mode = #tpu.pipeline_mode<synchronous>, transform_indices = @transform_2, window_bounds = array<i64: 1, 512>}, {pipeline_mode = #tpu.pipeline_mode<synchronous>, transform_indices = @transform_3, window_bounds = array<i64: 2, 512>}]} {
    %c0 = arith.constant 0 : index
    %c0_0 = arith.constant 0 : index
    %0 = vector.load %arg1[%c0, %c0_0] : memref<2x32xf32, #tpu.memory_space<vmem>>, vector<2x32xf32>
    %1 = arith.truncf %0 : vector<2x32xf32> to vector<2x32xbf16>
    %c0_1 = arith.constant 0 : index
    %c0_2 = arith.constant 0 : index
    %2 = vector.load %arg2[%c0_1, %c0_2] : memref<32x512xbf16, #tpu.memory_space<vmem>>, vector<32x512xbf16>
    %cst = arith.constant dense<0.000000e+00> : vector<2x512xf32>
    %3 = tpu.matmul %1, %2, %cst {dimension_numbers = #tpu.dot_dimension_numbers<[1], [0], [0], [1], [0, 0, 1, 1], [], []>} : vector<2x32xbf16>, vector<32x512xbf16>, vector<2x512xf32> -> vector<2x512xf32>
    %c0_3 = arith.constant 0 : index
    %c0_4 = arith.constant 0 : index
    %4 = vector.load %arg3[%c0_3, %c0_4] : memref<1x512xf32, #tpu.memory_space<vmem>>, vector<1x512xf32>
    %5 = vector.broadcast %4 : vector<1x512xf32> to vector<2x512xf32>
    %6 = arith.addf %3, %5 : vector<2x512xf32>
    %cst_5 = arith.constant 0.000000e+00 : f32
    %7 = vector.broadcast %cst_5 : f32 to vector<2x512xf32>
    %8 = arith.cmpf ogt, %6, %7 : vector<2x512xf32>
    %cst_6 = arith.constant 0.00999999977 : f32
    %9 = vector.broadcast %cst_6 : f32 to vector<2x512xf32>
    %10 = arith.mulf %9, %6 : vector<2x512xf32>
    %11 = arith.select %8, %6, %10 : vector<2x512xi1>, vector<2x512xf32>
    %12 = arith.truncf %11 : vector<2x512xf32> to vector<2x512xbf16>
    %c0_7 = arith.constant 0 : index
    %c0_8 = arith.constant 0 : index
    %13 = vector.load %arg4[%c0_7, %c0_8] : memref<2x512xbf16, #tpu.memory_space<vmem>>, vector<2x512xbf16>
    tpu.vector_store %arg4[%c0_7, %c0_8], %12 {strides = array<i32>} : memref<2x512xbf16, #tpu.memory_space<vmem>>, vector<2x512xbf16>,
    return
  }
  func.func @transform_0(%arg0: i32) -> (i32, i32) {
    %c0_i32 = arith.constant 0 : i32
    %c0_i32_0 = arith.constant 0 : i32
    %c0_i32_1 = arith.constant 0 : i32
    return %c0_i32, %c0_i32_0 : i32, i32
  }
  func.func @transform_1(%arg0: i32) -> (i32, i32) {
    %c0_i32 = arith.constant 0 : i32
    %c0_i32_0 = arith.constant 0 : i32
    %c0_i32_1 = arith.constant 0 : i32
    return %c0_i32, %c0_i32_0 : i32, i32
  }
  func.func @transform_2(%arg0: i32) -> (i32, i32) {
    %c0_i32 = arith.constant 0 : i32
    %c0_i32_0 = arith.constant 0 : i32
    %c0_i32_1 = arith.constant 0 : i32
    return %c0_i32, %c0_i32_0 : i32, i32
  }
  func.func @transform_3(%arg0: i32) -> (i32, i32) {
    %c0_i32 = arith.constant 0 : i32
    %c0_i32_0 = arith.constant 0 : i32
    %c0_i32_1 = arith.constant 0 : i32
    return %c0_i32, %c0_i32_0 : i32, i32
  }
}

module attributes {stable_mosaic.version = 11 : i64} {
  func.func @_deconv_phase_kernel(%arg0: i32, %arg1: memref<1x7x128xbf16, #tpu.memory_space<vmem>>, %arg2: memref<9x128x64xbf16, #tpu.memory_space<vmem>>, %arg3: memref<1x64xf32, #tpu.memory_space<vmem>>, %arg4: memref<4x4x64xf32, #tpu.memory_space<vmem>>, %arg5: memref<4x4x64xf32, #tpu.memory_space<vmem>>, %arg6: memref<1x4x256xbf16, #tpu.memory_space<vmem>>) attributes {dimension_semantics = [#tpu.dimension_semantics<parallel>], iteration_bounds = array<i64: 2>, scalar_prefetch = 0 : i64, scratch_operands = 0 : i64, tpu.core_type = #tpu.core_type<tc>, window_params = [{transform_indices = @transform_0, window_bounds = array<i64: 1, 7, 128>}, {pipeline_mode = #tpu.pipeline_mode<synchronous>, transform_indices = @transform_1, window_bounds = array<i64: 9, 128, 64>}, {pipeline_mode = #tpu.pipeline_mode<synchronous>, transform_indices = @transform_2, window_bounds = array<i64: 1, 64>}, {pipeline_mode = #tpu.pipeline_mode<synchronous>, transform_indices = @transform_3, window_bounds = array<i64: 4, 4, 64>}, {pipeline_mode = #tpu.pipeline_mode<synchronous>, transform_indices = @transform_4, window_bounds = array<i64: 4, 4, 64>}, {transform_indices = @transform_5, window_bounds = array<i64: 1, 4, 256>}]} {
    %c0 = arith.constant 0 : index
    %c0_0 = arith.constant 0 : index
    %c0_1 = arith.constant 0 : index
    %0 = vector.load %arg1[%c0, %c0_0, %c0_1] : memref<1x7x128xbf16, #tpu.memory_space<vmem>>, vector<1x7x128xbf16>
    %1 = vector.shape_cast %0 : vector<1x7x128xbf16> to vector<7x128xbf16>
    %2 = vector.extract_strided_slice %1 {offsets = [0, 0], sizes = [4, 128], strides = [1, 1]} : vector<7x128xbf16> to vector<4x128xbf16>
    %3 = vector.extract_strided_slice %1 {offsets = [1, 0], sizes = [4, 128], strides = [1, 1]} : vector<7x128xbf16> to vector<4x128xbf16>
    %4 = vector.extract_strided_slice %1 {offsets = [2, 0], sizes = [4, 128], strides = [1, 1]} : vector<7x128xbf16> to vector<4x128xbf16>
    %5 = vector.extract_strided_slice %1 {offsets = [3, 0], sizes = [4, 128], strides = [1, 1]} : vector<7x128xbf16> to vector<4x128xbf16>
    %6 = tpu.iota {dimensions = array<i32: 0>} : vector<4x128xi32>
    %c2_i32 = arith.constant 2 : i32
    %c0_i32 = arith.constant 0 : i32
    %7 = arith.cmpi eq, %c2_i32, %c0_i32 : i32
    %c1_i32 = arith.constant 1 : i32
    %8 = arith.select %7, %c1_i32, %c2_i32 : i32
    %9 = vector.broadcast %8 : i32 to vector<4x128xi32>
    %10 = arith.remsi %6, %9 : vector<4x128xi32>
    %c0_i32_2 = arith.constant 0 : i32
    %11 = vector.broadcast %c0_i32_2 : i32 to vector<4x128xi32>
    %12 = arith.cmpi ne, %10, %11 : vector<4x128xi32>
    %c0_i32_3 = arith.constant 0 : i32
    %13 = vector.broadcast %c0_i32_3 : i32 to vector<4x128xi32>
    %14 = arith.cmpi slt, %10, %13 : vector<4x128xi32>
    %c0_i32_4 = arith.constant 0 : i32
    %15 = arith.cmpi slt, %8, %c0_i32_4 : i32
    %16 = vector.broadcast %15 : i1 to vector<4x128xi1>
    %17 = vector.broadcast %16 : vector<4x128xi1> to vector<4x128xi1>
    %18 = arith.xori %14, %17 : vector<4x128xi1>
    %19 = arith.andi %18, %12 : vector<4x128xi1>
    %20 = vector.broadcast %8 : i32 to vector<4x128xi32>
    %21 = arith.addi %10, %20 : vector<4x128xi32>
    %22 = arith.select %19, %21, %10 : vector<4x128xi1>, vector<4x128xi32>
    %c1_i32_5 = arith.constant 1 : i32
    %23 = vector.broadcast %c1_i32_5 : i32 to vector<4x128xi32>
    %24 = arith.cmpi slt, %22, %23 : vector<4x128xi32>
    %cst = arith.constant 0.000000e+00 : bf16
    %25 = vector.broadcast %cst : bf16 to vector<4x128xbf16>
    %26 = arith.select %24, %3, %25 : vector<4x128xi1>, vector<4x128xbf16>
    %27 = arith.select %24, %5, %25 : vector<4x128xi1>, vector<4x128xbf16>
    %c0_6 = arith.constant 0 : index
    %c0_7 = arith.constant 0 : index
    %28 = vector.load %arg3[%c0_6, %c0_7] : memref<1x64xf32, #tpu.memory_space<vmem>>, vector<1x64xf32>
    %c4 = arith.constant 4 : index
    %c0_8 = arith.constant 0 : index
    %c0_9 = arith.constant 0 : index
    %29 = vector.load %arg2[%c4, %c0_8, %c0_9] : memref<9x128x64xbf16, #tpu.memory_space<vmem>>, vector<1x128x64xbf16>
    %30 = vector.shape_cast %29 : vector<1x128x64xbf16> to vector<128x64xbf16>
    %cst_10 = arith.constant dense<0.000000e+00> : vector<4x64xf32>
    %31 = tpu.matmul %2, %30, %cst_10 {dimension_numbers = #tpu.dot_dimension_numbers<[1], [0], [0], [1], [0, 0, 1, 1], [], []>} : vector<4x128xbf16>, vector<128x64xbf16>, vector<4x64xf32> -> vector<4x64xf32>
    %32 = vector.broadcast %28 : vector<1x64xf32> to vector<4x64xf32>
    %33 = arith.addf %31, %32 : vector<4x64xf32>
    %c3 = arith.constant 3 : index
    %c0_11 = arith.constant 0 : index
    %c0_12 = arith.constant 0 : index
    %34 = vector.load %arg2[%c3, %c0_11, %c0_12] : memref<9x128x64xbf16, #tpu.memory_space<vmem>>, vector<1x128x64xbf16>
    %35 = vector.shape_cast %34 : vector<1x128x64xbf16> to vector<128x64xbf16>
    %cst_13 = arith.constant dense<0.000000e+00> : vector<4x64xf32>
    %36 = tpu.matmul %26, %35, %cst_13 {dimension_numbers = #tpu.dot_dimension_numbers<[1], [0], [0], [1], [0, 0, 1, 1], [], []>} : vector<4x128xbf16>, vector<128x64xbf16>, vector<4x64xf32> -> vector<4x64xf32>
    %c5 = arith.constant 5 : index
    %c0_14 = arith.constant 0 : index
    %c0_15 = arith.constant 0 : index
    %37 = vector.load %arg2[%c5, %c0_14, %c0_15] : memref<9x128x64xbf16, #tpu.memory_space<vmem>>, vector<1x128x64xbf16>
    %38 = vector.shape_cast %37 : vector<1x128x64xbf16> to vector<128x64xbf16>
    %cst_16 = arith.constant dense<0.000000e+00> : vector<4x64xf32>
    %39 = tpu.matmul %2, %38, %cst_16 {dimension_numbers = #tpu.dot_dimension_numbers<[1], [0], [0], [1], [0, 0, 1, 1], [], []>} : vector<4x128xbf16>, vector<128x64xbf16>, vector<4x64xf32> -> vector<4x64xf32>
    %40 = arith.addf %36, %39 : vector<4x64xf32>
    %41 = vector.broadcast %28 : vector<1x64xf32> to vector<4x64xf32>
    %42 = arith.addf %40, %41 : vector<4x64xf32>
    %c1 = arith.constant 1 : index
    %c0_17 = arith.constant 0 : index
    %c0_18 = arith.constant 0 : index
    %43 = vector.load %arg2[%c1, %c0_17, %c0_18] : memref<9x128x64xbf16, #tpu.memory_space<vmem>>, vector<1x128x64xbf16>
    %44 = vector.shape_cast %43 : vector<1x128x64xbf16> to vector<128x64xbf16>
    %cst_19 = arith.constant dense<0.000000e+00> : vector<4x64xf32>
    %45 = tpu.matmul %4, %44, %cst_19 {dimension_numbers = #tpu.dot_dimension_numbers<[1], [0], [0], [1], [0, 0, 1, 1], [], []>} : vector<4x128xbf16>, vector<128x64xbf16>, vector<4x64xf32> -> vector<4x64xf32>
    %c7 = arith.constant 7 : index
    %c0_20 = arith.constant 0 : index
    %c0_21 = arith.constant 0 : index
    %46 = vector.load %arg2[%c7, %c0_20, %c0_21] : memref<9x128x64xbf16, #tpu.memory_space<vmem>>, vector<1x128x64xbf16>
    %47 = vector.shape_cast %46 : vector<1x128x64xbf16> to vector<128x64xbf16>
    %cst_22 = arith.constant dense<0.000000e+00> : vector<4x64xf32>
    %48 = tpu.matmul %2, %47, %cst_22 {dimension_numbers = #tpu.dot_dimension_numbers<[1], [0], [0], [1], [0, 0, 1, 1], [], []>} : vector<4x128xbf16>, vector<128x64xbf16>, vector<4x64xf32> -> vector<4x64xf32>
    %49 = arith.addf %45, %48 : vector<4x64xf32>
    %50 = vector.broadcast %28 : vector<1x64xf32> to vector<4x64xf32>
    %51 = arith.addf %49, %50 : vector<4x64xf32>
    %c0_23 = arith.constant 0 : index
    %c0_24 = arith.constant 0 : index
    %c0_25 = arith.constant 0 : index
    %52 = vector.load %arg2[%c0_23, %c0_24, %c0_25] : memref<9x128x64xbf16, #tpu.memory_space<vmem>>, vector<1x128x64xbf16>
    %53 = vector.shape_cast %52 : vector<1x128x64xbf16> to vector<128x64xbf16>
    %cst_26 = arith.constant dense<0.000000e+00> : vector<4x64xf32>
    %54 = tpu.matmul %27, %53, %cst_26 {dimension_numbers = #tpu.dot_dimension_numbers<[1], [0], [0], [1], [0, 0, 1, 1], [], []>} : vector<4x128xbf16>, vector<128x64xbf16>, vector<4x64xf32> -> vector<4x64xf32>
    %c2 = arith.constant 2 : index
    %c0_27 = arith.constant 0 : index
    %c0_28 = arith.constant 0 : index
    %55 = vector.load %arg2[%c2, %c0_27, %c0_28] : memref<9x128x64xbf16, #tpu.memory_space<vmem>>, vector<1x128x64xbf16>
    %56 = vector.shape_cast %55 : vector<1x128x64xbf16> to vector<128x64xbf16>
    %cst_29 = arith.constant dense<0.000000e+00> : vector<4x64xf32>
    %57 = tpu.matmul %4, %56, %cst_29 {dimension_numbers = #tpu.dot_dimension_numbers<[1], [0], [0], [1], [0, 0, 1, 1], [], []>} : vector<4x128xbf16>, vector<128x64xbf16>, vector<4x64xf32> -> vector<4x64xf32>
    %58 = arith.addf %54, %57 : vector<4x64xf32>
    %c6 = arith.constant 6 : index
    %c0_30 = arith.constant 0 : index
    %c0_31 = arith.constant 0 : index
    %59 = vector.load %arg2[%c6, %c0_30, %c0_31] : memref<9x128x64xbf16, #tpu.memory_space<vmem>>, vector<1x128x64xbf16>
    %60 = vector.shape_cast %59 : vector<1x128x64xbf16> to vector<128x64xbf16>
    %cst_32 = arith.constant dense<0.000000e+00> : vector<4x64xf32>
    %61 = tpu.matmul %26, %60, %cst_32 {dimension_numbers = #tpu.dot_dimension_numbers<[1], [0], [0], [1], [0, 0, 1, 1], [], []>} : vector<4x128xbf16>, vector<128x64xbf16>, vector<4x64xf32> -> vector<4x64xf32>
    %62 = arith.addf %58, %61 : vector<4x64xf32>
    %c8 = arith.constant 8 : index
    %c0_33 = arith.constant 0 : index
    %c0_34 = arith.constant 0 : index
    %63 = vector.load %arg2[%c8, %c0_33, %c0_34] : memref<9x128x64xbf16, #tpu.memory_space<vmem>>, vector<1x128x64xbf16>
    %64 = vector.shape_cast %63 : vector<1x128x64xbf16> to vector<128x64xbf16>
    %cst_35 = arith.constant dense<0.000000e+00> : vector<4x64xf32>
    %65 = tpu.matmul %2, %64, %cst_35 {dimension_numbers = #tpu.dot_dimension_numbers<[1], [0], [0], [1], [0, 0, 1, 1], [], []>} : vector<4x128xbf16>, vector<128x64xbf16>, vector<4x64xf32> -> vector<4x64xf32>
    %66 = arith.addf %62, %65 : vector<4x64xf32>
    %67 = vector.broadcast %28 : vector<1x64xf32> to vector<4x64xf32>
    %68 = arith.addf %66, %67 : vector<4x64xf32>
    %cst_36 = arith.constant 0.000000e+00 : f32
    %69 = vector.broadcast %cst_36 : f32 to vector<1x1xf32>
    %cst_37 = arith.constant dense<0.000000e+00> : vector<4xf32>
    %70 = vector.multi_reduction <add>, %33, %cst_37 [1] : vector<4x64xf32> to vector<4xf32>
    %71 = vector.shape_cast %70 : vector<4xf32> to vector<4x1xf32>
    %cst_38 = arith.constant dense<0.000000e+00> : vector<1xf32>
    %72 = vector.multi_reduction <add>, %71, %cst_38 [0] : vector<4x1xf32> to vector<1xf32>
    %73 = vector.shape_cast %72 : vector<1xf32> to vector<1x1xf32>
    %74 = arith.addf %69, %73 : vector<1x1xf32>
    %cst_39 = arith.constant dense<0.000000e+00> : vector<4xf32>
    %75 = vector.multi_reduction <add>, %42, %cst_39 [1] : vector<4x64xf32> to vector<4xf32>
    %76 = vector.shape_cast %75 : vector<4xf32> to vector<4x1xf32>
    %cst_40 = arith.constant dense<0.000000e+00> : vector<1xf32>
    %77 = vector.multi_reduction <add>, %76, %cst_40 [0] : vector<4x1xf32> to vector<1xf32>
    %78 = vector.shape_cast %77 : vector<1xf32> to vector<1x1xf32>
    %79 = arith.addf %74, %78 : vector<1x1xf32>
    %cst_41 = arith.constant dense<0.000000e+00> : vector<4xf32>
    %80 = vector.multi_reduction <add>, %51, %cst_41 [1] : vector<4x64xf32> to vector<4xf32>
    %81 = vector.shape_cast %80 : vector<4xf32> to vector<4x1xf32>
    %cst_42 = arith.constant dense<0.000000e+00> : vector<1xf32>
    %82 = vector.multi_reduction <add>, %81, %cst_42 [0] : vector<4x1xf32> to vector<1xf32>
    %83 = vector.shape_cast %82 : vector<1xf32> to vector<1x1xf32>
    %84 = arith.addf %79, %83 : vector<1x1xf32>
    %cst_43 = arith.constant dense<0.000000e+00> : vector<4xf32>
    %85 = vector.multi_reduction <add>, %68, %cst_43 [1] : vector<4x64xf32> to vector<4xf32>
    %86 = vector.shape_cast %85 : vector<4xf32> to vector<4x1xf32>
    %cst_44 = arith.constant dense<0.000000e+00> : vector<1xf32>
    %87 = vector.multi_reduction <add>, %86, %cst_44 [0] : vector<4x1xf32> to vector<1xf32>
    %88 = vector.shape_cast %87 : vector<1xf32> to vector<1x1xf32>
    %89 = arith.addf %84, %88 : vector<1x1xf32>
    %cst_45 = arith.constant 9.765625E-4 : f32
    %90 = vector.broadcast %cst_45 : f32 to vector<1x1xf32>
    %91 = arith.mulf %89, %90 : vector<1x1xf32>
    %cst_46 = arith.constant 0.000000e+00 : f32
    %92 = vector.broadcast %cst_46 : f32 to vector<1x1xf32>
    %93 = vector.broadcast %91 : vector<1x1xf32> to vector<4x64xf32>
    %94 = arith.subf %33, %93 : vector<4x64xf32>
    %95 = arith.mulf %94, %94 : vector<4x64xf32>
    %cst_47 = arith.constant dense<0.000000e+00> : vector<4xf32>
    %96 = vector.multi_reduction <add>, %95, %cst_47 [1] : vector<4x64xf32> to vector<4xf32>
    %97 = vector.shape_cast %96 : vector<4xf32> to vector<4x1xf32>
    %cst_48 = arith.constant dense<0.000000e+00> : vector<1xf32>
    %98 = vector.multi_reduction <add>, %97, %cst_48 [0] : vector<4x1xf32> to vector<1xf32>
    %99 = vector.shape_cast %98 : vector<1xf32> to vector<1x1xf32>
    %100 = arith.addf %92, %99 : vector<1x1xf32>
    %101 = vector.broadcast %91 : vector<1x1xf32> to vector<4x64xf32>
    %102 = arith.subf %42, %101 : vector<4x64xf32>
    %103 = arith.mulf %102, %102 : vector<4x64xf32>
    %cst_49 = arith.constant dense<0.000000e+00> : vector<4xf32>
    %104 = vector.multi_reduction <add>, %103, %cst_49 [1] : vector<4x64xf32> to vector<4xf32>
    %105 = vector.shape_cast %104 : vector<4xf32> to vector<4x1xf32>
    %cst_50 = arith.constant dense<0.000000e+00> : vector<1xf32>
    %106 = vector.multi_reduction <add>, %105, %cst_50 [0] : vector<4x1xf32> to vector<1xf32>
    %107 = vector.shape_cast %106 : vector<1xf32> to vector<1x1xf32>
    %108 = arith.addf %100, %107 : vector<1x1xf32>
    %109 = vector.broadcast %91 : vector<1x1xf32> to vector<4x64xf32>
    %110 = arith.subf %51, %109 : vector<4x64xf32>
    %111 = arith.mulf %110, %110 : vector<4x64xf32>
    %cst_51 = arith.constant dense<0.000000e+00> : vector<4xf32>
    %112 = vector.multi_reduction <add>, %111, %cst_51 [1] : vector<4x64xf32> to vector<4xf32>
    %113 = vector.shape_cast %112 : vector<4xf32> to vector<4x1xf32>
    %cst_52 = arith.constant dense<0.000000e+00> : vector<1xf32>
    %114 = vector.multi_reduction <add>, %113, %cst_52 [0] : vector<4x1xf32> to vector<1xf32>
    %115 = vector.shape_cast %114 : vector<1xf32> to vector<1x1xf32>
    %116 = arith.addf %108, %115 : vector<1x1xf32>
    %117 = vector.broadcast %91 : vector<1x1xf32> to vector<4x64xf32>
    %118 = arith.subf %68, %117 : vector<4x64xf32>
    %119 = arith.mulf %118, %118 : vector<4x64xf32>
    %cst_53 = arith.constant dense<0.000000e+00> : vector<4xf32>
    %120 = vector.multi_reduction <add>, %119, %cst_53 [1] : vector<4x64xf32> to vector<4xf32>
    %121 = vector.shape_cast %120 : vector<4xf32> to vector<4x1xf32>
    %cst_54 = arith.constant dense<0.000000e+00> : vector<1xf32>
    %122 = vector.multi_reduction <add>, %121, %cst_54 [0] : vector<4x1xf32> to vector<1xf32>
    %123 = vector.shape_cast %122 : vector<1xf32> to vector<1x1xf32>
    %124 = arith.addf %116, %123 : vector<1x1xf32>
    %cst_55 = arith.constant 9.765625E-4 : f32
    %125 = vector.broadcast %cst_55 : f32 to vector<1x1xf32>
    %126 = arith.mulf %124, %125 : vector<1x1xf32>
    %cst_56 = arith.constant 9.99999974E-6 : f32
    %127 = vector.broadcast %cst_56 : f32 to vector<1x1xf32>
    %128 = arith.addf %126, %127 : vector<1x1xf32>
    %129 = math.rsqrt %128 : vector<1x1xf32>
    %130 = vector.broadcast %91 : vector<1x1xf32> to vector<4x64xf32>
    %131 = arith.subf %33, %130 : vector<4x64xf32>
    %132 = vector.broadcast %129 : vector<1x1xf32> to vector<4x64xf32>
    %133 = arith.mulf %131, %132 : vector<4x64xf32>
    %c0_57 = arith.constant 0 : index
    %c0_58 = arith.constant 0 : index
    %c0_59 = arith.constant 0 : index
    %134 = vector.load %arg4[%c0_57, %c0_58, %c0_59] : memref<4x4x64xf32, #tpu.memory_space<vmem>>, vector<1x4x64xf32>
    %135 = vector.shape_cast %134 : vector<1x4x64xf32> to vector<4x64xf32>
    %136 = arith.mulf %133, %135 : vector<4x64xf32>
    %c0_60 = arith.constant 0 : index
    %c0_61 = arith.constant 0 : index
    %c0_62 = arith.constant 0 : index
    %137 = vector.load %arg5[%c0_60, %c0_61, %c0_62] : memref<4x4x64xf32, #tpu.memory_space<vmem>>, vector<1x4x64xf32>
    %138 = vector.shape_cast %137 : vector<1x4x64xf32> to vector<4x64xf32>
    %139 = arith.addf %136, %138 : vector<4x64xf32>
    %cst_63 = arith.constant 0.000000e+00 : f32
    %140 = vector.broadcast %cst_63 : f32 to vector<4x64xf32>
    %141 = arith.cmpf ogt, %139, %140 : vector<4x64xf32>
    %cst_64 = arith.constant 0.00999999977 : f32
    %142 = vector.broadcast %cst_64 : f32 to vector<4x64xf32>
    %143 = arith.mulf %142, %139 : vector<4x64xf32>
    %144 = arith.select %141, %139, %143 : vector<4x64xi1>, vector<4x64xf32>
    %145 = arith.truncf %144 : vector<4x64xf32> to vector<4x64xbf16>
    %c0_65 = arith.constant 0 : index
    %c0_66 = arith.constant 0 : index
    %c0_67 = arith.constant 0 : index
    %146 = vector.load %arg6[%c0_65, %c0_66, %c0_67] : memref<1x4x256xbf16, #tpu.memory_space<vmem>>, vector<1x4x64xbf16>
    %147 = vector.shape_cast %146 : vector<1x4x64xbf16> to vector<4x64xbf16>
    %148 = vector.shape_cast %145 : vector<4x64xbf16> to vector<1x4x64xbf16>
    tpu.vector_store %arg6[%c0_65, %c0_66, %c0_67], %148 {strides = array<i32>} : memref<1x4x256xbf16, #tpu.memory_space<vmem>>, vector<1x4x64xbf16>,
    %149 = vector.broadcast %91 : vector<1x1xf32> to vector<4x64xf32>
    %150 = arith.subf %42, %149 : vector<4x64xf32>
    %151 = vector.broadcast %129 : vector<1x1xf32> to vector<4x64xf32>
    %152 = arith.mulf %150, %151 : vector<4x64xf32>
    %c1_68 = arith.constant 1 : index
    %c0_69 = arith.constant 0 : index
    %c0_70 = arith.constant 0 : index
    %153 = vector.load %arg4[%c1_68, %c0_69, %c0_70] : memref<4x4x64xf32, #tpu.memory_space<vmem>>, vector<1x4x64xf32>
    %154 = vector.shape_cast %153 : vector<1x4x64xf32> to vector<4x64xf32>
    %155 = arith.mulf %152, %154 : vector<4x64xf32>
    %c1_71 = arith.constant 1 : index
    %c0_72 = arith.constant 0 : index
    %c0_73 = arith.constant 0 : index
    %156 = vector.load %arg5[%c1_71, %c0_72, %c0_73] : memref<4x4x64xf32, #tpu.memory_space<vmem>>, vector<1x4x64xf32>
    %157 = vector.shape_cast %156 : vector<1x4x64xf32> to vector<4x64xf32>
    %158 = arith.addf %155, %157 : vector<4x64xf32>
    %cst_74 = arith.constant 0.000000e+00 : f32
    %159 = vector.broadcast %cst_74 : f32 to vector<4x64xf32>
    %160 = arith.cmpf ogt, %158, %159 : vector<4x64xf32>
    %cst_75 = arith.constant 0.00999999977 : f32
    %161 = vector.broadcast %cst_75 : f32 to vector<4x64xf32>
    %162 = arith.mulf %161, %158 : vector<4x64xf32>
    %163 = arith.select %160, %158, %162 : vector<4x64xi1>, vector<4x64xf32>
    %164 = arith.truncf %163 : vector<4x64xf32> to vector<4x64xbf16>
    %c0_76 = arith.constant 0 : index
    %c0_77 = arith.constant 0 : index
    %c64 = arith.constant 64 : index
    %165 = vector.load %arg6[%c0_76, %c0_77, %c64] : memref<1x4x256xbf16, #tpu.memory_space<vmem>>, vector<1x4x64xbf16>
    %166 = vector.shape_cast %165 : vector<1x4x64xbf16> to vector<4x64xbf16>
    %167 = vector.shape_cast %164 : vector<4x64xbf16> to vector<1x4x64xbf16>
    tpu.vector_store %arg6[%c0_76, %c0_77, %c64], %167 {strides = array<i32>} : memref<1x4x256xbf16, #tpu.memory_space<vmem>>, vector<1x4x64xbf16>,
    %168 = vector.broadcast %91 : vector<1x1xf32> to vector<4x64xf32>
    %169 = arith.subf %51, %168 : vector<4x64xf32>
    %170 = vector.broadcast %129 : vector<1x1xf32> to vector<4x64xf32>
    %171 = arith.mulf %169, %170 : vector<4x64xf32>
    %c2_78 = arith.constant 2 : index
    %c0_79 = arith.constant 0 : index
    %c0_80 = arith.constant 0 : index
    %172 = vector.load %arg4[%c2_78, %c0_79, %c0_80] : memref<4x4x64xf32, #tpu.memory_space<vmem>>, vector<1x4x64xf32>
    %173 = vector.shape_cast %172 : vector<1x4x64xf32> to vector<4x64xf32>
    %174 = arith.mulf %171, %173 : vector<4x64xf32>
    %c2_81 = arith.constant 2 : index
    %c0_82 = arith.constant 0 : index
    %c0_83 = arith.constant 0 : index
    %175 = vector.load %arg5[%c2_81, %c0_82, %c0_83] : memref<4x4x64xf32, #tpu.memory_space<vmem>>, vector<1x4x64xf32>
    %176 = vector.shape_cast %175 : vector<1x4x64xf32> to vector<4x64xf32>
    %177 = arith.addf %174, %176 : vector<4x64xf32>
    %cst_84 = arith.constant 0.000000e+00 : f32
    %178 = vector.broadcast %cst_84 : f32 to vector<4x64xf32>
    %179 = arith.cmpf ogt, %177, %178 : vector<4x64xf32>
    %cst_85 = arith.constant 0.00999999977 : f32
    %180 = vector.broadcast %cst_85 : f32 to vector<4x64xf32>
    %181 = arith.mulf %180, %177 : vector<4x64xf32>
    %182 = arith.select %179, %177, %181 : vector<4x64xi1>, vector<4x64xf32>
    %183 = arith.truncf %182 : vector<4x64xf32> to vector<4x64xbf16>
    %c0_86 = arith.constant 0 : index
    %c0_87 = arith.constant 0 : index
    %c128 = arith.constant 128 : index
    %184 = vector.load %arg6[%c0_86, %c0_87, %c128] : memref<1x4x256xbf16, #tpu.memory_space<vmem>>, vector<1x4x64xbf16>
    %185 = vector.shape_cast %184 : vector<1x4x64xbf16> to vector<4x64xbf16>
    %186 = vector.shape_cast %183 : vector<4x64xbf16> to vector<1x4x64xbf16>
    tpu.vector_store %arg6[%c0_86, %c0_87, %c128], %186 {strides = array<i32>} : memref<1x4x256xbf16, #tpu.memory_space<vmem>>, vector<1x4x64xbf16>,
    %187 = vector.broadcast %91 : vector<1x1xf32> to vector<4x64xf32>
    %188 = arith.subf %68, %187 : vector<4x64xf32>
    %189 = vector.broadcast %129 : vector<1x1xf32> to vector<4x64xf32>
    %190 = arith.mulf %188, %189 : vector<4x64xf32>
    %c3_88 = arith.constant 3 : index
    %c0_89 = arith.constant 0 : index
    %c0_90 = arith.constant 0 : index
    %191 = vector.load %arg4[%c3_88, %c0_89, %c0_90] : memref<4x4x64xf32, #tpu.memory_space<vmem>>, vector<1x4x64xf32>
    %192 = vector.shape_cast %191 : vector<1x4x64xf32> to vector<4x64xf32>
    %193 = arith.mulf %190, %192 : vector<4x64xf32>
    %c3_91 = arith.constant 3 : index
    %c0_92 = arith.constant 0 : index
    %c0_93 = arith.constant 0 : index
    %194 = vector.load %arg5[%c3_91, %c0_92, %c0_93] : memref<4x4x64xf32, #tpu.memory_space<vmem>>, vector<1x4x64xf32>
    %195 = vector.shape_cast %194 : vector<1x4x64xf32> to vector<4x64xf32>
    %196 = arith.addf %193, %195 : vector<4x64xf32>
    %cst_94 = arith.constant 0.000000e+00 : f32
    %197 = vector.broadcast %cst_94 : f32 to vector<4x64xf32>
    %198 = arith.cmpf ogt, %196, %197 : vector<4x64xf32>
    %cst_95 = arith.constant 0.00999999977 : f32
    %199 = vector.broadcast %cst_95 : f32 to vector<4x64xf32>
    %200 = arith.mulf %199, %196 : vector<4x64xf32>
    %201 = arith.select %198, %196, %200 : vector<4x64xi1>, vector<4x64xf32>
    %202 = arith.truncf %201 : vector<4x64xf32> to vector<4x64xbf16>
    %c0_96 = arith.constant 0 : index
    %c0_97 = arith.constant 0 : index
    %c192 = arith.constant 192 : index
    %203 = vector.load %arg6[%c0_96, %c0_97, %c192] : memref<1x4x256xbf16, #tpu.memory_space<vmem>>, vector<1x4x64xbf16>
    %204 = vector.shape_cast %203 : vector<1x4x64xbf16> to vector<4x64xbf16>
    %205 = vector.shape_cast %202 : vector<4x64xbf16> to vector<1x4x64xbf16>
    tpu.vector_store %arg6[%c0_96, %c0_97, %c192], %205 {strides = array<i32>} : memref<1x4x256xbf16, #tpu.memory_space<vmem>>, vector<1x4x64xbf16>,
    return
  }
  func.func @transform_0(%arg0: i32) -> (i32, i32, i32) {
    %c0_i32 = arith.constant 0 : i32
    %c0_i32_0 = arith.constant 0 : i32
    %c0_i32_1 = arith.constant 0 : i32
    return %arg0, %c0_i32, %c0_i32_0 : i32, i32, i32
  }
  func.func @transform_1(%arg0: i32) -> (i32, i32, i32) {
    %c0_i32 = arith.constant 0 : i32
    %c0_i32_0 = arith.constant 0 : i32
    %c0_i32_1 = arith.constant 0 : i32
    %c0_i32_2 = arith.constant 0 : i32
    return %c0_i32, %c0_i32_0, %c0_i32_1 : i32, i32, i32
  }
  func.func @transform_2(%arg0: i32) -> (i32, i32) {
    %c0_i32 = arith.constant 0 : i32
    %c0_i32_0 = arith.constant 0 : i32
    %c0_i32_1 = arith.constant 0 : i32
    return %c0_i32, %c0_i32_0 : i32, i32
  }
  func.func @transform_3(%arg0: i32) -> (i32, i32, i32) {
    %c0_i32 = arith.constant 0 : i32
    %c0_i32_0 = arith.constant 0 : i32
    %c0_i32_1 = arith.constant 0 : i32
    %c0_i32_2 = arith.constant 0 : i32
    return %c0_i32, %c0_i32_0, %c0_i32_1 : i32, i32, i32
  }
  func.func @transform_4(%arg0: i32) -> (i32, i32, i32) {
    %c0_i32 = arith.constant 0 : i32
    %c0_i32_0 = arith.constant 0 : i32
    %c0_i32_1 = arith.constant 0 : i32
    %c0_i32_2 = arith.constant 0 : i32
    return %c0_i32, %c0_i32_0, %c0_i32_1 : i32, i32, i32
  }
  func.func @transform_5(%arg0: i32) -> (i32, i32, i32) {
    %c0_i32 = arith.constant 0 : i32
    %c0_i32_0 = arith.constant 0 : i32
    %c0_i32_1 = arith.constant 0 : i32
    return %arg0, %c0_i32, %c0_i32_0 : i32, i32, i32
  }
}

module attributes {stable_mosaic.version = 11 : i64} {
  func.func @_deconv_phase_kernel(%arg0: i32, %arg1: memref<1x21x64xbf16, #tpu.memory_space<vmem>>, %arg2: memref<9x64x32xbf16, #tpu.memory_space<vmem>>, %arg3: memref<1x32xf32, #tpu.memory_space<vmem>>, %arg4: memref<4x16x32xf32, #tpu.memory_space<vmem>>, %arg5: memref<4x16x32xf32, #tpu.memory_space<vmem>>, %arg6: memref<1x16x128xbf16, #tpu.memory_space<vmem>>) attributes {dimension_semantics = [#tpu.dimension_semantics<parallel>], iteration_bounds = array<i64: 2>, scalar_prefetch = 0 : i64, scratch_operands = 0 : i64, tpu.core_type = #tpu.core_type<tc>, window_params = [{transform_indices = @transform_0, window_bounds = array<i64: 1, 21, 64>}, {pipeline_mode = #tpu.pipeline_mode<synchronous>, transform_indices = @transform_1, window_bounds = array<i64: 9, 64, 32>}, {pipeline_mode = #tpu.pipeline_mode<synchronous>, transform_indices = @transform_2, window_bounds = array<i64: 1, 32>}, {pipeline_mode = #tpu.pipeline_mode<synchronous>, transform_indices = @transform_3, window_bounds = array<i64: 4, 16, 32>}, {pipeline_mode = #tpu.pipeline_mode<synchronous>, transform_indices = @transform_4, window_bounds = array<i64: 4, 16, 32>}, {transform_indices = @transform_5, window_bounds = array<i64: 1, 16, 128>}]} {
    %c0 = arith.constant 0 : index
    %c0_0 = arith.constant 0 : index
    %c0_1 = arith.constant 0 : index
    %0 = vector.load %arg1[%c0, %c0_0, %c0_1] : memref<1x21x64xbf16, #tpu.memory_space<vmem>>, vector<1x21x64xbf16>
    %1 = vector.shape_cast %0 : vector<1x21x64xbf16> to vector<21x64xbf16>
    %2 = vector.extract_strided_slice %1 {offsets = [0, 0], sizes = [16, 64], strides = [1, 1]} : vector<21x64xbf16> to vector<16x64xbf16>
    %3 = vector.extract_strided_slice %1 {offsets = [1, 0], sizes = [16, 64], strides = [1, 1]} : vector<21x64xbf16> to vector<16x64xbf16>
    %4 = vector.extract_strided_slice %1 {offsets = [4, 0], sizes = [16, 64], strides = [1, 1]} : vector<21x64xbf16> to vector<16x64xbf16>
    %5 = vector.extract_strided_slice %1 {offsets = [5, 0], sizes = [16, 64], strides = [1, 1]} : vector<21x64xbf16> to vector<16x64xbf16>
    %6 = tpu.iota {dimensions = array<i32: 0>} : vector<16x64xi32>
    %c4_i32 = arith.constant 4 : i32
    %c0_i32 = arith.constant 0 : i32
    %7 = arith.cmpi eq, %c4_i32, %c0_i32 : i32
    %c1_i32 = arith.constant 1 : i32
    %8 = arith.select %7, %c1_i32, %c4_i32 : i32
    %9 = vector.broadcast %8 : i32 to vector<16x64xi32>
    %10 = arith.remsi %6, %9 : vector<16x64xi32>
    %c0_i32_2 = arith.constant 0 : i32
    %11 = vector.broadcast %c0_i32_2 : i32 to vector<16x64xi32>
    %12 = arith.cmpi ne, %10, %11 : vector<16x64xi32>
    %c0_i32_3 = arith.constant 0 : i32
    %13 = vector.broadcast %c0_i32_3 : i32 to vector<16x64xi32>
    %14 = arith.cmpi slt, %10, %13 : vector<16x64xi32>
    %c0_i32_4 = arith.constant 0 : i32
    %15 = arith.cmpi slt, %8, %c0_i32_4 : i32
    %16 = vector.broadcast %15 : i1 to vector<16x64xi1>
    %17 = vector.broadcast %16 : vector<16x64xi1> to vector<16x64xi1>
    %18 = arith.xori %14, %17 : vector<16x64xi1>
    %19 = arith.andi %18, %12 : vector<16x64xi1>
    %20 = vector.broadcast %8 : i32 to vector<16x64xi32>
    %21 = arith.addi %10, %20 : vector<16x64xi32>
    %22 = arith.select %19, %21, %10 : vector<16x64xi1>, vector<16x64xi32>
    %c3_i32 = arith.constant 3 : i32
    %23 = vector.broadcast %c3_i32 : i32 to vector<16x64xi32>
    %24 = arith.cmpi slt, %22, %23 : vector<16x64xi32>
    %cst = arith.constant 0.000000e+00 : bf16
    %25 = vector.broadcast %cst : bf16 to vector<16x64xbf16>
    %26 = arith.select %24, %3, %25 : vector<16x64xi1>, vector<16x64xbf16>
    %27 = arith.select %24, %5, %25 : vector<16x64xi1>, vector<16x64xbf16>
    %c0_5 = arith.constant 0 : index
    %c0_6 = arith.constant 0 : index
    %28 = vector.load %arg3[%c0_5, %c0_6] : memref<1x32xf32, #tpu.memory_space<vmem>>, vector<1x32xf32>
    %c4 = arith.constant 4 : index
    %c0_7 = arith.constant 0 : index
    %c0_8 = arith.constant 0 : index
    %29 = vector.load %arg2[%c4, %c0_7, %c0_8] : memref<9x64x32xbf16, #tpu.memory_space<vmem>>, vector<1x64x32xbf16>
    %30 = vector.shape_cast %29 : vector<1x64x32xbf16> to vector<64x32xbf16>
    %cst_9 = arith.constant dense<0.000000e+00> : vector<16x32xf32>
    %31 = tpu.matmul %2, %30, %cst_9 {dimension_numbers = #tpu.dot_dimension_numbers<[1], [0], [0], [1], [0, 0, 1, 1], [], []>} : vector<16x64xbf16>, vector<64x32xbf16>, vector<16x32xf32> -> vector<16x32xf32>
    %32 = vector.broadcast %28 : vector<1x32xf32> to vector<16x32xf32>
    %33 = arith.addf %31, %32 : vector<16x32xf32>
    %c3 = arith.constant 3 : index
    %c0_10 = arith.constant 0 : index
    %c0_11 = arith.constant 0 : index
    %34 = vector.load %arg2[%c3, %c0_10, %c0_11] : memref<9x64x32xbf16, #tpu.memory_space<vmem>>, vector<1x64x32xbf16>
    %35 = vector.shape_cast %34 : vector<1x64x32xbf16> to vector<64x32xbf16>
    %cst_12 = arith.constant dense<0.000000e+00> : vector<16x32xf32>
    %36 = tpu.matmul %26, %35, %cst_12 {dimension_numbers = #tpu.dot_dimension_numbers<[1], [0], [0], [1], [0, 0, 1, 1], [], []>} : vector<16x64xbf16>, vector<64x32xbf16>, vector<16x32xf32> -> vector<16x32xf32>
    %c5 = arith.constant 5 : index
    %c0_13 = arith.constant 0 : index
    %c0_14 = arith.constant 0 : index
    %37 = vector.load %arg2[%c5, %c0_13, %c0_14] : memref<9x64x32xbf16, #tpu.memory_space<vmem>>, vector<1x64x32xbf16>
    %38 = vector.shape_cast %37 : vector<1x64x32xbf16> to vector<64x32xbf16>
    %cst_15 = arith.constant dense<0.000000e+00> : vector<16x32xf32>
    %39 = tpu.matmul %2, %38, %cst_15 {dimension_numbers = #tpu.dot_dimension_numbers<[1], [0], [0], [1], [0, 0, 1, 1], [], []>} : vector<16x64xbf16>, vector<64x32xbf16>, vector<16x32xf32> -> vector<16x32xf32>
    %40 = arith.addf %36, %39 : vector<16x32xf32>
    %41 = vector.broadcast %28 : vector<1x32xf32> to vector<16x32xf32>
    %42 = arith.addf %40, %41 : vector<16x32xf32>
    %c1 = arith.constant 1 : index
    %c0_16 = arith.constant 0 : index
    %c0_17 = arith.constant 0 : index
    %43 = vector.load %arg2[%c1, %c0_16, %c0_17] : memref<9x64x32xbf16, #tpu.memory_space<vmem>>, vector<1x64x32xbf16>
    %44 = vector.shape_cast %43 : vector<1x64x32xbf16> to vector<64x32xbf16>
    %cst_18 = arith.constant dense<0.000000e+00> : vector<16x32xf32>
    %45 = tpu.matmul %4, %44, %cst_18 {dimension_numbers = #tpu.dot_dimension_numbers<[1], [0], [0], [1], [0, 0, 1, 1], [], []>} : vector<16x64xbf16>, vector<64x32xbf16>, vector<16x32xf32> -> vector<16x32xf32>
    %c7 = arith.constant 7 : index
    %c0_19 = arith.constant 0 : index
    %c0_20 = arith.constant 0 : index
    %46 = vector.load %arg2[%c7, %c0_19, %c0_20] : memref<9x64x32xbf16, #tpu.memory_space<vmem>>, vector<1x64x32xbf16>
    %47 = vector.shape_cast %46 : vector<1x64x32xbf16> to vector<64x32xbf16>
    %cst_21 = arith.constant dense<0.000000e+00> : vector<16x32xf32>
    %48 = tpu.matmul %2, %47, %cst_21 {dimension_numbers = #tpu.dot_dimension_numbers<[1], [0], [0], [1], [0, 0, 1, 1], [], []>} : vector<16x64xbf16>, vector<64x32xbf16>, vector<16x32xf32> -> vector<16x32xf32>
    %49 = arith.addf %45, %48 : vector<16x32xf32>
    %50 = vector.broadcast %28 : vector<1x32xf32> to vector<16x32xf32>
    %51 = arith.addf %49, %50 : vector<16x32xf32>
    %c0_22 = arith.constant 0 : index
    %c0_23 = arith.constant 0 : index
    %c0_24 = arith.constant 0 : index
    %52 = vector.load %arg2[%c0_22, %c0_23, %c0_24] : memref<9x64x32xbf16, #tpu.memory_space<vmem>>, vector<1x64x32xbf16>
    %53 = vector.shape_cast %52 : vector<1x64x32xbf16> to vector<64x32xbf16>
    %cst_25 = arith.constant dense<0.000000e+00> : vector<16x32xf32>
    %54 = tpu.matmul %27, %53, %cst_25 {dimension_numbers = #tpu.dot_dimension_numbers<[1], [0], [0], [1], [0, 0, 1, 1], [], []>} : vector<16x64xbf16>, vector<64x32xbf16>, vector<16x32xf32> -> vector<16x32xf32>
    %c2 = arith.constant 2 : index
    %c0_26 = arith.constant 0 : index
    %c0_27 = arith.constant 0 : index
    %55 = vector.load %arg2[%c2, %c0_26, %c0_27] : memref<9x64x32xbf16, #tpu.memory_space<vmem>>, vector<1x64x32xbf16>
    %56 = vector.shape_cast %55 : vector<1x64x32xbf16> to vector<64x32xbf16>
    %cst_28 = arith.constant dense<0.000000e+00> : vector<16x32xf32>
    %57 = tpu.matmul %4, %56, %cst_28 {dimension_numbers = #tpu.dot_dimension_numbers<[1], [0], [0], [1], [0, 0, 1, 1], [], []>} : vector<16x64xbf16>, vector<64x32xbf16>, vector<16x32xf32> -> vector<16x32xf32>
    %58 = arith.addf %54, %57 : vector<16x32xf32>
    %c6 = arith.constant 6 : index
    %c0_29 = arith.constant 0 : index
    %c0_30 = arith.constant 0 : index
    %59 = vector.load %arg2[%c6, %c0_29, %c0_30] : memref<9x64x32xbf16, #tpu.memory_space<vmem>>, vector<1x64x32xbf16>
    %60 = vector.shape_cast %59 : vector<1x64x32xbf16> to vector<64x32xbf16>
    %cst_31 = arith.constant dense<0.000000e+00> : vector<16x32xf32>
    %61 = tpu.matmul %26, %60, %cst_31 {dimension_numbers = #tpu.dot_dimension_numbers<[1], [0], [0], [1], [0, 0, 1, 1], [], []>} : vector<16x64xbf16>, vector<64x32xbf16>, vector<16x32xf32> -> vector<16x32xf32>
    %62 = arith.addf %58, %61 : vector<16x32xf32>
    %c8 = arith.constant 8 : index
    %c0_32 = arith.constant 0 : index
    %c0_33 = arith.constant 0 : index
    %63 = vector.load %arg2[%c8, %c0_32, %c0_33] : memref<9x64x32xbf16, #tpu.memory_space<vmem>>, vector<1x64x32xbf16>
    %64 = vector.shape_cast %63 : vector<1x64x32xbf16> to vector<64x32xbf16>
    %cst_34 = arith.constant dense<0.000000e+00> : vector<16x32xf32>
    %65 = tpu.matmul %2, %64, %cst_34 {dimension_numbers = #tpu.dot_dimension_numbers<[1], [0], [0], [1], [0, 0, 1, 1], [], []>} : vector<16x64xbf16>, vector<64x32xbf16>, vector<16x32xf32> -> vector<16x32xf32>
    %66 = arith.addf %62, %65 : vector<16x32xf32>
    %67 = vector.broadcast %28 : vector<1x32xf32> to vector<16x32xf32>
    %68 = arith.addf %66, %67 : vector<16x32xf32>
    %cst_35 = arith.constant 0.000000e+00 : f32
    %69 = vector.broadcast %cst_35 : f32 to vector<1x1xf32>
    %cst_36 = arith.constant dense<0.000000e+00> : vector<16xf32>
    %70 = vector.multi_reduction <add>, %33, %cst_36 [1] : vector<16x32xf32> to vector<16xf32>
    %71 = vector.shape_cast %70 : vector<16xf32> to vector<16x1xf32>
    %cst_37 = arith.constant dense<0.000000e+00> : vector<1xf32>
    %72 = vector.multi_reduction <add>, %71, %cst_37 [0] : vector<16x1xf32> to vector<1xf32>
    %73 = vector.shape_cast %72 : vector<1xf32> to vector<1x1xf32>
    %74 = arith.addf %69, %73 : vector<1x1xf32>
    %cst_38 = arith.constant dense<0.000000e+00> : vector<16xf32>
    %75 = vector.multi_reduction <add>, %42, %cst_38 [1] : vector<16x32xf32> to vector<16xf32>
    %76 = vector.shape_cast %75 : vector<16xf32> to vector<16x1xf32>
    %cst_39 = arith.constant dense<0.000000e+00> : vector<1xf32>
    %77 = vector.multi_reduction <add>, %76, %cst_39 [0] : vector<16x1xf32> to vector<1xf32>
    %78 = vector.shape_cast %77 : vector<1xf32> to vector<1x1xf32>
    %79 = arith.addf %74, %78 : vector<1x1xf32>
    %cst_40 = arith.constant dense<0.000000e+00> : vector<16xf32>
    %80 = vector.multi_reduction <add>, %51, %cst_40 [1] : vector<16x32xf32> to vector<16xf32>
    %81 = vector.shape_cast %80 : vector<16xf32> to vector<16x1xf32>
    %cst_41 = arith.constant dense<0.000000e+00> : vector<1xf32>
    %82 = vector.multi_reduction <add>, %81, %cst_41 [0] : vector<16x1xf32> to vector<1xf32>
    %83 = vector.shape_cast %82 : vector<1xf32> to vector<1x1xf32>
    %84 = arith.addf %79, %83 : vector<1x1xf32>
    %cst_42 = arith.constant dense<0.000000e+00> : vector<16xf32>
    %85 = vector.multi_reduction <add>, %68, %cst_42 [1] : vector<16x32xf32> to vector<16xf32>
    %86 = vector.shape_cast %85 : vector<16xf32> to vector<16x1xf32>
    %cst_43 = arith.constant dense<0.000000e+00> : vector<1xf32>
    %87 = vector.multi_reduction <add>, %86, %cst_43 [0] : vector<16x1xf32> to vector<1xf32>
    %88 = vector.shape_cast %87 : vector<1xf32> to vector<1x1xf32>
    %89 = arith.addf %84, %88 : vector<1x1xf32>
    %cst_44 = arith.constant 4.8828125E-4 : f32
    %90 = vector.broadcast %cst_44 : f32 to vector<1x1xf32>
    %91 = arith.mulf %89, %90 : vector<1x1xf32>
    %cst_45 = arith.constant 0.000000e+00 : f32
    %92 = vector.broadcast %cst_45 : f32 to vector<1x1xf32>
    %93 = vector.broadcast %91 : vector<1x1xf32> to vector<16x32xf32>
    %94 = arith.subf %33, %93 : vector<16x32xf32>
    %95 = arith.mulf %94, %94 : vector<16x32xf32>
    %cst_46 = arith.constant dense<0.000000e+00> : vector<16xf32>
    %96 = vector.multi_reduction <add>, %95, %cst_46 [1] : vector<16x32xf32> to vector<16xf32>
    %97 = vector.shape_cast %96 : vector<16xf32> to vector<16x1xf32>
    %cst_47 = arith.constant dense<0.000000e+00> : vector<1xf32>
    %98 = vector.multi_reduction <add>, %97, %cst_47 [0] : vector<16x1xf32> to vector<1xf32>
    %99 = vector.shape_cast %98 : vector<1xf32> to vector<1x1xf32>
    %100 = arith.addf %92, %99 : vector<1x1xf32>
    %101 = vector.broadcast %91 : vector<1x1xf32> to vector<16x32xf32>
    %102 = arith.subf %42, %101 : vector<16x32xf32>
    %103 = arith.mulf %102, %102 : vector<16x32xf32>
    %cst_48 = arith.constant dense<0.000000e+00> : vector<16xf32>
    %104 = vector.multi_reduction <add>, %103, %cst_48 [1] : vector<16x32xf32> to vector<16xf32>
    %105 = vector.shape_cast %104 : vector<16xf32> to vector<16x1xf32>
    %cst_49 = arith.constant dense<0.000000e+00> : vector<1xf32>
    %106 = vector.multi_reduction <add>, %105, %cst_49 [0] : vector<16x1xf32> to vector<1xf32>
    %107 = vector.shape_cast %106 : vector<1xf32> to vector<1x1xf32>
    %108 = arith.addf %100, %107 : vector<1x1xf32>
    %109 = vector.broadcast %91 : vector<1x1xf32> to vector<16x32xf32>
    %110 = arith.subf %51, %109 : vector<16x32xf32>
    %111 = arith.mulf %110, %110 : vector<16x32xf32>
    %cst_50 = arith.constant dense<0.000000e+00> : vector<16xf32>
    %112 = vector.multi_reduction <add>, %111, %cst_50 [1] : vector<16x32xf32> to vector<16xf32>
    %113 = vector.shape_cast %112 : vector<16xf32> to vector<16x1xf32>
    %cst_51 = arith.constant dense<0.000000e+00> : vector<1xf32>
    %114 = vector.multi_reduction <add>, %113, %cst_51 [0] : vector<16x1xf32> to vector<1xf32>
    %115 = vector.shape_cast %114 : vector<1xf32> to vector<1x1xf32>
    %116 = arith.addf %108, %115 : vector<1x1xf32>
    %117 = vector.broadcast %91 : vector<1x1xf32> to vector<16x32xf32>
    %118 = arith.subf %68, %117 : vector<16x32xf32>
    %119 = arith.mulf %118, %118 : vector<16x32xf32>
    %cst_52 = arith.constant dense<0.000000e+00> : vector<16xf32>
    %120 = vector.multi_reduction <add>, %119, %cst_52 [1] : vector<16x32xf32> to vector<16xf32>
    %121 = vector.shape_cast %120 : vector<16xf32> to vector<16x1xf32>
    %cst_53 = arith.constant dense<0.000000e+00> : vector<1xf32>
    %122 = vector.multi_reduction <add>, %121, %cst_53 [0] : vector<16x1xf32> to vector<1xf32>
    %123 = vector.shape_cast %122 : vector<1xf32> to vector<1x1xf32>
    %124 = arith.addf %116, %123 : vector<1x1xf32>
    %cst_54 = arith.constant 4.8828125E-4 : f32
    %125 = vector.broadcast %cst_54 : f32 to vector<1x1xf32>
    %126 = arith.mulf %124, %125 : vector<1x1xf32>
    %cst_55 = arith.constant 9.99999974E-6 : f32
    %127 = vector.broadcast %cst_55 : f32 to vector<1x1xf32>
    %128 = arith.addf %126, %127 : vector<1x1xf32>
    %129 = math.rsqrt %128 : vector<1x1xf32>
    %130 = vector.broadcast %91 : vector<1x1xf32> to vector<16x32xf32>
    %131 = arith.subf %33, %130 : vector<16x32xf32>
    %132 = vector.broadcast %129 : vector<1x1xf32> to vector<16x32xf32>
    %133 = arith.mulf %131, %132 : vector<16x32xf32>
    %c0_56 = arith.constant 0 : index
    %c0_57 = arith.constant 0 : index
    %c0_58 = arith.constant 0 : index
    %134 = vector.load %arg4[%c0_56, %c0_57, %c0_58] : memref<4x16x32xf32, #tpu.memory_space<vmem>>, vector<1x16x32xf32>
    %135 = vector.shape_cast %134 : vector<1x16x32xf32> to vector<16x32xf32>
    %136 = arith.mulf %133, %135 : vector<16x32xf32>
    %c0_59 = arith.constant 0 : index
    %c0_60 = arith.constant 0 : index
    %c0_61 = arith.constant 0 : index
    %137 = vector.load %arg5[%c0_59, %c0_60, %c0_61] : memref<4x16x32xf32, #tpu.memory_space<vmem>>, vector<1x16x32xf32>
    %138 = vector.shape_cast %137 : vector<1x16x32xf32> to vector<16x32xf32>
    %139 = arith.addf %136, %138 : vector<16x32xf32>
    %cst_62 = arith.constant 0.000000e+00 : f32
    %140 = vector.broadcast %cst_62 : f32 to vector<16x32xf32>
    %141 = arith.cmpf ogt, %139, %140 : vector<16x32xf32>
    %cst_63 = arith.constant 0.00999999977 : f32
    %142 = vector.broadcast %cst_63 : f32 to vector<16x32xf32>
    %143 = arith.mulf %142, %139 : vector<16x32xf32>
    %144 = arith.select %141, %139, %143 : vector<16x32xi1>, vector<16x32xf32>
    %145 = arith.truncf %144 : vector<16x32xf32> to vector<16x32xbf16>
    %c0_64 = arith.constant 0 : index
    %c0_65 = arith.constant 0 : index
    %c0_66 = arith.constant 0 : index
    %146 = vector.load %arg6[%c0_64, %c0_65, %c0_66] : memref<1x16x128xbf16, #tpu.memory_space<vmem>>, vector<1x16x32xbf16>
    %147 = vector.shape_cast %146 : vector<1x16x32xbf16> to vector<16x32xbf16>
    %148 = vector.shape_cast %145 : vector<16x32xbf16> to vector<1x16x32xbf16>
    tpu.vector_store %arg6[%c0_64, %c0_65, %c0_66], %148 {strides = array<i32>} : memref<1x16x128xbf16, #tpu.memory_space<vmem>>, vector<1x16x32xbf16>,
    %149 = vector.broadcast %91 : vector<1x1xf32> to vector<16x32xf32>
    %150 = arith.subf %42, %149 : vector<16x32xf32>
    %151 = vector.broadcast %129 : vector<1x1xf32> to vector<16x32xf32>
    %152 = arith.mulf %150, %151 : vector<16x32xf32>
    %c1_67 = arith.constant 1 : index
    %c0_68 = arith.constant 0 : index
    %c0_69 = arith.constant 0 : index
    %153 = vector.load %arg4[%c1_67, %c0_68, %c0_69] : memref<4x16x32xf32, #tpu.memory_space<vmem>>, vector<1x16x32xf32>
    %154 = vector.shape_cast %153 : vector<1x16x32xf32> to vector<16x32xf32>
    %155 = arith.mulf %152, %154 : vector<16x32xf32>
    %c1_70 = arith.constant 1 : index
    %c0_71 = arith.constant 0 : index
    %c0_72 = arith.constant 0 : index
    %156 = vector.load %arg5[%c1_70, %c0_71, %c0_72] : memref<4x16x32xf32, #tpu.memory_space<vmem>>, vector<1x16x32xf32>
    %157 = vector.shape_cast %156 : vector<1x16x32xf32> to vector<16x32xf32>
    %158 = arith.addf %155, %157 : vector<16x32xf32>
    %cst_73 = arith.constant 0.000000e+00 : f32
    %159 = vector.broadcast %cst_73 : f32 to vector<16x32xf32>
    %160 = arith.cmpf ogt, %158, %159 : vector<16x32xf32>
    %cst_74 = arith.constant 0.00999999977 : f32
    %161 = vector.broadcast %cst_74 : f32 to vector<16x32xf32>
    %162 = arith.mulf %161, %158 : vector<16x32xf32>
    %163 = arith.select %160, %158, %162 : vector<16x32xi1>, vector<16x32xf32>
    %164 = arith.truncf %163 : vector<16x32xf32> to vector<16x32xbf16>
    %c0_75 = arith.constant 0 : index
    %c0_76 = arith.constant 0 : index
    %c32 = arith.constant 32 : index
    %165 = vector.load %arg6[%c0_75, %c0_76, %c32] : memref<1x16x128xbf16, #tpu.memory_space<vmem>>, vector<1x16x32xbf16>
    %166 = vector.shape_cast %165 : vector<1x16x32xbf16> to vector<16x32xbf16>
    %167 = vector.shape_cast %164 : vector<16x32xbf16> to vector<1x16x32xbf16>
    tpu.vector_store %arg6[%c0_75, %c0_76, %c32], %167 {strides = array<i32>} : memref<1x16x128xbf16, #tpu.memory_space<vmem>>, vector<1x16x32xbf16>,
    %168 = vector.broadcast %91 : vector<1x1xf32> to vector<16x32xf32>
    %169 = arith.subf %51, %168 : vector<16x32xf32>
    %170 = vector.broadcast %129 : vector<1x1xf32> to vector<16x32xf32>
    %171 = arith.mulf %169, %170 : vector<16x32xf32>
    %c2_77 = arith.constant 2 : index
    %c0_78 = arith.constant 0 : index
    %c0_79 = arith.constant 0 : index
    %172 = vector.load %arg4[%c2_77, %c0_78, %c0_79] : memref<4x16x32xf32, #tpu.memory_space<vmem>>, vector<1x16x32xf32>
    %173 = vector.shape_cast %172 : vector<1x16x32xf32> to vector<16x32xf32>
    %174 = arith.mulf %171, %173 : vector<16x32xf32>
    %c2_80 = arith.constant 2 : index
    %c0_81 = arith.constant 0 : index
    %c0_82 = arith.constant 0 : index
    %175 = vector.load %arg5[%c2_80, %c0_81, %c0_82] : memref<4x16x32xf32, #tpu.memory_space<vmem>>, vector<1x16x32xf32>
    %176 = vector.shape_cast %175 : vector<1x16x32xf32> to vector<16x32xf32>
    %177 = arith.addf %174, %176 : vector<16x32xf32>
    %cst_83 = arith.constant 0.000000e+00 : f32
    %178 = vector.broadcast %cst_83 : f32 to vector<16x32xf32>
    %179 = arith.cmpf ogt, %177, %178 : vector<16x32xf32>
    %cst_84 = arith.constant 0.00999999977 : f32
    %180 = vector.broadcast %cst_84 : f32 to vector<16x32xf32>
    %181 = arith.mulf %180, %177 : vector<16x32xf32>
    %182 = arith.select %179, %177, %181 : vector<16x32xi1>, vector<16x32xf32>
    %183 = arith.truncf %182 : vector<16x32xf32> to vector<16x32xbf16>
    %c0_85 = arith.constant 0 : index
    %c0_86 = arith.constant 0 : index
    %c64 = arith.constant 64 : index
    %184 = vector.load %arg6[%c0_85, %c0_86, %c64] : memref<1x16x128xbf16, #tpu.memory_space<vmem>>, vector<1x16x32xbf16>
    %185 = vector.shape_cast %184 : vector<1x16x32xbf16> to vector<16x32xbf16>
    %186 = vector.shape_cast %183 : vector<16x32xbf16> to vector<1x16x32xbf16>
    tpu.vector_store %arg6[%c0_85, %c0_86, %c64], %186 {strides = array<i32>} : memref<1x16x128xbf16, #tpu.memory_space<vmem>>, vector<1x16x32xbf16>,
    %187 = vector.broadcast %91 : vector<1x1xf32> to vector<16x32xf32>
    %188 = arith.subf %68, %187 : vector<16x32xf32>
    %189 = vector.broadcast %129 : vector<1x1xf32> to vector<16x32xf32>
    %190 = arith.mulf %188, %189 : vector<16x32xf32>
    %c3_87 = arith.constant 3 : index
    %c0_88 = arith.constant 0 : index
    %c0_89 = arith.constant 0 : index
    %191 = vector.load %arg4[%c3_87, %c0_88, %c0_89] : memref<4x16x32xf32, #tpu.memory_space<vmem>>, vector<1x16x32xf32>
    %192 = vector.shape_cast %191 : vector<1x16x32xf32> to vector<16x32xf32>
    %193 = arith.mulf %190, %192 : vector<16x32xf32>
    %c3_90 = arith.constant 3 : index
    %c0_91 = arith.constant 0 : index
    %c0_92 = arith.constant 0 : index
    %194 = vector.load %arg5[%c3_90, %c0_91, %c0_92] : memref<4x16x32xf32, #tpu.memory_space<vmem>>, vector<1x16x32xf32>
    %195 = vector.shape_cast %194 : vector<1x16x32xf32> to vector<16x32xf32>
    %196 = arith.addf %193, %195 : vector<16x32xf32>
    %cst_93 = arith.constant 0.000000e+00 : f32
    %197 = vector.broadcast %cst_93 : f32 to vector<16x32xf32>
    %198 = arith.cmpf ogt, %196, %197 : vector<16x32xf32>
    %cst_94 = arith.constant 0.00999999977 : f32
    %199 = vector.broadcast %cst_94 : f32 to vector<16x32xf32>
    %200 = arith.mulf %199, %196 : vector<16x32xf32>
    %201 = arith.select %198, %196, %200 : vector<16x32xi1>, vector<16x32xf32>
    %202 = arith.truncf %201 : vector<16x32xf32> to vector<16x32xbf16>
    %c0_95 = arith.constant 0 : index
    %c0_96 = arith.constant 0 : index
    %c96 = arith.constant 96 : index
    %203 = vector.load %arg6[%c0_95, %c0_96, %c96] : memref<1x16x128xbf16, #tpu.memory_space<vmem>>, vector<1x16x32xbf16>
    %204 = vector.shape_cast %203 : vector<1x16x32xbf16> to vector<16x32xbf16>
    %205 = vector.shape_cast %202 : vector<16x32xbf16> to vector<1x16x32xbf16>
    tpu.vector_store %arg6[%c0_95, %c0_96, %c96], %205 {strides = array<i32>} : memref<1x16x128xbf16, #tpu.memory_space<vmem>>, vector<1x16x32xbf16>,
    return
  }
  func.func @transform_0(%arg0: i32) -> (i32, i32, i32) {
    %c0_i32 = arith.constant 0 : i32
    %c0_i32_0 = arith.constant 0 : i32
    %c0_i32_1 = arith.constant 0 : i32
    return %arg0, %c0_i32, %c0_i32_0 : i32, i32, i32
  }
  func.func @transform_1(%arg0: i32) -> (i32, i32, i32) {
    %c0_i32 = arith.constant 0 : i32
    %c0_i32_0 = arith.constant 0 : i32
    %c0_i32_1 = arith.constant 0 : i32
    %c0_i32_2 = arith.constant 0 : i32
    return %c0_i32, %c0_i32_0, %c0_i32_1 : i32, i32, i32
  }
  func.func @transform_2(%arg0: i32) -> (i32, i32) {
    %c0_i32 = arith.constant 0 : i32
    %c0_i32_0 = arith.constant 0 : i32
    %c0_i32_1 = arith.constant 0 : i32
    return %c0_i32, %c0_i32_0 : i32, i32
  }
  func.func @transform_3(%arg0: i32) -> (i32, i32, i32) {
    %c0_i32 = arith.constant 0 : i32
    %c0_i32_0 = arith.constant 0 : i32
    %c0_i32_1 = arith.constant 0 : i32
    %c0_i32_2 = arith.constant 0 : i32
    return %c0_i32, %c0_i32_0, %c0_i32_1 : i32, i32, i32
  }
  func.func @transform_4(%arg0: i32) -> (i32, i32, i32) {
    %c0_i32 = arith.constant 0 : i32
    %c0_i32_0 = arith.constant 0 : i32
    %c0_i32_1 = arith.constant 0 : i32
    %c0_i32_2 = arith.constant 0 : i32
    return %c0_i32, %c0_i32_0, %c0_i32_1 : i32, i32, i32
  }
  func.func @transform_5(%arg0: i32) -> (i32, i32, i32) {
    %c0_i32 = arith.constant 0 : i32
    %c0_i32_0 = arith.constant 0 : i32
    %c0_i32_1 = arith.constant 0 : i32
    return %arg0, %c0_i32, %c0_i32_0 : i32, i32, i32
  }
}

module attributes {stable_mosaic.version = 11 : i64} {
  func.func @_deconv_phase_kernel(%arg0: i32, %arg1: memref<1x73x32xbf16, #tpu.memory_space<vmem>>, %arg2: memref<9x32x32xbf16, #tpu.memory_space<vmem>>, %arg3: memref<1x32xf32, #tpu.memory_space<vmem>>, %arg4: memref<1x64x128xf32, #tpu.memory_space<vmem>>) attributes {dimension_semantics = [#tpu.dimension_semantics<parallel>], iteration_bounds = array<i64: 2>, scalar_prefetch = 0 : i64, scratch_operands = 0 : i64, tpu.core_type = #tpu.core_type<tc>, window_params = [{transform_indices = @transform_0, window_bounds = array<i64: 1, 73, 32>}, {pipeline_mode = #tpu.pipeline_mode<synchronous>, transform_indices = @transform_1, window_bounds = array<i64: 9, 32, 32>}, {pipeline_mode = #tpu.pipeline_mode<synchronous>, transform_indices = @transform_2, window_bounds = array<i64: 1, 32>}, {transform_indices = @transform_3, window_bounds = array<i64: 1, 64, 128>}]} {
    %c0 = arith.constant 0 : index
    %c0_0 = arith.constant 0 : index
    %c0_1 = arith.constant 0 : index
    %0 = vector.load %arg1[%c0, %c0_0, %c0_1] : memref<1x73x32xbf16, #tpu.memory_space<vmem>>, vector<1x73x32xbf16>
    %1 = vector.shape_cast %0 : vector<1x73x32xbf16> to vector<73x32xbf16>
    %2 = vector.extract_strided_slice %1 {offsets = [0, 0], sizes = [64, 32], strides = [1, 1]} : vector<73x32xbf16> to vector<64x32xbf16>
    %3 = vector.extract_strided_slice %1 {offsets = [1, 0], sizes = [64, 32], strides = [1, 1]} : vector<73x32xbf16> to vector<64x32xbf16>
    %4 = vector.extract_strided_slice %1 {offsets = [8, 0], sizes = [64, 32], strides = [1, 1]} : vector<73x32xbf16> to vector<64x32xbf16>
    %5 = vector.extract_strided_slice %1 {offsets = [9, 0], sizes = [64, 32], strides = [1, 1]} : vector<73x32xbf16> to vector<64x32xbf16>
    %6 = tpu.iota {dimensions = array<i32: 0>} : vector<64x32xi32>
    %c8_i32 = arith.constant 8 : i32
    %c0_i32 = arith.constant 0 : i32
    %7 = arith.cmpi eq, %c8_i32, %c0_i32 : i32
    %c1_i32 = arith.constant 1 : i32
    %8 = arith.select %7, %c1_i32, %c8_i32 : i32
    %9 = vector.broadcast %8 : i32 to vector<64x32xi32>
    %10 = arith.remsi %6, %9 : vector<64x32xi32>
    %c0_i32_2 = arith.constant 0 : i32
    %11 = vector.broadcast %c0_i32_2 : i32 to vector<64x32xi32>
    %12 = arith.cmpi ne, %10, %11 : vector<64x32xi32>
    %c0_i32_3 = arith.constant 0 : i32
    %13 = vector.broadcast %c0_i32_3 : i32 to vector<64x32xi32>
    %14 = arith.cmpi slt, %10, %13 : vector<64x32xi32>
    %c0_i32_4 = arith.constant 0 : i32
    %15 = arith.cmpi slt, %8, %c0_i32_4 : i32
    %16 = vector.broadcast %15 : i1 to vector<64x32xi1>
    %17 = vector.broadcast %16 : vector<64x32xi1> to vector<64x32xi1>
    %18 = arith.xori %14, %17 : vector<64x32xi1>
    %19 = arith.andi %18, %12 : vector<64x32xi1>
    %20 = vector.broadcast %8 : i32 to vector<64x32xi32>
    %21 = arith.addi %10, %20 : vector<64x32xi32>
    %22 = arith.select %19, %21, %10 : vector<64x32xi1>, vector<64x32xi32>
    %c7_i32 = arith.constant 7 : i32
    %23 = vector.broadcast %c7_i32 : i32 to vector<64x32xi32>
    %24 = arith.cmpi slt, %22, %23 : vector<64x32xi32>
    %cst = arith.constant 0.000000e+00 : bf16
    %25 = vector.broadcast %cst : bf16 to vector<64x32xbf16>
    %26 = arith.select %24, %3, %25 : vector<64x32xi1>, vector<64x32xbf16>
    %27 = arith.select %24, %5, %25 : vector<64x32xi1>, vector<64x32xbf16>
    %c0_5 = arith.constant 0 : index
    %c0_6 = arith.constant 0 : index
    %28 = vector.load %arg3[%c0_5, %c0_6] : memref<1x32xf32, #tpu.memory_space<vmem>>, vector<1x32xf32>
    %c4 = arith.constant 4 : index
    %c0_7 = arith.constant 0 : index
    %c0_8 = arith.constant 0 : index
    %29 = vector.load %arg2[%c4, %c0_7, %c0_8] : memref<9x32x32xbf16, #tpu.memory_space<vmem>>, vector<1x32x32xbf16>
    %30 = vector.shape_cast %29 : vector<1x32x32xbf16> to vector<32x32xbf16>
    %cst_9 = arith.constant dense<0.000000e+00> : vector<64x32xf32>
    %31 = tpu.matmul %2, %30, %cst_9 {dimension_numbers = #tpu.dot_dimension_numbers<[1], [0], [0], [1], [0, 0, 1, 1], [], []>} : vector<64x32xbf16>, vector<32x32xbf16>, vector<64x32xf32> -> vector<64x32xf32>
    %32 = vector.broadcast %28 : vector<1x32xf32> to vector<64x32xf32>
    %33 = arith.addf %31, %32 : vector<64x32xf32>
    %c3 = arith.constant 3 : index
    %c0_10 = arith.constant 0 : index
    %c0_11 = arith.constant 0 : index
    %34 = vector.load %arg2[%c3, %c0_10, %c0_11] : memref<9x32x32xbf16, #tpu.memory_space<vmem>>, vector<1x32x32xbf16>
    %35 = vector.shape_cast %34 : vector<1x32x32xbf16> to vector<32x32xbf16>
    %cst_12 = arith.constant dense<0.000000e+00> : vector<64x32xf32>
    %36 = tpu.matmul %26, %35, %cst_12 {dimension_numbers = #tpu.dot_dimension_numbers<[1], [0], [0], [1], [0, 0, 1, 1], [], []>} : vector<64x32xbf16>, vector<32x32xbf16>, vector<64x32xf32> -> vector<64x32xf32>
    %c5 = arith.constant 5 : index
    %c0_13 = arith.constant 0 : index
    %c0_14 = arith.constant 0 : index
    %37 = vector.load %arg2[%c5, %c0_13, %c0_14] : memref<9x32x32xbf16, #tpu.memory_space<vmem>>, vector<1x32x32xbf16>
    %38 = vector.shape_cast %37 : vector<1x32x32xbf16> to vector<32x32xbf16>
    %cst_15 = arith.constant dense<0.000000e+00> : vector<64x32xf32>
    %39 = tpu.matmul %2, %38, %cst_15 {dimension_numbers = #tpu.dot_dimension_numbers<[1], [0], [0], [1], [0, 0, 1, 1], [], []>} : vector<64x32xbf16>, vector<32x32xbf16>, vector<64x32xf32> -> vector<64x32xf32>
    %40 = arith.addf %36, %39 : vector<64x32xf32>
    %41 = vector.broadcast %28 : vector<1x32xf32> to vector<64x32xf32>
    %42 = arith.addf %40, %41 : vector<64x32xf32>
    %c1 = arith.constant 1 : index
    %c0_16 = arith.constant 0 : index
    %c0_17 = arith.constant 0 : index
    %43 = vector.load %arg2[%c1, %c0_16, %c0_17] : memref<9x32x32xbf16, #tpu.memory_space<vmem>>, vector<1x32x32xbf16>
    %44 = vector.shape_cast %43 : vector<1x32x32xbf16> to vector<32x32xbf16>
    %cst_18 = arith.constant dense<0.000000e+00> : vector<64x32xf32>
    %45 = tpu.matmul %4, %44, %cst_18 {dimension_numbers = #tpu.dot_dimension_numbers<[1], [0], [0], [1], [0, 0, 1, 1], [], []>} : vector<64x32xbf16>, vector<32x32xbf16>, vector<64x32xf32> -> vector<64x32xf32>
    %c7 = arith.constant 7 : index
    %c0_19 = arith.constant 0 : index
    %c0_20 = arith.constant 0 : index
    %46 = vector.load %arg2[%c7, %c0_19, %c0_20] : memref<9x32x32xbf16, #tpu.memory_space<vmem>>, vector<1x32x32xbf16>
    %47 = vector.shape_cast %46 : vector<1x32x32xbf16> to vector<32x32xbf16>
    %cst_21 = arith.constant dense<0.000000e+00> : vector<64x32xf32>
    %48 = tpu.matmul %2, %47, %cst_21 {dimension_numbers = #tpu.dot_dimension_numbers<[1], [0], [0], [1], [0, 0, 1, 1], [], []>} : vector<64x32xbf16>, vector<32x32xbf16>, vector<64x32xf32> -> vector<64x32xf32>
    %49 = arith.addf %45, %48 : vector<64x32xf32>
    %50 = vector.broadcast %28 : vector<1x32xf32> to vector<64x32xf32>
    %51 = arith.addf %49, %50 : vector<64x32xf32>
    %c0_22 = arith.constant 0 : index
    %c0_23 = arith.constant 0 : index
    %c0_24 = arith.constant 0 : index
    %52 = vector.load %arg2[%c0_22, %c0_23, %c0_24] : memref<9x32x32xbf16, #tpu.memory_space<vmem>>, vector<1x32x32xbf16>
    %53 = vector.shape_cast %52 : vector<1x32x32xbf16> to vector<32x32xbf16>
    %cst_25 = arith.constant dense<0.000000e+00> : vector<64x32xf32>
    %54 = tpu.matmul %27, %53, %cst_25 {dimension_numbers = #tpu.dot_dimension_numbers<[1], [0], [0], [1], [0, 0, 1, 1], [], []>} : vector<64x32xbf16>, vector<32x32xbf16>, vector<64x32xf32> -> vector<64x32xf32>
    %c2 = arith.constant 2 : index
    %c0_26 = arith.constant 0 : index
    %c0_27 = arith.constant 0 : index
    %55 = vector.load %arg2[%c2, %c0_26, %c0_27] : memref<9x32x32xbf16, #tpu.memory_space<vmem>>, vector<1x32x32xbf16>
    %56 = vector.shape_cast %55 : vector<1x32x32xbf16> to vector<32x32xbf16>
    %cst_28 = arith.constant dense<0.000000e+00> : vector<64x32xf32>
    %57 = tpu.matmul %4, %56, %cst_28 {dimension_numbers = #tpu.dot_dimension_numbers<[1], [0], [0], [1], [0, 0, 1, 1], [], []>} : vector<64x32xbf16>, vector<32x32xbf16>, vector<64x32xf32> -> vector<64x32xf32>
    %58 = arith.addf %54, %57 : vector<64x32xf32>
    %c6 = arith.constant 6 : index
    %c0_29 = arith.constant 0 : index
    %c0_30 = arith.constant 0 : index
    %59 = vector.load %arg2[%c6, %c0_29, %c0_30] : memref<9x32x32xbf16, #tpu.memory_space<vmem>>, vector<1x32x32xbf16>
    %60 = vector.shape_cast %59 : vector<1x32x32xbf16> to vector<32x32xbf16>
    %cst_31 = arith.constant dense<0.000000e+00> : vector<64x32xf32>
    %61 = tpu.matmul %26, %60, %cst_31 {dimension_numbers = #tpu.dot_dimension_numbers<[1], [0], [0], [1], [0, 0, 1, 1], [], []>} : vector<64x32xbf16>, vector<32x32xbf16>, vector<64x32xf32> -> vector<64x32xf32>
    %62 = arith.addf %58, %61 : vector<64x32xf32>
    %c8 = arith.constant 8 : index
    %c0_32 = arith.constant 0 : index
    %c0_33 = arith.constant 0 : index
    %63 = vector.load %arg2[%c8, %c0_32, %c0_33] : memref<9x32x32xbf16, #tpu.memory_space<vmem>>, vector<1x32x32xbf16>
    %64 = vector.shape_cast %63 : vector<1x32x32xbf16> to vector<32x32xbf16>
    %cst_34 = arith.constant dense<0.000000e+00> : vector<64x32xf32>
    %65 = tpu.matmul %2, %64, %cst_34 {dimension_numbers = #tpu.dot_dimension_numbers<[1], [0], [0], [1], [0, 0, 1, 1], [], []>} : vector<64x32xbf16>, vector<32x32xbf16>, vector<64x32xf32> -> vector<64x32xf32>
    %66 = arith.addf %62, %65 : vector<64x32xf32>
    %67 = vector.broadcast %28 : vector<1x32xf32> to vector<64x32xf32>
    %68 = arith.addf %66, %67 : vector<64x32xf32>
    %69 = tpu.iota {dimensions = array<i32: 1>} : vector<64x32xi32>
    %c3_i32 = arith.constant 3 : i32
    %70 = vector.broadcast %c3_i32 : i32 to vector<64x32xi32>
    %71 = arith.cmpi sge, %69, %70 : vector<64x32xi32>
    %c6_i32 = arith.constant 6 : i32
    %72 = vector.broadcast %c6_i32 : i32 to vector<64x32xi32>
    %73 = arith.cmpi slt, %69, %72 : vector<64x32xi32>
    %74 = arith.andi %71, %73 : vector<64x32xi1>
    %75 = math.absf %33 : vector<64x32xf32>
    %cst_35 = arith.constant 0.000000e+00 : f32
    %76 = vector.broadcast %cst_35 : f32 to vector<64x32xf32>
    %77 = arith.subf %76, %75 : vector<64x32xf32>
    %78 = math.exp %77 : vector<64x32xf32>
    %cst_36 = arith.constant 9.99999974E-5 : f32
    %79 = vector.broadcast %cst_36 : f32 to vector<64x32xf32>
    %80 = arith.cmpf ogt, %78, %79 : vector<64x32xf32>
    %cst_37 = arith.constant 1.000000e+00 : f32
    %81 = vector.broadcast %cst_37 : f32 to vector<64x32xf32>
    %82 = arith.addf %81, %78 : vector<64x32xf32>
    %83 = math.log %82 : vector<64x32xf32>
    %84 = arith.select %80, %83, %78 : vector<64x32xi1>, vector<64x32xf32>
    %cst_38 = arith.constant 0.000000e+00 : f32
    %85 = vector.broadcast %cst_38 : f32 to vector<64x32xf32>
    %86 = arith.maximumf %33, %85 : vector<64x32xf32>
    %87 = arith.addf %86, %84 : vector<64x32xf32>
    %88 = arith.select %74, %87, %33 : vector<64x32xi1>, vector<64x32xf32>
    %c0_39 = arith.constant 0 : index
    %c0_40 = arith.constant 0 : index
    %c0_41 = arith.constant 0 : index
    %89 = vector.load %arg4[%c0_39, %c0_40, %c0_41] : memref<1x64x128xf32, #tpu.memory_space<vmem>>, vector<1x64x32xf32>
    %90 = vector.shape_cast %89 : vector<1x64x32xf32> to vector<64x32xf32>
    %91 = vector.shape_cast %88 : vector<64x32xf32> to vector<1x64x32xf32>
    tpu.vector_store %arg4[%c0_39, %c0_40, %c0_41], %91 {strides = array<i32>} : memref<1x64x128xf32, #tpu.memory_space<vmem>>, vector<1x64x32xf32>,
    %92 = math.absf %42 : vector<64x32xf32>
    %cst_42 = arith.constant 0.000000e+00 : f32
    %93 = vector.broadcast %cst_42 : f32 to vector<64x32xf32>
    %94 = arith.subf %93, %92 : vector<64x32xf32>
    %95 = math.exp %94 : vector<64x32xf32>
    %cst_43 = arith.constant 9.99999974E-5 : f32
    %96 = vector.broadcast %cst_43 : f32 to vector<64x32xf32>
    %97 = arith.cmpf ogt, %95, %96 : vector<64x32xf32>
    %cst_44 = arith.constant 1.000000e+00 : f32
    %98 = vector.broadcast %cst_44 : f32 to vector<64x32xf32>
    %99 = arith.addf %98, %95 : vector<64x32xf32>
    %100 = math.log %99 : vector<64x32xf32>
    %101 = arith.select %97, %100, %95 : vector<64x32xi1>, vector<64x32xf32>
    %cst_45 = arith.constant 0.000000e+00 : f32
    %102 = vector.broadcast %cst_45 : f32 to vector<64x32xf32>
    %103 = arith.maximumf %42, %102 : vector<64x32xf32>
    %104 = arith.addf %103, %101 : vector<64x32xf32>
    %105 = arith.select %74, %104, %42 : vector<64x32xi1>, vector<64x32xf32>
    %c0_46 = arith.constant 0 : index
    %c0_47 = arith.constant 0 : index
    %c32 = arith.constant 32 : index
    %106 = vector.load %arg4[%c0_46, %c0_47, %c32] : memref<1x64x128xf32, #tpu.memory_space<vmem>>, vector<1x64x32xf32>
    %107 = vector.shape_cast %106 : vector<1x64x32xf32> to vector<64x32xf32>
    %108 = vector.shape_cast %105 : vector<64x32xf32> to vector<1x64x32xf32>
    tpu.vector_store %arg4[%c0_46, %c0_47, %c32], %108 {strides = array<i32>} : memref<1x64x128xf32, #tpu.memory_space<vmem>>, vector<1x64x32xf32>,
    %109 = math.absf %51 : vector<64x32xf32>
    %cst_48 = arith.constant 0.000000e+00 : f32
    %110 = vector.broadcast %cst_48 : f32 to vector<64x32xf32>
    %111 = arith.subf %110, %109 : vector<64x32xf32>
    %112 = math.exp %111 : vector<64x32xf32>
    %cst_49 = arith.constant 9.99999974E-5 : f32
    %113 = vector.broadcast %cst_49 : f32 to vector<64x32xf32>
    %114 = arith.cmpf ogt, %112, %113 : vector<64x32xf32>
    %cst_50 = arith.constant 1.000000e+00 : f32
    %115 = vector.broadcast %cst_50 : f32 to vector<64x32xf32>
    %116 = arith.addf %115, %112 : vector<64x32xf32>
    %117 = math.log %116 : vector<64x32xf32>
    %118 = arith.select %114, %117, %112 : vector<64x32xi1>, vector<64x32xf32>
    %cst_51 = arith.constant 0.000000e+00 : f32
    %119 = vector.broadcast %cst_51 : f32 to vector<64x32xf32>
    %120 = arith.maximumf %51, %119 : vector<64x32xf32>
    %121 = arith.addf %120, %118 : vector<64x32xf32>
    %122 = arith.select %74, %121, %51 : vector<64x32xi1>, vector<64x32xf32>
    %c0_52 = arith.constant 0 : index
    %c0_53 = arith.constant 0 : index
    %c64 = arith.constant 64 : index
    %123 = vector.load %arg4[%c0_52, %c0_53, %c64] : memref<1x64x128xf32, #tpu.memory_space<vmem>>, vector<1x64x32xf32>
    %124 = vector.shape_cast %123 : vector<1x64x32xf32> to vector<64x32xf32>
    %125 = vector.shape_cast %122 : vector<64x32xf32> to vector<1x64x32xf32>
    tpu.vector_store %arg4[%c0_52, %c0_53, %c64], %125 {strides = array<i32>} : memref<1x64x128xf32, #tpu.memory_space<vmem>>, vector<1x64x32xf32>,
    %126 = math.absf %68 : vector<64x32xf32>
    %cst_54 = arith.constant 0.000000e+00 : f32
    %127 = vector.broadcast %cst_54 : f32 to vector<64x32xf32>
    %128 = arith.subf %127, %126 : vector<64x32xf32>
    %129 = math.exp %128 : vector<64x32xf32>
    %cst_55 = arith.constant 9.99999974E-5 : f32
    %130 = vector.broadcast %cst_55 : f32 to vector<64x32xf32>
    %131 = arith.cmpf ogt, %129, %130 : vector<64x32xf32>
    %cst_56 = arith.constant 1.000000e+00 : f32
    %132 = vector.broadcast %cst_56 : f32 to vector<64x32xf32>
    %133 = arith.addf %132, %129 : vector<64x32xf32>
    %134 = math.log %133 : vector<64x32xf32>
    %135 = arith.select %131, %134, %129 : vector<64x32xi1>, vector<64x32xf32>
    %cst_57 = arith.constant 0.000000e+00 : f32
    %136 = vector.broadcast %cst_57 : f32 to vector<64x32xf32>
    %137 = arith.maximumf %68, %136 : vector<64x32xf32>
    %138 = arith.addf %137, %135 : vector<64x32xf32>
    %139 = arith.select %74, %138, %68 : vector<64x32xi1>, vector<64x32xf32>
    %c0_58 = arith.constant 0 : index
    %c0_59 = arith.constant 0 : index
    %c96 = arith.constant 96 : index
    %140 = vector.load %arg4[%c0_58, %c0_59, %c96] : memref<1x64x128xf32, #tpu.memory_space<vmem>>, vector<1x64x32xf32>
    %141 = vector.shape_cast %140 : vector<1x64x32xf32> to vector<64x32xf32>
    %142 = vector.shape_cast %139 : vector<64x32xf32> to vector<1x64x32xf32>
    tpu.vector_store %arg4[%c0_58, %c0_59, %c96], %142 {strides = array<i32>} : memref<1x64x128xf32, #tpu.memory_space<vmem>>, vector<1x64x32xf32>,
    return
  }
  func.func @transform_0(%arg0: i32) -> (i32, i32, i32) {
    %c0_i32 = arith.constant 0 : i32
    %c0_i32_0 = arith.constant 0 : i32
    %c0_i32_1 = arith.constant 0 : i32
    return %arg0, %c0_i32, %c0_i32_0 : i32, i32, i32
  }
  func.func @transform_1(%arg0: i32) -> (i32, i32, i32) {
    %c0_i32 = arith.constant 0 : i32
    %c0_i32_0 = arith.constant 0 : i32
    %c0_i32_1 = arith.constant 0 : i32
    %c0_i32_2 = arith.constant 0 : i32
    return %c0_i32, %c0_i32_0, %c0_i32_1 : i32, i32, i32
  }
  func.func @transform_2(%arg0: i32) -> (i32, i32) {
    %c0_i32 = arith.constant 0 : i32
    %c0_i32_0 = arith.constant 0 : i32
    %c0_i32_1 = arith.constant 0 : i32
    return %c0_i32, %c0_i32_0 : i32, i32
  }
  func.func @transform_3(%arg0: i32) -> (i32, i32, i32) {
    %c0_i32 = arith.constant 0 : i32
    %c0_i32_0 = arith.constant 0 : i32
    %c0_i32_1 = arith.constant 0 : i32
    return %arg0, %c0_i32, %c0_i32_0 : i32, i32, i32
  }
}

</mosaic_0001>

<bundles_post_ra>
// kernel: forward.4
= control target key start
LH: loop header
LB: loop body
LE: loop exit
PB: predicated region body
PF: predicated region fallthrough
CT: control target
= control target key end

     0   :  { %8 = vsyncpa [#allocation3], 0  ;;  %s290_s12 = smov [#allocation2]   ;;  %s327_s0 = inlined_call_operand.vmem [shape: f32[2,32], index: 0, kind: input, shape index: {}]   ;;  %s328_s1 = inlined_call_operand.hbm [shape: bf16[32,512], index: 1, kind: input, shape index: {}]   ;;  %s329_s2 = inlined_call_operand.vmem [shape: f32[1,512], index: 2, kind: input, shape index: {}]   ;;  %s330_s3 = inlined_call_operand.vmem [shape: bf16[2,512], index: 3, kind: output, shape index: {}]  }
   0x1   :  { %s16_s13 = sshll.u32 %s290_s12, 4  ;;  %s17_s13 = int_to_ptr.vmem [resolvable:$true] %s16_s13 }
   0x2   :  { %s276_s14 = scalar_lea.vmem %s17_s13, 1024  ;;  %p281_p1 = scmp.lt.s32.totalorder %s17_s13, %s17_s13 }
   0x3   :  { %p277_p0 = scmp.ne.s32.totalorder %s17_s13, %s276_s14  ;;  %p282_p2 = scmp.lt.s32.totalorder %s276_s14, %s276_s14 }
   0x5   :  { %p283_p3 = por %p282_p2, %p281_p1 }
   0x7   :  { %p284_p4 = pnand %p283_p3, %p277_p0 }
   0x9   :  { %287 = shalt.err (!%p284_p4)
}
   0xa   :  { %s291_s15 = smov 256   ;;  %s292_s16 = smov 16  }
   0xb   :  { %22 = dma.hbm_to_vmem [thread:$0]  %s328_s1, 1024, %s17_s13, [#allocation3], %s291_s15, %s291_s15, %s292_s16  }
   0xc   :  { %288 = dma.done.wait [#allocation3], 1024  }
   0xd   :  { %289 = vsyncadd [#allocation3], 4294966272  ;;  %v293_v0 = vmov 0   ;;  %v256_v1 = vld [vmem:[#allocation2 + $0x24] ss:$16 sps:$4 sm:$0xff]   ;;  %vm101_vm0 = vcmask 261120   ;;  %v41_v11 = vlaneseq }
   0xe   :  { %137 = vmatprep.mubr.bf16.mxu0 %v293_v0  ;;  %178 = vmatprep.mubr.bf16.mxu1 %v293_v0  ;;  %v258_v2 = vld [vmem:[#allocation2 + $0x2c] ss:$16 sps:$4 sm:$0xff]   ;;  %v260_v3 = vld [vmem:[#allocation2 + $0x20] ss:$16 sps:$4 sm:$0xff]   ;;  %v261_v4 = vld [vmem:[#allocation2 + $0x28] ss:$16 sps:$4 sm:$0xff]  }
   0xf   :  { %117 = vmatprep.subr.bf16.mxu0 %v256_v1  ;;  %158 = vmatprep.subr.bf16.mxu1 %v258_v2  ;;  %v262_v5 = vld [vmem:[#allocation2 + $0x4] ss:$16 sps:$4 sm:$0xff]   ;;  %v264_v6 = vld [vmem:[#allocation2 + $0xc] ss:$16 sps:$4 sm:$0xff]   ;;  %v266_v7 = vld [vmem:[#allocation2] ss:$16 sps:$4 sm:$0xff]  }
  0x10   :  { %118 = vmatpush1.bf16.msra.mxu0 %v260_v3  ;;  %159 = vmatpush1.bf16.msra.mxu1 %v261_v4  ;;  %v267_v8 = vld [vmem:[#allocation2 + $0x8] ss:$16 sps:$4 sm:$0xff]   ;;  %v29_v9 = vld [vmem:[%s327_s0] sm:$0x3]  ;;  %v42_v12 = vshrl.u32 %v41_v11, 7 }
  0x11   :  { %119 = vmatprep.subr.bf16.mxu0 %v262_v5  ;;  %160 = vmatprep.subr.bf16.mxu1 %v264_v6  ;;  %v30_v10 = vpack.c.bf16 %v29_v9, %v29_v9  ;;  %v39_v15 = vld [vmem:[%s329_s2] sm:$0xf]  ;;  %v294_v20 = vmov 1966171168  }
  0x12   :  { %v43_v13 = vsub.s32 0, %v42_v12  ;;  %v51_v14 = vsub.s32 2, %v42_v12  ;;  %v47_v16 = vsub.s32 1, %v42_v12  ;;  %v55_v17 = vsub.s32 3, %v42_v12 }
  0x13   :  { %v210_v21 = vunpack.c.l.s4 %v294_v20 }
  0x14   :  { %120 = vmatpush1.bf16.msra.mxu0 %v266_v7  ;;  %161 = vmatpush1.bf16.msra.mxu1 %v267_v8  ;;  %v44_v18 = vrot.slane %v39_v15, %v43_v13  ;;  %v52_v19 = vrot.slane %v39_v15, %v51_v14  ;;  %v48_v24 = vrot.slane %v39_v15, %v47_v16 }
  0x15   :  { %v56_v25 = vrot.slane %v39_v15, %v55_v17  ;;  %v211_v30 = vunpack.c.0.s8 %v210_v21 }
  0x17   :  { %246 = vmatmul.mubr.msk.bf16.vlgmr.msra.gmra.mxu0 %vm101_vm0, %v30_v10  ;;  %247 = vmatmul.mubr.msk.bf16.vlgmr.msra.gmra.mxu1 %vm101_vm0, %v30_v10  ;;  %v214_v41 = vsub.s32 %v211_v30, %v42_v12 }
  0xd7   :  { %v139_v22 = vpop.f32.mrf.mxu0  ;;  %v180_v23 = vpop.f32.mrf.mxu1 }
  0xd8   :  { %v140_v26 = vadd.f32 %v139_v22, %v44_v18  ;;  %v181_v27 = vadd.f32 %v180_v23, %v52_v19 }
  0xd9   :  { %v141_v28 = vpop.f32.mrf.mxu0  ;;  %v182_v29 = vpop.f32.mrf.mxu1 }
  0xda   :  { %v191_v31 = vmul.f32 0.01, %v140_v26  ;;  %v193_v32 = vmul.f32 0.01, %v181_v27  ;;  %v142_v33 = vadd.f32 %v141_v28, %v48_v24  ;;  %v183_v34 = vadd.f32 %v182_v29, %v56_v25 }
  0xdb   :  { %v143_v35 = vpop.f32.mrf.mxu0  ;;  %v184_v36 = vpop.f32.mrf.mxu1  ;;  %vm187_vm1 = vcmp.gt.f32.partialorder %v140_v26, 0.0  ;;  %vm189_vm2 = vcmp.gt.f32.partialorder %v181_v27, 0.0 }
  0xdc   :  { %vm188_vm3 = vcmp.gt.f32.partialorder %v142_v33, 0.0  ;;  %v192_v37 = vmul.f32 0.01, %v142_v33  ;;  %vm190_vm4 = vcmp.gt.f32.partialorder %v183_v34, 0.0  ;;  %v194_v38 = vmul.f32 0.01, %v183_v34 }
  0xdd   :  { %v144_v39 = vpop.f32.mrf.mxu0  ;;  %v185_v40 = vpop.f32.mrf.mxu1  ;;  %v195_v42 = vsel %vm187_vm1, %v140_v26, %v191_v31  ;;  %v197_v43 = vsel %vm189_vm2, %v181_v27, %v193_v32 }
  0xde   :  { %v196_v44 = vsel %vm188_vm3, %v142_v33, %v192_v37  ;;  %v198_v45 = vsel %vm190_vm4, %v183_v34, %v194_v38 }
  0xdf   :  { %v248_v46 = vpack.c.bf16 %v196_v44, %v195_v42  ;;  %v249_v47 = vpack.c.bf16 %v198_v45, %v197_v43 }
  0xe1   :  { %v215_v48 = vrot.slane %v248_v46, %v214_v41  ;;  %v222_v49 = vrot.slane %v249_v47, %v214_v41 }
  0xe3   :  { %v223_v50 = vcombine.low %v215_v48, %v222_v49 }
  0xe5   :  { %250 = vst.sshfl [vmem:[%s330_s3] sm:$0x55 pattern:$0x73625140] %v223_v50 }
  0xe6   :  { %237 = vsyncpa [#allocation3], 1 }

// kernel: forward.5
= control target key start
LH: loop header
LB: loop body
LE: loop exit
PB: predicated region body
PF: predicated region fallthrough
CT: control target
= control target key end

     0   :  { %s2081_s18 = smov 0   ;;  %s2510_s0 = inlined_call_operand.vmem [shape: bf16[2,7,128], index: 0, kind: input, shape index: {}]   ;;  %s2511_s1 = inlined_call_operand.vmem [shape: bf16[9,128,64], index: 1, kind: input, shape index: {}]   ;;  %s2512_s2 = inlined_call_operand.vmem [shape: f32[1,64], index: 2, kind: input, shape index: {}]   ;;  %s2513_s3 = inlined_call_operand.vmem [shape: f32[4,4,64], index: 3, kind: input, shape index: {}]   ;;  %s2514_s4 = inlined_call_operand.vmem [shape: f32[4,4,64], index: 4, kind: input, shape index: {}]   ;;  %s2515_s5 = inlined_call_operand.vmem [shape: bf16[2,4,256], index: 5, kind: output, shape index: {}]  }
   0x1 LB: > { %s1468_s19 = sadd.s32 4294967295, %s2044_s18   ;;  %p1472_p0 = scmp.ge.s32.totalorder %s2044_s18, 1  ;;  %s2044_s18 = sphi %s2081_s18, %s15_s18  }
   0x2   : > { %p186_p1 = scmp.lt.s32.totalorder %s2044_s18, 3 }
   0x4   : > { %p187_p2 = pnand %p1472_p0, %p186_p1 }
   0x5   : > { %p213_p3 = scmp.lt.s32.totalorder (!%p187_p2), %s1468_s19, 1  ;;  %s2050_s9 = smov (!%p187_p2), 64  }
   0x6   : > { %190 = sbr.rel (%p187_p2) target bundleno = 836 (0x344), region = 40 }
   0xb   : > { %v1963_v0 = vld [vmem:[%s2511_s1 + $0x138] sm:$0xff]   ;;  %v2046_v1 = vmov 0.0   ;;  %v1965_v3 = vld [vmem:[%s2511_s1 + $0x130] sm:$0xff]   ;;  %vm2047_vm0 = vmmov 0   ;;  %v1967_v5 = vld [vmem:[%s2511_s1 + $0x128] sm:$0xff]   ;;  %v226_v11 = vlaneseq  ;;  %s2517_s19 = smov (!%p213_p3, %s1468_s19), 1 }
   0xc   : > { %1770 = vmatprep.subr.bf16.mxu0 %v2046_v1  ;;  %1790 = vmatprep.subr.bf16.mxu1 %v2046_v1  ;;  %v1964_v2 = vld [vmem:[%s2511_s1 + $0x178] sm:$0xff]   ;;  %v1966_v4 = vld [vmem:[%s2511_s1 + $0x170] sm:$0xff]   ;;  %v1968_v6 = vld [vmem:[%s2511_s1 + $0x168] sm:$0xff]   ;;  %s1473_s25 = sshll.u32 %s2517_s19, 2  ;;  %v2048_v23 = vmov 0   ;;  %vm1241_vm5 = vcmask 519168  }
   0xd   : > { %1771 = vmatpush3.bf16.msra.mxu0 %v1963_v0  ;;  %1786 = vmatprep.mubr.msk.bf16.mxu0 %vm2047_vm0, %v2046_v1  ;;  %v1969_v7 = vld [vmem:[%s2511_s1 + $0x120] sm:$0xff]   ;;  %v1971_v9 = vld [vmem:[%s2511_s1 + $0x118] sm:$0xff]   ;;  %v1973_v12 = vld [vmem:[%s2511_s1 + $0x110] sm:$0xff]   ;;  %v2147_v14 = vshrl.u32 %v226_v11, 7  ;;  %s216_s30 = scalar_lea.vmem %s2510_s0, %s1473_s25  ;;  %vm1245_vm6 = vcmask 1043456   ;;  %vm1352_vm11 = vcmask 517120   ;;  %s221_s8 = scalar_lea.vmem %s2515_s5, %s1473_s25 }
   0xe   : > { %1791 = vmatpush3.bf16.msra.mxu1 %v1964_v2  ;;  %1772 = vmatprep.subr.bf16.mxu0 %v2046_v1  ;;  %v1970_v8 = vld [vmem:[%s2511_s1 + $0x160] sm:$0xff]   ;;  %v1972_v10 = vld [vmem:[%s2511_s1 + $0x158] sm:$0xff]   ;;  %v1974_v13 = vld [vmem:[%s2511_s1 + $0x150] sm:$0xff]   ;;  %vm1376_vm12 = vcmask 1041920  }
   0xf   : > { %1792 = vmatprep.subr.bf16.mxu1 %v2046_v1  ;;  %1806 = vmatprep.mubr.msk.bf16.mxu1 %vm2047_vm0, %v2046_v1  ;;  %v1975_v15 = vld [vmem:[%s2511_s1 + $0x108] sm:$0xff]   ;;  %v232_v17 = vand.u32 1, %v2147_v14  ;;  %v1977_v18 = vld [vmem:[%s2511_s1 + $0x100] sm:$0xff]   ;;  %v1979_v21 = vld [vmem:[%s2511_s1 + $0xf8] sm:$0xff]  }
  0x10   : > { %v1976_v16 = vld [vmem:[%s2511_s1 + $0x148] sm:$0xff]   ;;  %v1978_v19 = vld [vmem:[%s2511_s1 + $0x140] sm:$0xff]   ;;  %v1980_v22 = vld [vmem:[%s2511_s1 + $0x1f8] sm:$0xff]  }
  0x11   : > { %1773 = vmatpush3.bf16.msra.mxu0 %v1965_v3  ;;  %vm240_vm1 = vcmp.lt.s32.totalorder %v232_v17, 1  ;;  %v2172_v20 = vld [vmem:[%s216_s30] sm:$0xf]  ;;  %v1981_v25 = vld [vmem:[%s2511_s1 + $0xf0] sm:$0xff]   ;;  %v1983_v30 = vld [vmem:[%s2511_s1 + $0xe8] sm:$0xff]  }
  0x12   : > { %1793 = vmatpush3.bf16.msra.mxu1 %v1966_v4  ;;  %1774 = vmatprep.subr.bf16.mxu0 %v2046_v1  ;;  %vm241_vm2 = vmpackc.low %vm240_vm1, %vm240_vm1  ;;  %v1982_v26 = vld [vmem:[%s2511_s1 + $0x1f0] sm:$0xff]   ;;  %v1984_v31 = vld [vmem:[%s2511_s1 + $0x1e8] sm:$0xff]   ;;  %v1590_v63 = vcombine.low %v2172_v20, %v2172_v20 }
  0x13   : > { %1794 = vmatprep.subr.bf16.mxu1 %v2046_v1  ;;  %v2183_v24 = vsel %vm241_vm2, 65537, %v2048_v23  ;;  %v1985_v33 = vld [vmem:[%s2511_s1 + $0xe0] sm:$0xff]   ;;  %v1987_v35 = vld [vmem:[%s2511_s1 + $0xd8] sm:$0xff]   ;;  %v1989_v39 = vld [vmem:[%s2511_s1 + $0xd0] sm:$0xff]  }
  0x14   : > { %v244_v27 = vshrl.u32 %v2183_v24, 16  ;;  %v247_v28 = vshll.u32 %v2183_v24, 16  ;;  %v1986_v34 = vld [vmem:[%s2511_s1 + $0x1e0] sm:$0xff]   ;;  %v1988_v37 = vld [vmem:[%s2511_s1 + $0x1d8] sm:$0xff]   ;;  %v1990_v40 = vld [vmem:[%s2511_s1 + $0x1d0] sm:$0xff]   ;;  %v716_v3 = vrot.slane %v1590_v63, 1 }
  0x15   : > { %1775 = vmatpush3.bf16.msra.mxu0 %v1967_v5  ;;  %v1991_v42 = vld [vmem:[%s2511_s1 + $0xc8] sm:$0xff]   ;;  %v1993_v46 = vld [vmem:[%s2511_s1 + $0xc0] sm:$0xff]   ;;  %v1995_v49 = vld [vmem:[%s2511_s1 + $0x78] sm:$0xff]  }
  0x16   : > { %1795 = vmatpush3.bf16.msra.mxu1 %v1968_v6  ;;  %1776 = vmatprep.subr.bf16.mxu0 %v2046_v1  ;;  %v246_v29 = vrot.slane %v244_v27, 7  ;;  %v1992_v43 = vld [vmem:[%s2511_s1 + $0x1c8] sm:$0xff]   ;;  %v1994_v47 = vld [vmem:[%s2511_s1 + $0x1c0] sm:$0xff]   ;;  %v1996_v50 = vld [vmem:[%s2511_s1 + $0xb8] sm:$0xff]  }
  0x17   : > { %1796 = vmatprep.subr.bf16.mxu1 %v2046_v1  ;;  %v1997_v51 = vld [vmem:[%s2511_s1 + $0x70] sm:$0xff]   ;;  %v1999_v53 = vld [vmem:[%s2511_s1 + $0x68] sm:$0xff]   ;;  %v2001_v55 = vld [vmem:[%s2511_s1 + $0x60] sm:$0xff]  }
  0x18   : > { %v249_v32 = vor.u32 %v247_v28, %v246_v29  ;;  %v1998_v52 = vld [vmem:[%s2511_s1 + $0xb0] sm:$0xff]   ;;  %v2000_v54 = vld [vmem:[%s2511_s1 + $0xa8] sm:$0xff]   ;;  %v2002_v56 = vld [vmem:[%s2511_s1 + $0xa0] sm:$0xff]  }
  0x19   : > { %1777 = vmatpush3.bf16.msra.mxu0 %v1969_v7  ;;  %v2003_v57 = vld [vmem:[%s2511_s1 + $0x58] sm:$0xff]   ;;  %v2005_v59 = vld [vmem:[%s2511_s1 + $0x50] sm:$0xff]   ;;  %v2007_v61 = vld [vmem:[%s2511_s1 + $0x48] sm:$0xff]  }
  0x1a   : > { %1797 = vmatpush3.bf16.msra.mxu1 %v1970_v8  ;;  %1778 = vmatprep.subr.bf16.mxu0 %v2046_v1  ;;  %vm250_vm3 = vcmp.ne.s16.totalorder %v249_v32, 0  ;;  %v2004_v58 = vld [vmem:[%s2511_s1 + $0x98] sm:$0xff]   ;;  %v2006_v60 = vld [vmem:[%s2511_s1 + $0x90] sm:$0xff]   ;;  %v2008_v62 = vld [vmem:[%s2511_s1 + $0x88] sm:$0xff]   ;;  %v252_v8 = vrot.slane %v244_v27, 6 }
  0x1b   : > { %1798 = vmatprep.subr.bf16.mxu1 %v2046_v1  ;;  %v251_v36 = vsel %vm250_vm3, %v2172_v20, 0  ;;  %v2009_v0 = vld [vmem:[%s2511_s1 + $0x40] sm:$0xff]   ;;  %v2012_v4 = vld [vmem:[%s2511_s1 + $0x38] sm:$0xff]   ;;  %v2014_v6 = vld [vmem:[%s2511_s1 + $0x30] sm:$0xff]  }
  0x1c   : > { %v1541_v38 = vcombine.low %v251_v36, %v251_v36  ;;  %v2010_v2 = vld [vmem:[%s2511_s1 + $0x80] sm:$0xff]   ;;  %v2013_v5 = vld [vmem:[%s2511_s1 + $0x1b8] sm:$0xff]   ;;  %v2015_v7 = vld [vmem:[%s2511_s1 + $0x1b0] sm:$0xff]  }
  0x1d   : > { %1779 = vmatpush3.bf16.msra.mxu0 %v1971_v9  ;;  %v253_v9 = vrot.slane %v247_v28, 7  ;;  %v2017_v11 = vld [vmem:[%s2511_s1 + $0x1a8] sm:$0xff]   ;;  %v2026_v29 = vld [vmem:[%s2511_s1] sm:$0xff]   ;;  %v2028_v32 = vld [vmem:[%s2511_s1 + $0x238] sm:$0xff]  }
  0x1e   : > { %1799 = vmatpush3.bf16.msra.mxu1 %v1972_v10  ;;  %1780 = vmatprep.subr.bf16.mxu0 %v2046_v1  ;;  %v497_v41 = vshll.u32 %v1541_v38, 16  ;;  %v495_v44 = vshrl.u32 %v1541_v38, 16  ;;  %v2016_v10 = vld [vmem:[%s2511_s1 + $0x28] sm:$0xff]   ;;  %v2032_v36 = vld [vmem:[%s2511_s1 + $0x218] sm:$0xff]  }
  0x1f   : > { %1800 = vmatprep.subr.bf16.mxu1 %v2046_v1  ;;  %v2034_v38 = vld [vmem:[%s2511_s1 + $0x208] sm:$0xff]  }
  0x20   : > { %v499_v45 = vrot.slane %v497_v41, 1 }
  0x21   : > { %1781 = vmatpush3.bf16.msra.mxu0 %v1973_v12  ;;  %v254_v12 = vor.u32 %v253_v9, %v252_v8 }
  0x22   : > { %1801 = vmatpush3.bf16.msra.mxu1 %v1974_v13  ;;  %1782 = vmatprep.subr.bf16.mxu0 %v2046_v1  ;;  %v2253_v48 = vor.u32 %v499_v45, %v495_v44  ;;  %v2018_v13 = vld [vmem:[%s2511_s1 + $0x20] sm:$0xff]  }
  0x23   : > { %1802 = vmatprep.subr.bf16.mxu1 %v2046_v1  ;;  %vm255_vm4 = vcmp.ne.s16.totalorder %v254_v12, 0 }
  0x24   : > { %v256_v17 = vsel %vm255_vm4, %v2172_v20, 0 }
  0x25   : > { %1783 = vmatpush3.bf16.msra.mxu0 %v1975_v15  ;;  %v2019_v15 = vld [vmem:[%s2511_s1 + $0x1a0] sm:$0xff]  }
  0x26   : > { %1803 = vmatpush3.bf16.msra.mxu1 %v1976_v16  ;;  %1784 = vmatprep.subr.bf16.mxu0 %v2046_v1  ;;  %v2020_v16 = vld [vmem:[%s2511_s1 + $0x18] sm:$0xff]  }
  0x27   : > { %1804 = vmatprep.subr.bf16.mxu1 %v2046_v1 }
  0x29   : > { %1785 = vmatpush3.bf16.msra.mxu0 %v1977_v18  ;;  %v2021_v18 = vld [vmem:[%s2511_s1 + $0x198] sm:$0xff]  }
  0x2a   : > { %1805 = vmatpush3.bf16.msra.mxu1 %v1978_v19  ;;  %1810 = vmatprep.subr.bf16.mxu0 %v2046_v1  ;;  %v1623_v19 = vcombine.low %v256_v17, %v256_v17 }
  0x2b   : > { %1830 = vmatprep.subr.bf16.mxu1 %v2046_v1 }
  0x2c   : > { %1787 = vmatmul.mubr.bf16.vlgmr.msra.gmra.mxu0 %v2172_v20  ;;  %v932_v23 = vshrl.u32 %v1623_v19, 16  ;;  %v935_v24 = vshll.u32 %v1623_v19, 16 }
  0x2d   : > { %1811 = vmatpush3.bf16.msra.mxu0 %v1979_v21  ;;  %1807 = vmatmul.mubr.bf16.vlgmr.msra.gmra.mxu1 %v2172_v20  ;;  %v2022_v21 = vld [vmem:[%s2511_s1 + $0x10] sm:$0xff]  }
  0x2e   : > { %1831 = vmatpush3.bf16.msra.mxu1 %v1980_v22  ;;  %1812 = vmatprep.subr.bf16.mxu0 %v2046_v1  ;;  %v2023_v22 = vld [vmem:[%s2511_s1 + $0x190] sm:$0xff]   ;;  %v934_v27 = vrot.slane %v932_v23, 1  ;;  %v937_v28 = vrot.slane %v935_v24, 2 }
  0x2f   : > { %1832 = vmatprep.subr.bf16.mxu1 %v2046_v1  ;;  %1826 = vmatprep.mubr.msk.bf16.mxu0 %vm2047_vm0, %v2046_v1 }
  0x30   : > { %1846 = vmatprep.mubr.msk.bf16.mxu1 %vm2047_vm0, %v2046_v1 }
  0x31   : > { %1813 = vmatpush3.bf16.msra.mxu0 %v1981_v25  ;;  %v2024_v25 = vld [vmem:[%s2511_s1 + $0x8] sm:$0xff]  }
  0x32   : > { %1833 = vmatpush3.bf16.msra.mxu1 %v1982_v26  ;;  %1814 = vmatprep.subr.bf16.mxu0 %v2046_v1  ;;  %v2025_v26 = vld [vmem:[%s2511_s1 + $0x188] sm:$0xff]  }
  0x33   : > { %1834 = vmatprep.subr.bf16.mxu1 %v2046_v1 }
  0x35   : > { %1815 = vmatpush3.bf16.msra.mxu0 %v1983_v30  ;;  %v2027_v30 = vld [vmem:[%s2511_s1 + $0x180] sm:$0xff]  }
  0x36   : > { %1835 = vmatpush3.bf16.msra.mxu1 %v1984_v31  ;;  %1816 = vmatprep.subr.bf16.mxu0 %v2046_v1  ;;  %v938_v31 = vor.u32 %v937_v28, %v934_v27 }
  0x37   : > { %1836 = vmatprep.subr.bf16.mxu1 %v2046_v1 }
  0x39   : > { %1817 = vmatpush3.bf16.msra.mxu0 %v1985_v33  ;;  %v2029_v33 = vld [vmem:[%s2511_s1 + $0x230] sm:$0xff]  }
  0x3a   : > { %1837 = vmatpush3.bf16.msra.mxu1 %v1986_v34  ;;  %1818 = vmatprep.subr.bf16.mxu0 %v2046_v1  ;;  %v2030_v34 = vld [vmem:[%s2511_s1 + $0x228] sm:$0xff]  }
  0x3b   : > { %1838 = vmatprep.subr.bf16.mxu1 %v2046_v1 }
  0x3d   : > { %1819 = vmatpush3.bf16.msra.mxu0 %v1987_v35  ;;  %v2031_v35 = vld [vmem:[%s2511_s1 + $0x220] sm:$0xff]  }
  0x3e   : > { %1839 = vmatpush3.bf16.msra.mxu1 %v1988_v37  ;;  %1820 = vmatprep.subr.bf16.mxu0 %v2046_v1  ;;  %v2033_v37 = vld [vmem:[%s2511_s1 + $0x210] sm:$0xff]  }
  0x3f   : > { %1840 = vmatprep.subr.bf16.mxu1 %v2046_v1 }
  0x41   : > { %1821 = vmatpush3.bf16.msra.mxu0 %v1989_v39  ;;  %v2035_v39 = vld [vmem:[%s2511_s1 + $0x200] sm:$0xff]  }
  0x42   : > { %1841 = vmatpush3.bf16.msra.mxu1 %v1990_v40  ;;  %1822 = vmatprep.subr.bf16.mxu0 %v2046_v1  ;;  %v1492_v40 = vld [vmem:[%s2512_s2] ss:$0 sm:$0xff] }
  0x43   : > { %1842 = vmatprep.subr.bf16.mxu1 %v2046_v1 }
  0x45   : > { %1823 = vmatpush3.bf16.msra.mxu0 %v1991_v42 }
  0x46   : > { %1843 = vmatpush3.bf16.msra.mxu1 %v1992_v43  ;;  %1824 = vmatprep.subr.bf16.mxu0 %v2046_v1 }
  0x47   : > { %1844 = vmatprep.subr.bf16.mxu1 %v2046_v1 }
  0x49   : > { %1825 = vmatpush3.bf16.msra.mxu0 %v1993_v46 }
  0x4a   : > { %1845 = vmatpush3.bf16.msra.mxu1 %v1994_v47  ;;  %1850 = vmatprep.subr.bf16.mxu0 %v2046_v1 }
  0x4b   : > { %1870 = vmatprep.subr.bf16.mxu1 %v2046_v1 }
  0x4c   : > { %1827 = vmatmul.mubr.bf16.vlgmr.msra.gmra.mxu0 %v2253_v48 }
  0x4d   : > { %1851 = vmatpush3.bf16.msra.mxu0 %v1995_v49  ;;  %1847 = vmatmul.mubr.bf16.vlgmr.msra.gmra.mxu1 %v2172_v20 }
  0x4e   : > { %1871 = vmatpush3.bf16.msra.mxu1 %v1996_v50  ;;  %1852 = vmatprep.subr.bf16.mxu0 %v2046_v1 }
  0x4f   : > { %1872 = vmatprep.subr.bf16.mxu1 %v2046_v1  ;;  %1866 = vmatprep.mubr.msk.bf16.mxu0 %vm2047_vm0, %v2046_v1 }
  0x50   : > { %1886 = vmatprep.mubr.msk.bf16.mxu1 %vm2047_vm0, %v2046_v1 }
  0x51   : > { %1853 = vmatpush3.bf16.msra.mxu0 %v1997_v51 }
  0x52   : > { %1873 = vmatpush3.bf16.msra.mxu1 %v1998_v52  ;;  %1854 = vmatprep.subr.bf16.mxu0 %v2046_v1 }
  0x53   : > { %1874 = vmatprep.subr.bf16.mxu1 %v2046_v1 }
  0x55   : > { %1855 = vmatpush3.bf16.msra.mxu0 %v1999_v53 }
  0x56   : > { %1875 = vmatpush3.bf16.msra.mxu1 %v2000_v54  ;;  %1856 = vmatprep.subr.bf16.mxu0 %v2046_v1 }
  0x57   : > { %1876 = vmatprep.subr.bf16.mxu1 %v2046_v1 }
  0x59   : > { %1857 = vmatpush3.bf16.msra.mxu0 %v2001_v55 }
  0x5a   : > { %1877 = vmatpush3.bf16.msra.mxu1 %v2002_v56  ;;  %1858 = vmatprep.subr.bf16.mxu0 %v2046_v1 }
  0x5b   : > { %1878 = vmatprep.subr.bf16.mxu1 %v2046_v1 }
  0x5d   : > { %1859 = vmatpush3.bf16.msra.mxu0 %v2003_v57 }
  0x5e   : > { %1879 = vmatpush3.bf16.msra.mxu1 %v2004_v58  ;;  %1860 = vmatprep.subr.bf16.mxu0 %v2046_v1 }
  0x5f   : > { %1880 = vmatprep.subr.bf16.mxu1 %v2046_v1 }
  0x61   : > { %1861 = vmatpush3.bf16.msra.mxu0 %v2005_v59 }
  0x62   : > { %1881 = vmatpush3.bf16.msra.mxu1 %v2006_v60  ;;  %1862 = vmatprep.subr.bf16.mxu0 %v2046_v1 }
  0x63   : > { %1882 = vmatprep.subr.bf16.mxu1 %v2046_v1 }
  0x65   : > { %1863 = vmatpush3.bf16.msra.mxu0 %v2007_v61 }
  0x66   : > { %1883 = vmatpush3.bf16.msra.mxu1 %v2008_v62  ;;  %1864 = vmatprep.subr.bf16.mxu0 %v2046_v1 }
  0x67   : > { %1884 = vmatprep.subr.bf16.mxu1 %v2046_v1 }
  0x69   : > { %1865 = vmatpush3.bf16.msra.mxu0 %v2009_v0 }
  0x6a   : > { %1885 = vmatpush3.bf16.msra.mxu1 %v2010_v2  ;;  %1890 = vmatprep.subr.bf16.mxu0 %v2046_v1 }
  0x6b   : > { %1910 = vmatprep.subr.bf16.mxu1 %v2046_v1 }
  0x6c   : > { %1867 = vmatmul.mubr.bf16.vlgmr.msra.gmra.mxu0 %v716_v3 }
  0x6d   : > { %1891 = vmatpush3.bf16.msra.mxu0 %v2012_v4  ;;  %1887 = vmatmul.mubr.bf16.vlgmr.msra.gmra.mxu1 %v716_v3 }
  0x6e   : > { %1911 = vmatpush3.bf16.msra.mxu1 %v2013_v5  ;;  %1892 = vmatprep.subr.bf16.mxu0 %v2046_v1 }
  0x6f   : > { %1912 = vmatprep.subr.bf16.mxu1 %v2046_v1  ;;  %1906 = vmatprep.mubr.msk.bf16.mxu0 %vm2047_vm0, %v2046_v1 }
  0x70   : > { %1926 = vmatprep.mubr.msk.bf16.mxu1 %vm2047_vm0, %v2046_v1 }
  0x71   : > { %1893 = vmatpush3.bf16.msra.mxu0 %v2014_v6 }
  0x72   : > { %1913 = vmatpush3.bf16.msra.mxu1 %v2015_v7  ;;  %1894 = vmatprep.subr.bf16.mxu0 %v2046_v1 }
  0x73   : > { %1914 = vmatprep.subr.bf16.mxu1 %v2046_v1 }
  0x75   : > { %1895 = vmatpush3.bf16.msra.mxu0 %v2016_v10 }
  0x76   : > { %1915 = vmatpush3.bf16.msra.mxu1 %v2017_v11  ;;  %1896 = vmatprep.subr.bf16.mxu0 %v2046_v1 }
  0x77   : > { %1916 = vmatprep.subr.bf16.mxu1 %v2046_v1 }
  0x79   : > { %1897 = vmatpush3.bf16.msra.mxu0 %v2018_v13 }
  0x7a   : > { %1917 = vmatpush3.bf16.msra.mxu1 %v2019_v15  ;;  %1898 = vmatprep.subr.bf16.mxu0 %v2046_v1 }
  0x7b   : > { %1918 = vmatprep.subr.bf16.mxu1 %v2046_v1 }
  0x7d   : > { %1899 = vmatpush3.bf16.msra.mxu0 %v2020_v16 }
  0x7e   : > { %1919 = vmatpush3.bf16.msra.mxu1 %v2021_v18  ;;  %1900 = vmatprep.subr.bf16.mxu0 %v2046_v1 }
  0x7f   : > { %1920 = vmatprep.subr.bf16.mxu1 %v2046_v1 }
  0x81   : > { %1901 = vmatpush3.bf16.msra.mxu0 %v2022_v21 }
  0x82   : > { %1921 = vmatpush3.bf16.msra.mxu1 %v2023_v22  ;;  %1902 = vmatprep.subr.bf16.mxu0 %v2046_v1 }
  0x83   : > { %1922 = vmatprep.subr.bf16.mxu1 %v2046_v1 }
  0x85   : > { %1903 = vmatpush3.bf16.msra.mxu0 %v2024_v25 }
  0x86   : > { %1923 = vmatpush3.bf16.msra.mxu1 %v2025_v26  ;;  %1904 = vmatprep.subr.bf16.mxu0 %v2046_v1 }
  0x87   : > { %1924 = vmatprep.subr.bf16.mxu1 %v2046_v1 }
  0x89   : > { %1905 = vmatpush3.bf16.msra.mxu0 %v2026_v29 }
  0x8a   : > { %1925 = vmatpush3.bf16.msra.mxu1 %v2027_v30  ;;  %1930 = vmatprep.subr.bf16.mxu0 %v2046_v1 }
  0x8c   : > { %1907 = vmatmul.mubr.bf16.vlgmr.msra.gmra.mxu0 %v938_v31 }
  0x8d   : > { %1931 = vmatpush3.bf16.msra.mxu0 %v2028_v32  ;;  %1927 = vmatmul.mubr.bf16.vlgmr.msra.gmra.mxu1 %v2253_v48 }
  0x8e   : > { %1932 = vmatprep.subr.bf16.mxu0 %v2046_v1  ;;  %1946 = vmatprep.mubr.msk.bf16.mxu0 %vm2047_vm0, %v2046_v1 }
  0x91   : > { %1933 = vmatpush3.bf16.msra.mxu0 %v2029_v33 }
  0x92   : > { %1934 = vmatprep.subr.bf16.mxu0 %v2046_v1 }
  0x95   : > { %1935 = vmatpush3.bf16.msra.mxu0 %v2030_v34 }
  0x96   : > { %1936 = vmatprep.subr.bf16.mxu0 %v2046_v1 }
  0x99   : > { %1937 = vmatpush3.bf16.msra.mxu0 %v2031_v35 }
  0x9a   : > { %1938 = vmatprep.subr.bf16.mxu0 %v2046_v1 }
  0x9d   : > { %1939 = vmatpush3.bf16.msra.mxu0 %v2032_v36 }
  0x9e   : > { %1940 = vmatprep.subr.bf16.mxu0 %v2046_v1 }
  0xa1   : > { %1941 = vmatpush3.bf16.msra.mxu0 %v2033_v37 }
  0xa2   : > { %1942 = vmatprep.subr.bf16.mxu0 %v2046_v1 }
  0xa5   : > { %1943 = vmatpush3.bf16.msra.mxu0 %v2034_v38 }
  0xa6   : > { %1944 = vmatprep.subr.bf16.mxu0 %v2046_v1 }
  0xa9   : > { %1945 = vmatpush3.bf16.msra.mxu0 %v2035_v39 }
  0xac   : > { %1947 = vmatmul.mubr.bf16.vlgmr.msra.gmra.mxu0 %v2172_v20 }
  0xec   : > { %v363_v41 = vpop.f32.mrf.mxu0 }
  0xed   : > { %v2439_v42 = vadd.f32 %v1492_v40, %v363_v41  ;;  %v485_v43 = vpop.f32.mrf.mxu1 }
  0xee   : > { %v1788_v44 = vpop.f32.mrf.mxu0 }
  0xef   : > { %v1242_v45 = vsel %vm1241_vm5, %v2439_v42, 0.0  ;;  %v1808_v46 = vpop.f32.mrf.mxu1 }
  0xf0   : > { %1243 = vadd.xlane.f32.xlu0 %v1242_v45  ;;  %v366_v47 = vpop.f32.mrf.mxu0 }
  0xf1   : > { %v488_v1 = vpop.f32.mrf.mxu1 }
  0xf2   : > { %v1789_v48 = vpop.f32.mrf.mxu0 }
  0xf3   : > { %v1809_v49 = vpop.f32.mrf.mxu1 }
 0x10c   : > { %v584_v20 = vpop.f32.mrf.mxu0 }
 0x10d   : > { %v585_v50 = vadd.f32 %v584_v20, %v485_v43  ;;  %v707_v51 = vpop.f32.mrf.mxu1 }
 0x10e   : > { %v1828_v52 = vpop.f32.mrf.mxu0 }
 0x10f   : > { %v2443_v53 = vadd.f32 %v1492_v40, %v585_v50  ;;  %v1848_v54 = vpop.f32.mrf.mxu1 }
 0x110   : > { %v587_v55 = vpop.f32.mrf.mxu0 }
 0x111   : > { %v1254_v56 = vsel %vm1241_vm5, %v2443_v53, 0.0  ;;  %v710_v57 = vpop.f32.mrf.mxu1 }
 0x112   : > { %1255 = vadd.xlane.f32.xlu0 %v1254_v56  ;;  %v1829_v58 = vpop.f32.mrf.mxu0 }
 0x113   : > { %v1849_v59 = vpop.f32.mrf.mxu1 }
 0x12c   : > { %v800_v60 = vpop.f32.mrf.mxu0 }
 0x12d   : > { %v801_v61 = vadd.f32 %v800_v60, %v707_v51  ;;  %v922_v62 = vpop.f32.mrf.mxu1 }
 0x12e   : > { %v1868_v63 = vpop.f32.mrf.mxu0 }
 0x12f   : > { %v2447_v0 = vadd.f32 %v1492_v40, %v801_v61  ;;  %v1888_v2 = vpop.f32.mrf.mxu1 }
 0x130   : > { %v803_v3 = vpop.f32.mrf.mxu0 }
 0x131   : > { %v1265_v4 = vsel %vm1241_vm5, %v2447_v0, 0.0  ;;  %v925_v5 = vpop.f32.mrf.mxu1 }
 0x132   : > { %1266 = vadd.xlane.f32.xlu1 %v1265_v4  ;;  %v1869_v6 = vpop.f32.mrf.mxu0 }
 0x133   : > { %v1889_v7 = vpop.f32.mrf.mxu1 }
 0x14c   : > { %v1022_v8 = vpop.f32.mrf.mxu0 }
 0x14d   : > { %v1127_v9 = vpop.f32.mrf.mxu1  ;;  %v1023_v17 = vadd.f32 %v1022_v8, %v922_v62 }
 0x14e   : > { %v1908_v10 = vpop.f32.mrf.mxu0 }
 0x14f   : > { %v1928_v11 = vpop.f32.mrf.mxu1  ;;  %v1133_v18 = vadd.f32 %v1127_v9, %v1023_v17 }
 0x150   : > { %v1025_v12 = vpop.f32.mrf.mxu0 }
 0x151   : > { %v1130_v13 = vpop.f32.mrf.mxu1 }
 0x152   : > { %v1909_v15 = vpop.f32.mrf.mxu0 }
 0x153   : > { %v1929_v16 = vpop.f32.mrf.mxu1 }
 0x16c   : > { %v1233_v19 = vpop.f32.mrf.mxu0 }
 0x16d   : > { %v1239_v21 = vadd.f32 %v1233_v19, %v1133_v18 }
 0x16e   : > { %v1948_v22 = vpop.f32.mrf.mxu0 }
 0x16f   : > { %v1240_v23 = vadd.f32 %v1492_v40, %v1239_v21 }
 0x170   : > { %v1236_v24 = vpop.f32.mrf.mxu0 }
 0x171   : > { %v1276_v25 = vsel %vm1241_vm5, %v1240_v23, 0.0 }
 0x172   : > { %1277 = vadd.xlane.f32.xlu1 %v1276_v25  ;;  %v1949_v26 = vpop.f32.mrf.mxu0 }
 0x179   : > { %v1244_v27 = vpop.xlane.xlu0 %1243 }
 0x17a   : > { %v1246_v31 = vsel %vm1245_vm6, %v1244_v27, 0.0 }
 0x17b   : > { %v1247_v34 = vrot.slane %v1246_v31, 4 }
 0x17d   : > { %v1248_v37 = vadd.f32 %v1247_v34, %v1246_v31 }
 0x17f   : > { %v1249_v40 = vrot.slane %v1248_v37, 2 }
 0x181   : > { %v1250_v44 = vadd.f32 %v1249_v40, %v1248_v37 }
 0x183   : > { %v1251_v49 = vrot.slane %v1250_v44, 1 }
 0x185   : > { %v1252_v54 = vadd.f32 %v1251_v49, %v1250_v44  ;;  %v2049_v49 = vmov 1983009808  }
 0x19b   : > { %v1256_v28 = vpop.xlane.xlu0 %1255 }
 0x19c   : > { %v1257_v30 = vsel %vm1245_vm6, %v1256_v28, 0.0 }
 0x19d   : > { %v1258_v33 = vrot.slane %v1257_v30, 4 }
 0x19f   : > { %v1259_v36 = vadd.f32 %v1258_v33, %v1257_v30 }
 0x1a1   : > { %v1260_v39 = vrot.slane %v1259_v36, 2 }
 0x1a3   : > { %v1261_v43 = vadd.f32 %v1260_v39, %v1259_v36 }
 0x1a5   : > { %v1262_v1 = vrot.slane %v1261_v43, 1 }
 0x1a7   : > { %v1263_v51 = vadd.f32 %v1262_v1, %v1261_v43 }
 0x1a9   : > { %v1264_v57 = vadd.f32 %v1263_v51, %v1252_v54  ;;  %v1682_v54 = vld [vmem:[%s2513_s3 + $0x8] sm:$0xf] }
 0x1bb   : > { %v1267_v29 = vpop.xlane.xlu1 %1266 }
 0x1bc   : > { %v1268_v32 = vsel %vm1245_vm6, %v1267_v29, 0.0 }
 0x1bd   : > { %v1269_v35 = vrot.slane %v1268_v32, 4 }
 0x1bf   : > { %v1270_v38 = vadd.f32 %v1269_v35, %v1268_v32 }
 0x1c1   : > { %v1271_v41 = vrot.slane %v1270_v38, 2 }
 0x1c3   : > { %v1272_v45 = vadd.f32 %v1271_v41, %v1270_v38 }
 0x1c5   : > { %v1273_v20 = vrot.slane %v1272_v45, 1 }
 0x1c7   : > { %v1274_v55 = vadd.f32 %v1273_v20, %v1272_v45  ;;  %v1367_v20 = vunpack.c.l.s4 %v2049_v49 }
 0x1c9   : > { %v1275_v59 = vadd.f32 %v1274_v55, %v1264_v57  ;;  %v1344_v55 = vld [vmem:[%s2513_s3] sm:$0xf]  ;;  %v1685_v57 = vld [vmem:[%s2514_s4 + $0xc] sm:$0xf] }
 0x1fb   : > { %v1278_v46 = vpop.xlane.xlu1 %1277 }
 0x1fc   : > { %v1279_v47 = vsel %vm1245_vm6, %v1278_v46, 0.0 }
 0x1fd   : > { %v1280_v48 = vrot.slane %v1279_v47, 4 }
 0x1ff   : > { %v1281_v50 = vadd.f32 %v1280_v48, %v1279_v47 }
 0x201   : > { %v1282_v52 = vrot.slane %v1281_v50, 2 }
 0x203   : > { %v1283_v56 = vadd.f32 %v1282_v52, %v1281_v50  ;;  %v1684_v50 = vld [vmem:[%s2513_s3 + $0xc] sm:$0xf]  ;;  %v1680_v52 = vld [vmem:[%s2513_s3 + $0x4] sm:$0xf] }
 0x205   : > { %v1284_v58 = vrot.slane %v1283_v56, 1 }
 0x207   : > { %v1285_v60 = vadd.f32 %v1284_v58, %v1283_v56 }
 0x209   : > { %v1286_v61 = vadd.f32 %v1285_v60, %v1275_v59 }
 0x20b   : > { %v1287_v62 = vmul.f32 0.0009765625, %v1286_v61  ;;  %v1368_v61 = vunpack.c.0.s8 %v1367_v20 }
 0x20d   : > { %v2457_v63 = vsub.f32 %v2443_v53, %v1287_v62  ;;  %v2460_v2 = vsub.f32 %v2439_v42, %v1287_v62  ;;  %v1327_v3 = vsub.f32 %v1240_v23, %v1287_v62  ;;  %v1314_v4 = vsub.f32 %v2447_v0, %v1287_v62  ;;  %v1681_v62 = vld [vmem:[%s2514_s4 + $0x4] sm:$0xf] }
 0x20f   : > { %v1302_v5 = vmul.f32 %v2457_v63, %v2457_v63  ;;  %v1289_v6 = vmul.f32 %v2460_v2, %v2460_v2  ;;  %v1328_v9 = vmul.f32 %v1327_v3, %v1327_v3  ;;  %v1315_v10 = vmul.f32 %v1314_v4, %v1314_v4 }
 0x211   : > { %v1303_v7 = vsel %vm1241_vm5, %v1302_v5, 0.0  ;;  %v1290_v8 = vsel %vm1241_vm5, %v1289_v6, 0.0  ;;  %v1329_v42 = vsel %vm1241_vm5, %v1328_v9, 0.0  ;;  %v1316_v53 = vsel %vm1241_vm5, %v1315_v10, 0.0  ;;  %v1683_v5 = vld [vmem:[%s2514_s4 + $0x8] sm:$0xf] }
 0x212   : > { %1304 = vadd.xlane.f32.xlu1 %v1303_v7  ;;  %1291 = vadd.xlane.f32.xlu0 %v1290_v8 }
 0x216   : > { %1330 = vadd.xlane.f32.xlu1 %v1329_v42  ;;  %1317 = vadd.xlane.f32.xlu0 %v1316_v53  ;;  %v1371_v42 = vsub.s32 %v1368_v61, %v2147_v14 }
 0x29b   : > { %v1305_v0 = vpop.xlane.xlu1 %1304  ;;  %v1292_v11 = vpop.xlane.xlu0 %1291 }
 0x29c   : > { %v1306_v12 = vsel %vm1245_vm6, %v1305_v0, 0.0  ;;  %v1293_v13 = vsel %vm1245_vm6, %v1292_v11, 0.0 }
 0x29d   : > { %v1307_v15 = vrot.slane %v1306_v12, 4  ;;  %v1294_v16 = vrot.slane %v1293_v13, 4 }
 0x29f   : > { %v1308_v17 = vadd.f32 %v1307_v15, %v1306_v12  ;;  %v1295_v18 = vadd.f32 %v1294_v16, %v1293_v13  ;;  %v1331_v19 = vpop.xlane.xlu1 %1330  ;;  %v1318_v21 = vpop.xlane.xlu0 %1317 }
 0x2a0   : > { %v1332_v22 = vsel %vm1245_vm6, %v1331_v19, 0.0  ;;  %v1319_v23 = vsel %vm1245_vm6, %v1318_v21, 0.0 }
 0x2a1   : > { %v1309_v24 = vrot.slane %v1308_v17, 2  ;;  %v1296_v25 = vrot.slane %v1295_v18, 2  ;;  %v1333_v26 = vrot.slane %v1332_v22, 4  ;;  %v1320_v27 = vrot.slane %v1319_v23, 4 }
 0x2a3   : > { %v1310_v28 = vadd.f32 %v1309_v24, %v1308_v17  ;;  %v1297_v29 = vadd.f32 %v1296_v25, %v1295_v18  ;;  %v1334_v30 = vadd.f32 %v1333_v26, %v1332_v22  ;;  %v1321_v31 = vadd.f32 %v1320_v27, %v1319_v23 }
 0x2a5   : > { %v1311_v32 = vrot.slane %v1310_v28, 1  ;;  %v1298_v33 = vrot.slane %v1297_v29, 1  ;;  %v1335_v34 = vrot.slane %v1334_v30, 2  ;;  %v1322_v35 = vrot.slane %v1321_v31, 2 }
 0x2a7   : > { %v1312_v36 = vadd.f32 %v1311_v32, %v1310_v28  ;;  %v1299_v37 = vadd.f32 %v1298_v33, %v1297_v29  ;;  %v1336_v38 = vadd.f32 %v1335_v34, %v1334_v30  ;;  %v1323_v39 = vadd.f32 %v1322_v35, %v1321_v31 }
 0x2a9   : > { %v1337_v40 = vrot.slane %v1336_v38, 1  ;;  %v1324_v41 = vrot.slane %v1323_v39, 1  ;;  %v1313_v43 = vadd.f32 %v1312_v36, %v1299_v37 }
 0x2ab   : > { %v1325_v44 = vadd.f32 %v1324_v41, %v1323_v39  ;;  %v1338_v45 = vadd.f32 %v1337_v40, %v1336_v38 }
 0x2ad   : > { %v1326_v46 = vadd.f32 %v1325_v44, %v1313_v43 }
 0x2af   : > { %v1339_v47 = vadd.f32 %v1338_v45, %v1326_v46 }
 0x2b1   : > { %v1340_v1 = vmul.f32 0.0009765625, %v1339_v47 }
 0x2b3   : > { %v1341_v48 = vadd.f32 1e-05, %v1340_v1 }
 0x2b5   : > { %2036 = vrsqrt.f32 %v1341_v48 }
 0x2c2   : > { %v2037_v51 = vpop.eup %2036 }
 0x2c3   : > { %v1390_v56 = vmul.f32 %v2037_v51, %v1327_v3  ;;  %v1354_v58 = vmul.f32 %v2037_v51, %v2457_v63  ;;  %v1378_v59 = vmul.f32 %v2037_v51, %v1314_v4  ;;  %v1343_v60 = vmul.f32 %v2037_v51, %v2460_v2  ;;  %v1346_v3 = vld [vmem:[%s2514_s4] sm:$0xf] }
 0x2c5   : > { %v1393_v6 = vmul.f32 %v1684_v50, %v1390_v56  ;;  %v1357_v7 = vmul.f32 %v1680_v52, %v1354_v58  ;;  %v1381_v8 = vmul.f32 %v1682_v54, %v1378_v59  ;;  %v1345_v63 = vmul.f32 %v1344_v55, %v1343_v60 }
 0x2c7   : > { %v1396_v4 = vadd.f32 %v1685_v57, %v1393_v6  ;;  %v1360_v9 = vadd.f32 %v1681_v62, %v1357_v7  ;;  %v1384_v2 = vadd.f32 %v1683_v5, %v1381_v8  ;;  %v1347_v10 = vadd.f32 %v1346_v3, %v1345_v63 }
 0x2c9   : > { %vm1397_vm7 = vcmp.gt.f32.partialorder %v1396_v4, 0.0  ;;  %v1398_v53 = vmul.f32 0.01, %v1396_v4  ;;  %vm1361_vm8 = vcmp.gt.f32.partialorder %v1360_v9, 0.0  ;;  %v1362_v0 = vmul.f32 0.01, %v1360_v9 }
 0x2ca   : > { %vm1385_vm9 = vcmp.gt.f32.partialorder %v1384_v2, 0.0  ;;  %v1386_v11 = vmul.f32 0.01, %v1384_v2  ;;  %vm1348_vm10 = vcmp.gt.f32.partialorder %v1347_v10, 0.0  ;;  %v1349_v12 = vmul.f32 0.01, %v1347_v10 }
 0x2cb   : > { %v1399_v13 = vsel %vm1397_vm7, %v1396_v4, %v1398_v53  ;;  %v1363_v15 = vsel %vm1361_vm8, %v1360_v9, %v1362_v0 }
 0x2cc   : > { %v1400_v16 = vpack.c.bf16 %v1399_v13, %v1399_v13  ;;  %v1364_v17 = vpack.c.bf16 %v1363_v15, %v1363_v15  ;;  %v1387_v18 = vsel %vm1385_vm9, %v1384_v2, %v1386_v11  ;;  %v1350_v14 = vsel %vm1348_vm10, %v1347_v10, %v1349_v12 }
 0x2cd   : > { %v1388_v19 = vpack.c.bf16 %v1387_v18, %v1387_v18  ;;  %v1351_v21 = vpack.c.bf16 %v1350_v14, %v1350_v14 }
 0x2ce   : > { %v1408_v22 = vrot.slane %v1400_v16, %v1371_v42  ;;  %v1372_v23 = vrot.slane %v1364_v17, %v1371_v42 }
 0x2cf   : > { %1389 = vst.msk [vmem:[%s221_s8 + $0x2] sm:$0x3] %vm1352_vm11, %v1388_v19  ;;  %1353 = vst.msk [vmem:[%s221_s8] sm:$0x3] %vm1352_vm11, %v1351_v21 }
 0x2d0   : > { %1409 = vrot.lane.b32.xlu1 %v1408_v22, %s2050_s9  ;;  %1373 = vrot.lane.b32.xlu0 %v1372_v23, %s2050_s9 }
 0x342   : > { %v1410_v24 = vpop.permute.xlu1 %1409  ;;  %v1374_v25 = vpop.permute.xlu0 %1373 }
 0x343   : > { %1412 = vst.msk [vmem:[%s221_s8 + $0x2] sm:$0x3] %vm1376_vm12, %v1410_v24  ;;  %1377 = vst.msk [vmem:[%s221_s8] sm:$0x3] %vm1376_vm12, %v1374_v25 }
 0x344 PF: > { %s15_s18 = sadd.s32 1, %s2044_s18  }
 0x345   : > { %p12_p4 = scmp.ge.s32.totalorder %s15_s18, 4  }
 0x347   :  { %14 = sbr.rel (!%p12_p4) target bundleno = 1 (0x1), region = 84 }

// kernel: forward.6
= control target key start
LH: loop header
LB: loop body
LE: loop exit
PB: predicated region body
PF: predicated region fallthrough
CT: control target
= control target key end

     0   :  { %s1783_s18 = smov 0   ;;  %s2164_s0 = inlined_call_operand.vmem [shape: bf16[2,21,64], index: 0, kind: input, shape index: {}]   ;;  %s2165_s1 = inlined_call_operand.vmem [shape: bf16[9,64,32], index: 1, kind: input, shape index: {}]   ;;  %s2166_s2 = inlined_call_operand.vmem [shape: f32[1,32], index: 2, kind: input, shape index: {}]   ;;  %s2167_s3 = inlined_call_operand.vmem [shape: f32[4,16,32], index: 3, kind: input, shape index: {}]   ;;  %s2168_s4 = inlined_call_operand.vmem [shape: f32[4,16,32], index: 4, kind: input, shape index: {}]   ;;  %s2169_s5 = inlined_call_operand.vmem [shape: bf16[2,16,128], index: 5, kind: output, shape index: {}]  }
   0x1 LB: > { %s1376_s19 = sadd.s32 4294967295, %s1745_s18   ;;  %p1380_p0 = scmp.ge.s32.totalorder %s1745_s18, 1  ;;  %s1745_s18 = sphi %s1783_s18, %s15_s18  }
   0x2   : > { %p187_p1 = scmp.lt.s32.totalorder %s1745_s18, 3 }
   0x4   : > { %p188_p2 = pnand %p1380_p0, %p187_p1 }
   0x5   : > { %p215_p3 = scmp.lt.s32.totalorder (!%p188_p2), %s1376_s19, 1  ;;  %s1750_s14 = smov (!%p188_p2), 32  }
   0x6   : > { %191 = sbr.rel (%p188_p2) target bundleno = 778 (0x30a), region = 40  ;;  %s1752_s20 = smov (!%p188_p2), 96  }
   0xb   : > { %v1699_v0 = vld [vmem:[%s2165_s1 + $0x98] sm:$0xff]   ;;  %v1747_v1 = vmov 0.0   ;;  %v231_v3 = vlaneseq  ;;  %v1701_v4 = vld [vmem:[%s2165_s1 + $0x90] sm:$0xff]   ;;  %vm1748_vm0 = vmmov 0   ;;  %s2171_s19 = smov (!%p215_p3, %s1376_s19), 1  ;;  %v1703_v7 = vld [vmem:[%s2165_s1 + $0x88] sm:$0xff]  }
   0xc   : > { %1576 = vmatprep.subr.bf16.mxu0 %v1747_v1  ;;  %1588 = vmatprep.subr.bf16.mxu1 %v1747_v1  ;;  %v1700_v2 = vld [vmem:[%s2165_s1 + $0xb8] sm:$0xff]   ;;  %v1702_v5 = vld [vmem:[%s2165_s1 + $0xb0] sm:$0xff]   ;;  %s1684_s30 = smul.u32 12, %s2171_s19  ;;  %v1704_v8 = vld [vmem:[%s2165_s1 + $0xa8] sm:$0xff]   ;;  %vm353_vm1 = vcmask 523264   ;;  %v1749_v20 = vmov 0  }
   0xd   : > { %1577 = vmatpush3.bf16.msra.mxu0 %v1699_v0  ;;  %1584 = vmatprep.mubr.msk.bf16.mxu0 %vm1748_vm0, %v1747_v1  ;;  %v232_v6 = vshrl.u32 %v231_v3, 7  ;;  %v1705_v10 = vld [vmem:[%s2165_s1 + $0x80] sm:$0xff]   ;;  %v1708_v17 = vld [vmem:[%s2165_s1 + $0x78] sm:$0xff]   ;;  %v1710_v19 = vld [vmem:[%s2165_s1 + $0x70] sm:$0xff]   ;;  %vm264_vm5 = vsmask.f32 256 }
   0xe   : > { %1589 = vmatpush3.bf16.msra.mxu1 %v1700_v2  ;;  %1578 = vmatprep.subr.bf16.mxu0 %v1747_v1  ;;  %s1825_s10 = scalar_lea.vmem %s2164_s0, %s1684_s30  ;;  %v1706_v14 = vld [vmem:[%s2165_s1 + $0xa0] sm:$0xff]   ;;  %v1709_v18 = vld [vmem:[%s2165_s1 + $0xf8] sm:$0xff]   ;;  %v1711_v22 = vld [vmem:[%s2165_s1 + $0xf0] sm:$0xff]   ;;  %vm265_vm7 = vsmask.f32 4368  ;;  %s1522_s13 = sshll.u32 %s2171_s19, 3 }
   0xf   : > { %1590 = vmatprep.subr.bf16.mxu1 %v1747_v1  ;;  %1596 = vmatprep.mubr.msk.bf16.mxu1 %vm1748_vm0, %v1747_v1  ;;  %v233_v9 = vadd.s32 8, %v232_v6  ;;  %v1831_v11 = vld [vmem:[%s1825_s10] sm:$0xf]  ;;  %v238_v12 = vand.u32 3, %v232_v6  ;;  %v1834_v13 = vld [vmem:[%s1825_s10 + $0x4] sm:$0xf]  ;;  %vm266_vm8 = vmor %vm264_vm5, %vm265_vm7  ;;  %s2151_s17 = scalar_lea.vmem %s2169_s5, %s1522_s13 }
  0x10   : > { %v1843_v16 = vcombine.low %v1831_v11, %v1834_v13  ;;  %v1712_v28 = vld [vmem:[%s2165_s1 + $0x68] sm:$0xff]   ;;  %v1714_v37 = vld [vmem:[%s2165_s1 + $0x60] sm:$0xff]   ;;  %vm489_vm12 = vsmask.f32 7424  ;;  %v1717_v48 = vld [vmem:[%s2165_s1 + $0x58] sm:$0xff]   ;;  %vm658_vm5 = vcmask 1045504  }
  0x11   : > { %1579 = vmatpush3.bf16.msra.mxu0 %v1701_v4  ;;  %v245_v15 = vand.u32 3, %v233_v9  ;;  %vm258_vm2 = vcmp.lt.s32.totalorder %v238_v12, 3  ;;  %v1713_v30 = vld [vmem:[%s2165_s1 + $0xe8] sm:$0xff]   ;;  %v1715_v40 = vld [vmem:[%s2165_s1 + $0xe0] sm:$0xff]   ;;  %v1716_v54 = vld [vmem:[%s2165_s1 + $0x38] sm:$0xff]   ;;  %s1751_s19 = smov 64  }
  0x12   : > { %1591 = vmatpush3.bf16.msra.mxu1 %v1702_v5  ;;  %1580 = vmatprep.subr.bf16.mxu0 %v1747_v1  ;;  %vm260_vm4 = vmpackc.low %vm258_vm2, %vm258_vm2  ;;  %v1876_v31 = vld [vmem:[%s1825_s10 + $0x8] sm:$0x7]  ;;  %v1719_v55 = vld [vmem:[%s2165_s1 + $0x50] sm:$0xff]   ;;  %vm290_vm13 = vsmask.f32 2304  ;;  %v659_v6 = vrot.slane %v1843_v16, 2 }
  0x13   : > { %1592 = vmatprep.subr.bf16.mxu1 %v1747_v1  ;;  %vm259_vm3 = vcmp.lt.s32.totalorder %v245_v15, 3  ;;  %v262_v21 = vsel %vm260_vm4, 65537, %v1749_v20  ;;  %vm291_vm14 = vsmask.f32 6416  ;;  %v1718_v59 = vld [vmem:[%s2165_s1 + $0x30] sm:$0xff]   ;;  %v1721_v61 = vld [vmem:[%s2165_s1 + $0x48] sm:$0xff]   ;;  %v1448_v0 = vcombine.low %v1876_v31, %v1876_v31 }
  0x14   : > { %vm261_vm6 = vmpackc.low %vm259_vm3, %vm259_vm3  ;;  %v268_v24 = vshrl.u32 %v262_v21, 16  ;;  %v271_v25 = vshll.u32 %v262_v21, 16  ;;  %v1720_v4 = vld [vmem:[%s2165_s1 + $0x28] sm:$0xff]   ;;  %v1723_v5 = vld [vmem:[%s2165_s1 + $0x40] sm:$0xff]  }
  0x15   : > { %1581 = vmatpush3.bf16.msra.mxu0 %v1703_v7  ;;  %v263_v23 = vsel %vm261_vm6, 65537, %v1749_v20  ;;  %vm292_vm15 = vmor %vm290_vm13, %vm291_vm14  ;;  %v660_v7 = vrot.slane %v1448_v0, 2  ;;  %v1726_v9 = vld [vmem:[%s2165_s1 + $0xd8] sm:$0xff]   ;;  %vm822_vm6 = vsmask.f32 5376  ;;  %vm1219_vm13 = vcmask 257024  }
  0x16   : > { %1593 = vmatpush3.bf16.msra.mxu1 %v1704_v8  ;;  %1582 = vmatprep.subr.bf16.mxu0 %v1747_v1  ;;  %v276_v26 = vshrl.u32 %v263_v23, 16  ;;  %v279_v27 = vshll.u32 %v263_v23, 16  ;;  %v270_v29 = vrot.slane %v268_v24, 7  ;;  %v293_v50 = vrot.slane %v268_v24, 5  ;;  %v1722_v8 = vld [vmem:[%s2165_s1 + $0x20] sm:$0xff]  }
  0x17   : > { %1594 = vmatprep.subr.bf16.mxu1 %v1747_v1  ;;  %v294_v56 = vrot.slane %v271_v25, 6  ;;  %v661_v15 = vsel %vm658_vm5, %v659_v6, %v660_v7 }
  0x18   : > { %v278_v32 = vrot.slane %v276_v26, 7  ;;  %v273_v33 = vor.u32 %v271_v25, %v270_v29  ;;  %v274_v34 = vrot.slane %v270_v29, 4  ;;  %v297_v49 = vrot.slane %v276_v26, 5  ;;  %v1729_v25 = vld [vmem:[%s2165_s1 + $0x8] sm:$0xff]   ;;  %v1732_v26 = vld [vmem:[%s2165_s1 + $0xc0] sm:$0xff]  }
  0x19   : > { %1583 = vmatpush3.bf16.msra.mxu0 %v1705_v10  ;;  %v298_v57 = vrot.slane %v279_v27, 6  ;;  %v295_v60 = vor.u32 %v294_v56, %v293_v50 }
  0x1a   : > { %1595 = vmatpush3.bf16.msra.mxu1 %v1706_v14  ;;  %1600 = vmatprep.subr.bf16.mxu0 %v1747_v1  ;;  %v281_v35 = vor.u32 %v279_v27, %v278_v32  ;;  %v283_v36 = vrot.slane %v278_v32, 4  ;;  %vm284_vm9 = vcmp.ne.s16.totalorder %v273_v33, 0 }
  0x1b   : > { %1612 = vmatprep.subr.bf16.mxu1 %v1747_v1  ;;  %v287_v39 = vsel %vm284_vm9, %v1831_v11, 0  ;;  %v299_v62 = vor.u32 %v298_v57, %v297_v49  ;;  %v296_v63 = vrot.slane %v295_v60, 4  ;;  %vm302_vm2 = vcmp.ne.s16.totalorder %v295_v60, 0 }
  0x1c   : > { %1585 = vmatmul.mubr.msk.bf16.vlgmr.msra.gmra.mxu0 %vm353_vm1, %v1843_v16  ;;  %v282_v38 = vsel %vm266_vm8, %v274_v34, %v281_v35  ;;  %vm286_vm10 = vcmp.ne.s16.totalorder %v283_v36, 0  ;;  %v305_v10 = vsel %vm302_vm2, %v1831_v11, 0  ;;  %v1727_v11 = vld [vmem:[%s2165_s1 + $0x10] sm:$0xff]   ;;  %v1733_v35 = vld [vmem:[%s2165_s1 + $0x118] sm:$0xff]   ;;  %vm1285_vm2 = vcmask 781824  }
  0x1d   : > { %1601 = vmatpush3.bf16.msra.mxu0 %v1708_v17  ;;  %1597 = vmatmul.mubr.msk.bf16.vlgmr.msra.gmra.mxu1 %vm353_vm1, %v1843_v16  ;;  %vm285_vm11 = vcmp.ne.s16.totalorder %v282_v38, 0  ;;  %v289_v41 = vsel %vm286_vm10, %v1876_v31, 0  ;;  %v301_v2 = vrot.slane %v299_v62, 4  ;;  %v300_v3 = vsel %vm292_vm15, %v296_v63, %v299_v62  ;;  %v1725_v17 = vld [vmem:[%s2165_s1 + $0x18] sm:$0xff]   ;;  %v1734_v36 = vld [vmem:[%s2165_s1 + $0x110] sm:$0xff]   ;;  %v1736_v38 = vld [vmem:[%s2165_s1 + $0x100] sm:$0xff]  }
  0x1e   : > { %1613 = vmatpush3.bf16.msra.mxu1 %v1709_v18  ;;  %1602 = vmatprep.subr.bf16.mxu0 %v1747_v1  ;;  %v288_v42 = vsel %vm285_vm11, %v1834_v13, 0  ;;  %v1421_v43 = vcombine.low %v289_v41, %v289_v41  ;;  %vm303_vm3 = vcmp.ne.s16.totalorder %v300_v3, 0  ;;  %v1728_v18 = vld [vmem:[%s2165_s1 + $0xd0] sm:$0xff]   ;;  %vm1252_vm15 = vcmask 519424  }
  0x1f   : > { %1614 = vmatprep.subr.bf16.mxu1 %v1747_v1  ;;  %1608 = vmatprep.mubr.msk.bf16.mxu0 %vm1748_vm0, %v1747_v1  ;;  %v1420_v44 = vcombine.low %v287_v39, %v288_v42  ;;  %vm304_vm4 = vcmp.ne.s16.totalorder %v301_v2, 0  ;;  %v306_v12 = vsel %vm303_vm3, %v1834_v13, 0  ;;  %v1730_v13 = vld [vmem:[%s2165_s1 + $0xc8] sm:$0xff]   ;;  %v2005_v39 = vld [vmem:[%s2166_s2] ss:$0 sm:$0xff]  ;;  %vm1318_vm3 = vcmask 1044224  }
  0x20   : > { %1620 = vmatprep.mubr.msk.bf16.mxu1 %vm1748_vm0, %v1747_v1  ;;  %v498_v45 = vshll.u32 %v1421_v43, 16  ;;  %v307_v14 = vsel %vm304_vm4, %v1876_v31, 0  ;;  %v1731_v31 = vld [vmem:[%s2165_s1] sm:$0xff]  }
  0x21   : > { %1603 = vmatpush3.bf16.msra.mxu0 %v1710_v19  ;;  %v491_v46 = vshrl.u32 %v1420_v44, 16  ;;  %v493_v47 = vshll.u32 %v1420_v44, 16  ;;  %v1467_v19 = vcombine.low %v305_v10, %v306_v12  ;;  %v1468_v20 = vcombine.low %v307_v14, %v307_v14 }
  0x22   : > { %1615 = vmatpush3.bf16.msra.mxu1 %v1711_v22  ;;  %1604 = vmatprep.subr.bf16.mxu0 %v1747_v1  ;;  %v500_v52 = vrot.slane %v498_v45, 1 }
  0x23   : > { %1616 = vmatprep.subr.bf16.mxu1 %v1747_v1  ;;  %v495_v51 = vrot.slane %v493_v47, 1  ;;  %v824_v21 = vshrl.u32 %v1467_v19, 16  ;;  %v827_v22 = vshll.u32 %v1467_v19, 16  ;;  %v832_v23 = vshrl.u32 %v1468_v20, 16 }
  0x24   : > { %v835_v24 = vshll.u32 %v1468_v20, 16 }
  0x25   : > { %1605 = vmatpush3.bf16.msra.mxu0 %v1712_v28  ;;  %v496_v53 = vor.u32 %v495_v51, %v491_v46  ;;  %v826_v27 = vrot.slane %v824_v21, 2  ;;  %v829_v28 = vrot.slane %v827_v22, 3  ;;  %v834_v29 = vrot.slane %v832_v23, 2 }
  0x26   : > { %1617 = vmatpush3.bf16.msra.mxu1 %v1713_v30  ;;  %1606 = vmatprep.subr.bf16.mxu0 %v1747_v1  ;;  %v837_v30 = vrot.slane %v835_v24, 3 }
  0x27   : > { %1618 = vmatprep.subr.bf16.mxu1 %v1747_v1  ;;  %v1909_v58 = vsel %vm489_vm12, %v496_v53, %v500_v52  ;;  %v830_v32 = vor.u32 %v829_v28, %v826_v27 }
  0x28   : > { %v838_v33 = vor.u32 %v837_v30, %v834_v29 }
  0x29   : > { %1607 = vmatpush3.bf16.msra.mxu0 %v1714_v37  ;;  %v1735_v37 = vld [vmem:[%s2165_s1 + $0x108] sm:$0xff]  }
  0x2a   : > { %1619 = vmatpush3.bf16.msra.mxu1 %v1715_v40  ;;  %1624 = vmatprep.subr.bf16.mxu0 %v1747_v1  ;;  %v839_v34 = vsel %vm822_vm6, %v830_v32, %v838_v33 }
  0x2b   : > { %1636 = vmatprep.subr.bf16.mxu1 %v1747_v1 }
  0x2c   : > { %1609 = vmatmul.mubr.msk.bf16.vlgmr.msra.gmra.mxu0 %vm353_vm1, %v1909_v58 }
  0x2d   : > { %1621 = vmatmul.mubr.msk.bf16.vlgmr.msra.gmra.mxu1 %vm353_vm1, %v1843_v16  ;;  %1625 = vmatpush3.bf16.msra.mxu0 %v1716_v54 }
  0x2e   : > { %1637 = vmatpush3.bf16.msra.mxu1 %v1717_v48  ;;  %1644 = vmatprep.mubr.msk.bf16.mxu1 %vm1748_vm0, %v1747_v1 }
  0x2f   : > { %1638 = vmatprep.subr.bf16.mxu1 %v1747_v1  ;;  %1626 = vmatprep.subr.bf16.mxu0 %v1747_v1 }
  0x30   : > { %1632 = vmatprep.mubr.msk.bf16.mxu0 %vm1748_vm0, %v1747_v1 }
  0x31   : > { %1627 = vmatpush3.bf16.msra.mxu0 %v1718_v59 }
  0x32   : > { %1639 = vmatpush3.bf16.msra.mxu1 %v1719_v55  ;;  %1628 = vmatprep.subr.bf16.mxu0 %v1747_v1 }
  0x33   : > { %1640 = vmatprep.subr.bf16.mxu1 %v1747_v1 }
  0x35   : > { %1629 = vmatpush3.bf16.msra.mxu0 %v1720_v4 }
  0x36   : > { %1641 = vmatpush3.bf16.msra.mxu1 %v1721_v61  ;;  %1630 = vmatprep.subr.bf16.mxu0 %v1747_v1 }
  0x37   : > { %1642 = vmatprep.subr.bf16.mxu1 %v1747_v1 }
  0x39   : > { %1631 = vmatpush3.bf16.msra.mxu0 %v1722_v8 }
  0x3a   : > { %1643 = vmatpush3.bf16.msra.mxu1 %v1723_v5  ;;  %1648 = vmatprep.subr.bf16.mxu0 %v1747_v1 }
  0x3b   : > { %1660 = vmatprep.subr.bf16.mxu1 %v1747_v1 }
  0x3c   : > { %1633 = vmatmul.mubr.msk.bf16.vlgmr.msra.gmra.mxu0 %vm353_vm1, %v661_v15 }
  0x3d   : > { %1645 = vmatmul.mubr.msk.bf16.vlgmr.msra.gmra.mxu1 %vm353_vm1, %v661_v15  ;;  %1649 = vmatpush3.bf16.msra.mxu0 %v1725_v17 }
  0x3e   : > { %1661 = vmatpush3.bf16.msra.mxu1 %v1726_v9  ;;  %1668 = vmatprep.mubr.msk.bf16.mxu1 %vm1748_vm0, %v1747_v1 }
  0x3f   : > { %1662 = vmatprep.subr.bf16.mxu1 %v1747_v1  ;;  %1650 = vmatprep.subr.bf16.mxu0 %v1747_v1 }
  0x40   : > { %1656 = vmatprep.mubr.msk.bf16.mxu0 %vm1748_vm0, %v1747_v1 }
  0x41   : > { %1651 = vmatpush3.bf16.msra.mxu0 %v1727_v11 }
  0x42   : > { %1663 = vmatpush3.bf16.msra.mxu1 %v1728_v18  ;;  %1652 = vmatprep.subr.bf16.mxu0 %v1747_v1 }
  0x43   : > { %1664 = vmatprep.subr.bf16.mxu1 %v1747_v1 }
  0x45   : > { %1653 = vmatpush3.bf16.msra.mxu0 %v1729_v25 }
  0x46   : > { %1665 = vmatpush3.bf16.msra.mxu1 %v1730_v13  ;;  %1654 = vmatprep.subr.bf16.mxu0 %v1747_v1 }
  0x47   : > { %1666 = vmatprep.subr.bf16.mxu1 %v1747_v1 }
  0x49   : > { %1655 = vmatpush3.bf16.msra.mxu0 %v1731_v31 }
  0x4a   : > { %1667 = vmatpush3.bf16.msra.mxu1 %v1732_v26  ;;  %1672 = vmatprep.subr.bf16.mxu0 %v1747_v1 }
  0x4c   : > { %1657 = vmatmul.mubr.msk.bf16.vlgmr.msra.gmra.mxu0 %vm353_vm1, %v839_v34 }
  0x4d   : > { %1669 = vmatmul.mubr.msk.bf16.vlgmr.msra.gmra.mxu1 %vm353_vm1, %v1909_v58  ;;  %1673 = vmatpush3.bf16.msra.mxu0 %v1733_v35 }
  0x4e   : > { %1680 = vmatprep.mubr.msk.bf16.mxu0 %vm1748_vm0, %v1747_v1  ;;  %1674 = vmatprep.subr.bf16.mxu0 %v1747_v1  ;;  %vm1062_vm0 = vcmask 261120  }
  0x51   : > { %1675 = vmatpush3.bf16.msra.mxu0 %v1734_v36 }
  0x52   : > { %1676 = vmatprep.subr.bf16.mxu0 %v1747_v1 }
  0x55   : > { %1677 = vmatpush3.bf16.msra.mxu0 %v1735_v37 }
  0x56   : > { %1678 = vmatprep.subr.bf16.mxu0 %v1747_v1 }
  0x59   : > { %1679 = vmatpush3.bf16.msra.mxu0 %v1736_v38 }
  0x5c   : > { %1681 = vmatmul.mubr.msk.bf16.vlgmr.msra.gmra.mxu0 %vm353_vm1, %v1843_v16 }
  0xdc   : > { %v391_v40 = vpop.f32.mrf.mxu0 }
  0xdd   : > { %v2008_v41 = vadd.f32 %v2005_v39, %v391_v40  ;;  %v474_v42 = vpop.f32.mrf.mxu1 }
  0xde   : > { %v1586_v43 = vpop.f32.mrf.mxu0 }
  0xdf   : > { %v1063_v44 = vsel %vm1062_vm0, %v2008_v41, 0.0  ;;  %v1598_v1 = vpop.f32.mrf.mxu1 }
  0xe0   : > { %1064 = vadd.xlane.f32.xlu0 %v1063_v44  ;;  %v394_v45 = vpop.f32.mrf.mxu0 }
  0xe1   : > { %v2013_v16 = vadd.f32 %v2005_v39, %v394_v45  ;;  %v477_v46 = vpop.f32.mrf.mxu1 }
  0xe2   : > { %v1587_v47 = vpop.f32.mrf.mxu0 }
  0xe3   : > { %v1066_v48 = vsel %vm1062_vm0, %v2013_v16, 0.0  ;;  %v1599_v49 = vpop.f32.mrf.mxu1 }
  0xe4   : > { %1067 = vadd.xlane.f32.xlu0 %v1066_v48 }
  0xec   : > { %v563_v52 = vpop.f32.mrf.mxu0 }
  0xed   : > { %v648_v50 = vpop.f32.mrf.mxu1  ;;  %v564_v54 = vadd.f32 %v563_v52, %v474_v42 }
  0xee   : > { %v1610_v55 = vpop.f32.mrf.mxu0 }
  0xef   : > { %v1622_v51 = vpop.f32.mrf.mxu1  ;;  %v2018_v57 = vadd.f32 %v2005_v39, %v564_v54 }
  0xf0   : > { %v566_v58 = vpop.f32.mrf.mxu0 }
  0xf1   : > { %v651_v53 = vpop.f32.mrf.mxu1  ;;  %v567_v59 = vadd.f32 %v566_v58, %v477_v46  ;;  %v1077_v60 = vsel %vm1062_vm0, %v2018_v57, 0.0 }
  0xf2   : > { %1078 = vadd.xlane.f32.xlu1 %v1077_v60  ;;  %v1611_v61 = vpop.f32.mrf.mxu0 }
  0xf3   : > { %v1623_v56 = vpop.f32.mrf.mxu1  ;;  %v2023_v62 = vadd.f32 %v2005_v39, %v567_v59 }
  0xf5   : > { %v1080_v63 = vsel %vm1062_vm0, %v2023_v62, 0.0 }
  0xf6   : > { %1081 = vadd.xlane.f32.xlu1 %v1080_v63 }
  0xfc   : > { %v723_v3 = vpop.f32.mrf.mxu0 }
  0xfd   : > { %v807_v0 = vpop.f32.mrf.mxu1  ;;  %v724_v5 = vadd.f32 %v723_v3, %v648_v50 }
  0xfe   : > { %v1634_v6 = vpop.f32.mrf.mxu0 }
  0xff   : > { %v1646_v2 = vpop.f32.mrf.mxu1  ;;  %v2028_v8 = vadd.f32 %v2005_v39, %v724_v5 }
 0x100   : > { %v726_v9 = vpop.f32.mrf.mxu0 }
 0x101   : > { %v810_v4 = vpop.f32.mrf.mxu1  ;;  %v727_v10 = vadd.f32 %v726_v9, %v651_v53  ;;  %v1091_v12 = vsel %vm1062_vm0, %v2028_v8, 0.0 }
 0x102   : > { %1092 = vadd.xlane.f32.xlu0 %v1091_v12  ;;  %v1635_v14 = vpop.f32.mrf.mxu0 }
 0x103   : > { %v1647_v7 = vpop.f32.mrf.mxu1  ;;  %v2033_v15 = vadd.f32 %v2005_v39, %v727_v10 }
 0x105   : > { %v1094_v17 = vsel %vm1062_vm0, %v2033_v15, 0.0 }
 0x106   : > { %1095 = vadd.xlane.f32.xlu1 %v1094_v17 }
 0x10c   : > { %v901_v20 = vpop.f32.mrf.mxu0 }
 0x10d   : > { %v975_v18 = vpop.f32.mrf.mxu1  ;;  %v902_v24 = vadd.f32 %v901_v20, %v807_v0 }
 0x10e   : > { %v1658_v13 = vpop.f32.mrf.mxu0 }
 0x10f   : > { %v1670_v19 = vpop.f32.mrf.mxu1  ;;  %v982_v25 = vadd.f32 %v975_v18, %v902_v24 }
 0x110   : > { %v904_v22 = vpop.f32.mrf.mxu0 }
 0x111   : > { %v978_v11 = vpop.f32.mrf.mxu1  ;;  %v905_v26 = vadd.f32 %v904_v22, %v810_v4 }
 0x112   : > { %v1659_v23 = vpop.f32.mrf.mxu0 }
 0x113   : > { %v1671_v21 = vpop.f32.mrf.mxu1  ;;  %v983_v30 = vadd.f32 %v978_v11, %v905_v26 }
 0x11c   : > { %v1051_v27 = vpop.f32.mrf.mxu0 }
 0x11d   : > { %v1058_v28 = vadd.f32 %v1051_v27, %v982_v25 }
 0x11e   : > { %v1682_v29 = vpop.f32.mrf.mxu0 }
 0x11f   : > { %v2038_v31 = vadd.f32 %v2005_v39, %v1058_v28 }
 0x120   : > { %v1054_v32 = vpop.f32.mrf.mxu0 }
 0x121   : > { %v1059_v33 = vadd.f32 %v1054_v32, %v983_v30  ;;  %v1105_v34 = vsel %vm1062_vm0, %v2038_v31, 0.0 }
 0x122   : > { %1106 = vadd.xlane.f32.xlu0 %v1105_v34  ;;  %v1683_v35 = vpop.f32.mrf.mxu0 }
 0x123   : > { %v1061_v36 = vadd.f32 %v2005_v39, %v1059_v33 }
 0x125   : > { %v1108_v37 = vsel %vm1062_vm0, %v1061_v36, 0.0 }
 0x126   : > { %1109 = vadd.xlane.f32.xlu1 %v1108_v37 }
 0x169   : > { %v1065_v40 = vpop.xlane.xlu0 %1064 }
 0x16d   : > { %v1068_v43 = vpop.xlane.xlu0 %1067 }
 0x16e   : > { %v1069_v46 = vadd.f32 %v1068_v43, %v1065_v40 }
 0x170   : > { %v1070_v49 = vrot.slane %v1069_v46, 4 }
 0x172   : > { %v1071_v52 = vadd.f32 %v1070_v49, %v1069_v46 }
 0x174   : > { %v1072_v39 = vrot.slane %v1071_v52, 2 }
 0x176   : > { %v1073_v60 = vadd.f32 %v1072_v39, %v1071_v52 }
 0x178   : > { %v1074_v3 = vrot.slane %v1073_v60, 1 }
 0x17a   : > { %v1075_v9 = vadd.f32 %v1074_v3, %v1073_v60 }
 0x17b   : > { %v1079_v38 = vpop.xlane.xlu1 %1078 }
 0x17f   : > { %v1082_v42 = vpop.xlane.xlu1 %1081 }
 0x180   : > { %v1083_v1 = vadd.f32 %v1082_v42, %v1079_v38 }
 0x182   : > { %v1084_v48 = vrot.slane %v1083_v1, 4 }
 0x184   : > { %v1085_v51 = vadd.f32 %v1084_v48, %v1083_v1 }
 0x186   : > { %v1086_v54 = vrot.slane %v1085_v51, 2 }
 0x188   : > { %v1087_v56 = vadd.f32 %v1086_v54, %v1085_v51 }
 0x18a   : > { %v1088_v0 = vrot.slane %v1087_v56, 1 }
 0x18b   : > { %v1093_v45 = vpop.xlane.xlu0 %1092 }
 0x18c   : > { %v1089_v6 = vadd.f32 %v1088_v0, %v1087_v56 }
 0x18e   : > { %v1090_v14 = vadd.f32 %v1089_v6, %v1075_v9 }
 0x18f   : > { %v1096_v44 = vpop.xlane.xlu1 %1095 }
 0x190   : > { %v1097_v47 = vadd.f32 %v1096_v44, %v1093_v45 }
 0x192   : > { %v1098_v50 = vrot.slane %v1097_v47, 4 }
 0x194   : > { %v1099_v53 = vadd.f32 %v1098_v50, %v1097_v47 }
 0x196   : > { %v1100_v55 = vrot.slane %v1099_v53, 2 }
 0x198   : > { %v1101_v61 = vadd.f32 %v1100_v55, %v1099_v53 }
 0x19a   : > { %v1102_v4 = vrot.slane %v1101_v61, 1 }
 0x19c   : > { %v1103_v10 = vadd.f32 %v1102_v4, %v1101_v61 }
 0x19e   : > { %v1104_v18 = vadd.f32 %v1103_v10, %v1090_v14 }
 0x1ab   : > { %v1107_v58 = vpop.xlane.xlu0 %1106 }
 0x1af   : > { %v1110_v59 = vpop.xlane.xlu1 %1109 }
 0x1b0   : > { %v1111_v63 = vadd.f32 %v1110_v59, %v1107_v58 }
 0x1b2   : > { %v1112_v2 = vrot.slane %v1111_v63, 4 }
 0x1b4   : > { %v1113_v5 = vadd.f32 %v1112_v2, %v1111_v63 }
 0x1b6   : > { %v1114_v7 = vrot.slane %v1113_v5, 2 }
 0x1b8   : > { %v1115_v12 = vadd.f32 %v1114_v7, %v1113_v5 }
 0x1ba   : > { %v1116_v17 = vrot.slane %v1115_v12, 1 }
 0x1bc   : > { %v1117_v19 = vadd.f32 %v1116_v17, %v1115_v12 }
 0x1be   : > { %v1118_v20 = vadd.f32 %v1117_v19, %v1104_v18 }
 0x1c0   : > { %v1119_v11 = vmul.f32 0.00048828125, %v1118_v20 }
 0x1c2   : > { %v2045_v13 = vsub.f32 %v2013_v16, %v1119_v11  ;;  %v2048_v21 = vsub.f32 %v2008_v41, %v1119_v11  ;;  %v2051_v22 = vsub.f32 %v2023_v62, %v1119_v11  ;;  %v2054_v23 = vsub.f32 %v2018_v57, %v1119_v11 }
 0x1c3   : > { %v2061_v26 = vsub.f32 %v2033_v15, %v1119_v11  ;;  %v2064_v16 = vsub.f32 %v2028_v8, %v1119_v11  ;;  %v2072_v28 = vsub.f32 %v1061_v36, %v1119_v11  ;;  %v2075_v15 = vsub.f32 %v2038_v31, %v1119_v11 }
 0x1c4   : > { %v1123_v24 = vmul.f32 %v2045_v13, %v2045_v13  ;;  %v1122_v25 = vmul.f32 %v2048_v21, %v2048_v21  ;;  %v1141_v57 = vmul.f32 %v2051_v22, %v2051_v22  ;;  %v1140_v27 = vmul.f32 %v2054_v23, %v2054_v23 }
 0x1c5   : > { %v1159_v30 = vmul.f32 %v2061_v26, %v2061_v26  ;;  %v1158_v32 = vmul.f32 %v2064_v16, %v2064_v16  ;;  %v1177_v31 = vmul.f32 %v2072_v28, %v2072_v28  ;;  %v1176_v35 = vmul.f32 %v2075_v15, %v2075_v15 }
 0x1c6   : > { %v1127_v41 = vsel %vm1062_vm0, %v1123_v24, 0.0  ;;  %v1124_v62 = vsel %vm1062_vm0, %v1122_v25, 0.0  ;;  %v1145_v8 = vsel %vm1062_vm0, %v1141_v57, 0.0  ;;  %v1142_v29 = vsel %vm1062_vm0, %v1140_v27, 0.0  ;;  %v1503_v25 = vld [vmem:[%s2167_s3 + $0x18] sm:$0xff]  ;;  %v1502_v57 = vld [vmem:[%s2167_s3 + $0x10] sm:$0xff] }
 0x1c7   : > { %1128 = vadd.xlane.f32.xlu1 %v1127_v41  ;;  %1125 = vadd.xlane.f32.xlu0 %v1124_v62  ;;  %v1163_v33 = vsel %vm1062_vm0, %v1159_v30, 0.0  ;;  %v1160_v34 = vsel %vm1062_vm0, %v1158_v32, 0.0  ;;  %v1181_v36 = vsel %vm1062_vm0, %v1177_v31, 0.0  ;;  %v1178_v37 = vsel %vm1062_vm0, %v1176_v35, 0.0  ;;  %v1505_v62 = vld [vmem:[%s2168_s4 + $0x18] sm:$0xff]  ;;  %v1508_v27 = vld [vmem:[%s2167_s3 + $0x20] sm:$0xff] }
 0x1c8   : > { %v1198_v31 = vld [vmem:[%s2167_s3 + $0x8] sm:$0xff]  ;;  %v1197_v35 = vld [vmem:[%s2167_s3] sm:$0xff] }
 0x1cb   : > { %1146 = vadd.xlane.f32.xlu1 %v1145_v8  ;;  %1143 = vadd.xlane.f32.xlu0 %v1142_v29  ;;  %v1514_v8 = vld [vmem:[%s2167_s3 + $0x30] sm:$0xff] }
 0x1cf   : > { %1164 = vadd.xlane.f32.xlu1 %v1163_v33  ;;  %1161 = vadd.xlane.f32.xlu0 %v1160_v34  ;;  %v1509_v34 = vld [vmem:[%s2167_s3 + $0x28] sm:$0xff] }
 0x1d3   : > { %1182 = vadd.xlane.f32.xlu1 %v1181_v36  ;;  %1179 = vadd.xlane.f32.xlu0 %v1178_v37 }
 0x250   : > { %v1129_v38 = vpop.xlane.xlu1 %1128  ;;  %v1126_v40 = vpop.xlane.xlu0 %1125 }
 0x251   : > { %v1130_v42 = vadd.f32 %v1129_v38, %v1126_v40 }
 0x253   : > { %v1131_v43 = vrot.slane %v1130_v42, 4 }
 0x254   : > { %v1147_v44 = vpop.xlane.xlu1 %1146  ;;  %v1144_v1 = vpop.xlane.xlu0 %1143 }
 0x255   : > { %v1132_v45 = vadd.f32 %v1131_v43, %v1130_v42  ;;  %v1148_v46 = vadd.f32 %v1147_v44, %v1144_v1  ;;  %v1511_v1 = vld [vmem:[%s2168_s4 + $0x28] sm:$0xff] }
 0x257   : > { %v1149_v47 = vrot.slane %v1148_v46, 4  ;;  %v1133_v50 = vrot.slane %v1132_v45, 2 }
 0x258   : > { %v1165_v48 = vpop.xlane.xlu1 %1164  ;;  %v1162_v49 = vpop.xlane.xlu0 %1161 }
 0x259   : > { %v1150_v51 = vadd.f32 %v1149_v47, %v1148_v46  ;;  %v1166_v52 = vadd.f32 %v1165_v48, %v1162_v49  ;;  %v1134_v56 = vadd.f32 %v1133_v50, %v1132_v45  ;;  %v1515_v45 = vld [vmem:[%s2167_s3 + $0x38] sm:$0xff] }
 0x25b   : > { %v1151_v53 = vrot.slane %v1150_v51, 2  ;;  %v1167_v54 = vrot.slane %v1166_v52, 4  ;;  %v1135_v2 = vrot.slane %v1134_v56, 1 }
 0x25c   : > { %v1183_v39 = vpop.xlane.xlu1 %1182  ;;  %v1180_v55 = vpop.xlane.xlu0 %1179 }
 0x25d   : > { %v1152_v58 = vadd.f32 %v1151_v53, %v1150_v51  ;;  %v1168_v59 = vadd.f32 %v1167_v54, %v1166_v52  ;;  %v1184_v60 = vadd.f32 %v1183_v39, %v1180_v55  ;;  %v1136_v9 = vadd.f32 %v1135_v2, %v1134_v56  ;;  %v1517_v52 = vld [vmem:[%s2168_s4 + $0x38] sm:$0xff]  ;;  %v1201_v54 = vld [vmem:[%s2168_s4] sm:$0xff] }
 0x25f   : > { %v1153_v61 = vrot.slane %v1152_v58, 1  ;;  %v1169_v63 = vrot.slane %v1168_v59, 2  ;;  %v1185_v0 = vrot.slane %v1184_v60, 4 }
 0x261   : > { %v1170_v3 = vadd.f32 %v1169_v63, %v1168_v59  ;;  %v1186_v4 = vadd.f32 %v1185_v0, %v1184_v60  ;;  %v1154_v5 = vadd.f32 %v1153_v61, %v1152_v58 }
 0x263   : > { %v1171_v6 = vrot.slane %v1170_v3, 1  ;;  %v1187_v7 = vrot.slane %v1186_v4, 2  ;;  %v1155_v14 = vadd.f32 %v1154_v5, %v1136_v9 }
 0x265   : > { %v1172_v10 = vadd.f32 %v1171_v6, %v1170_v3  ;;  %v1188_v12 = vadd.f32 %v1187_v7, %v1186_v4 }
 0x267   : > { %v1189_v17 = vrot.slane %v1188_v12, 1  ;;  %v1173_v18 = vadd.f32 %v1172_v10, %v1155_v14 }
 0x269   : > { %v1190_v19 = vadd.f32 %v1189_v17, %v1188_v12 }
 0x26b   : > { %v1191_v20 = vadd.f32 %v1190_v19, %v1173_v18 }
 0x26d   : > { %v1192_v11 = vmul.f32 0.00048828125, %v1191_v20 }
 0x26f   : > { %v1193_v24 = vadd.f32 1e-05, %v1192_v11 }
 0x271   : > { %1737 = vrsqrt.f32 %v1193_v24 }
 0x27e   : > { %v1738_v41 = vpop.eup %1737 }
 0x27f   : > { %v1223_v29 = vmul.f32 %v1738_v41, %v2051_v22  ;;  %v1222_v30 = vmul.f32 %v1738_v41, %v2054_v23  ;;  %v1255_v32 = vmul.f32 %v1738_v41, %v2064_v16  ;;  %v1288_v33 = vmul.f32 %v1738_v41, %v2075_v15  ;;  %v1504_v22 = vld [vmem:[%s2168_s4 + $0x10] sm:$0xff]  ;;  %v1510_v23 = vld [vmem:[%s2168_s4 + $0x20] sm:$0xff] }
 0x280   : > { %v1516_v16 = vld [vmem:[%s2168_s4 + $0x30] sm:$0xff]  ;;  %v1256_v15 = vmul.f32 %v1738_v41, %v2061_v26  ;;  %v1289_v36 = vmul.f32 %v1738_v41, %v2072_v28  ;;  %v1196_v37 = vmul.f32 %v1738_v41, %v2045_v13  ;;  %v1195_v38 = vmul.f32 %v1738_v41, %v2048_v21  ;;  %v1202_v26 = vld [vmem:[%s2168_s4 + $0x8] sm:$0xff] }
 0x281   : > { %v1228_v40 = vmul.f32 %v1503_v25, %v1223_v29  ;;  %v1227_v42 = vmul.f32 %v1502_v57, %v1222_v30  ;;  %v1260_v43 = vmul.f32 %v1508_v27, %v1255_v32  ;;  %v1293_v44 = vmul.f32 %v1514_v8, %v1288_v33 }
 0x282   : > { %v1261_v28 = vmul.f32 %v1509_v34, %v1256_v15  ;;  %v1200_v13 = vmul.f32 %v1198_v31, %v1196_v37  ;;  %v1199_v46 = vmul.f32 %v1197_v35, %v1195_v38  ;;  %v1294_v51 = vmul.f32 %v1515_v45, %v1289_v36 }
 0x283   : > { %v1233_v21 = vadd.f32 %v1505_v62, %v1228_v40  ;;  %v1232_v47 = vadd.f32 %v1504_v22, %v1227_v42  ;;  %v1265_v48 = vadd.f32 %v1510_v23, %v1260_v43  ;;  %v1298_v49 = vadd.f32 %v1516_v16, %v1293_v44 }
 0x284   : > { %v1266_v50 = vadd.f32 %v1511_v1, %v1261_v28  ;;  %v1204_v53 = vadd.f32 %v1202_v26, %v1200_v13  ;;  %v1203_v61 = vadd.f32 %v1201_v54, %v1199_v46  ;;  %v1299_v5 = vadd.f32 %v1517_v52, %v1294_v51 }
 0x285   : > { %vm1235_vm1 = vcmp.gt.f32.partialorder %v1233_v21, 0.0  ;;  %v1237_v39 = vmul.f32 0.01, %v1233_v21  ;;  %vm1234_vm7 = vcmp.gt.f32.partialorder %v1232_v47, 0.0  ;;  %v1236_v55 = vmul.f32 0.01, %v1232_v47 }
 0x286   : > { %vm1267_vm8 = vcmp.gt.f32.partialorder %v1265_v48, 0.0  ;;  %v1269_v56 = vmul.f32 0.01, %v1265_v48  ;;  %vm1300_vm9 = vcmp.gt.f32.partialorder %v1298_v49, 0.0  ;;  %v1302_v58 = vmul.f32 0.01, %v1298_v49 }
 0x287   : > { %v1239_v59 = vsel %vm1235_vm1, %v1233_v21, %v1237_v39  ;;  %v1238_v60 = vsel %vm1234_vm7, %v1232_v47, %v1236_v55  ;;  %v1270_v4 = vmul.f32 0.01, %v1266_v50  ;;  %vm1268_vm10 = vcmp.gt.f32.partialorder %v1266_v50, 0.0 }
 0x288   : > { %v1526_v63 = vpack.c.bf16 %v1239_v59, %v1239_v59  ;;  %v1525_v0 = vpack.c.bf16 %v1238_v60, %v1238_v60  ;;  %v1271_v2 = vsel %vm1267_vm8, %v1265_v48, %v1269_v56  ;;  %v1304_v3 = vsel %vm1300_vm9, %v1298_v49, %v1302_v58 }
 0x289   : > { %vm1206_vm11 = vcmp.gt.f32.partialorder %v1204_v53, 0.0  ;;  %v1208_v6 = vmul.f32 0.01, %v1204_v53  ;;  %vm1205_vm12 = vcmp.gt.f32.partialorder %v1203_v61, 0.0  ;;  %v1207_v7 = vmul.f32 0.01, %v1203_v61 }
 0x28a   : > { %1248 = vrot.lane.b32.xlu1 %v1526_v63, %s1750_s14  ;;  %1246 = vrot.lane.b32.xlu0 %v1525_v0, %s1750_s14  ;;  %v1527_v9 = vpack.c.bf16 %v1271_v2, %v1271_v2  ;;  %v1529_v10 = vpack.c.bf16 %v1304_v3, %v1304_v3  ;;  %v1272_v14 = vsel %vm1268_vm10, %v1266_v50, %v1270_v4  ;;  %v1303_v17 = vmul.f32 0.01, %v1299_v5 }
 0x28b   : > { %v1210_v12 = vsel %vm1206_vm11, %v1204_v53, %v1208_v6  ;;  %v1209_v19 = vsel %vm1205_vm12, %v1203_v61, %v1207_v7  ;;  %vm1301_vm14 = vcmp.gt.f32.partialorder %v1299_v5, 0.0  ;;  %v1528_v11 = vpack.c.bf16 %v1272_v14, %v1272_v14 }
 0x28c   : > { %v1524_v18 = vpack.c.bf16 %v1210_v12, %v1210_v12  ;;  %v1523_v20 = vpack.c.bf16 %v1209_v19, %v1209_v19  ;;  %v1305_v24 = vsel %vm1301_vm14, %v1299_v5, %v1303_v17 }
 0x28d   : > { %v1530_v25 = vpack.c.bf16 %v1305_v24, %v1305_v24 }
 0x28e   : > { %1279 = vrot.lane.b32.xlu1 %v1527_v9, %s1751_s19  ;;  %1312 = vrot.lane.b32.xlu0 %v1529_v10, %s1752_s20  ;;  %1221 = vst.msk [vmem:[%s2151_s17 + $0x4] sm:$0xf] %vm1219_vm13, %v1524_v18  ;;  %1220 = vst.msk [vmem:[%s2151_s17] sm:$0xf] %vm1219_vm13, %v1523_v20 }
 0x292   : > { %1281 = vrot.lane.b32.xlu1 %v1528_v11, %s1751_s19 }
 0x296   : > { %1314 = vrot.lane.b32.xlu1 %v1530_v25, %s1752_s20 }
 0x2fc   : > { %v1249_v41 = vpop.permute.xlu1 %1248  ;;  %v1247_v62 = vpop.permute.xlu0 %1246 }
 0x2fd   : > { %1254 = vst.msk [vmem:[%s2151_s17 + $0x4] sm:$0xf] %vm1252_vm15, %v1249_v41  ;;  %1253 = vst.msk [vmem:[%s2151_s17] sm:$0xf] %vm1252_vm15, %v1247_v62 }
 0x300   : > { %v1280_v57 = vpop.permute.xlu1 %1279  ;;  %v1313_v27 = vpop.permute.xlu0 %1312 }
 0x301   : > { %1286 = vst.msk [vmem:[%s2151_s17] sm:$0xf] %vm1285_vm2, %v1280_v57 }
 0x302   : > { %1319 = vst.msk [vmem:[%s2151_s17] sm:$0xf] %vm1318_vm3, %v1313_v27 }
 0x304   : > { %v1282_v8 = vpop.permute.xlu1 %1281 }
 0x305   : > { %1287 = vst.msk [vmem:[%s2151_s17 + $0x4] sm:$0xf] %vm1285_vm2, %v1282_v8 }
 0x308   : > { %v1315_v29 = vpop.permute.xlu1 %1314 }
 0x309   : > { %1320 = vst.msk [vmem:[%s2151_s17 + $0x4] sm:$0xf] %vm1318_vm3, %v1315_v29 }
 0x30a PF: > { %s15_s18 = sadd.s32 1, %s1745_s18  }
 0x30b   : > { %p12_p4 = scmp.ge.s32.totalorder %s15_s18, 4  }
 0x30d   :  { %14 = sbr.rel (!%p12_p4) target bundleno = 1 (0x1), region = 84 }

// kernel: forward.7
= control target key start
LH: loop header
LB: loop body
LE: loop exit
PB: predicated region body
PF: predicated region fallthrough
CT: control target
= control target key end

     0   :  { %s2448_s12 = smov 0   ;;  %s3428_s0 = inlined_call_operand.vmem [shape: bf16[2,73,32], index: 0, kind: input, shape index: {}]   ;;  %s3429_s1 = inlined_call_operand.vmem [shape: bf16[9,32,32], index: 1, kind: input, shape index: {}]   ;;  %s3430_s2 = inlined_call_operand.vmem [shape: f32[1,32], index: 2, kind: input, shape index: {}]   ;;  %s3431_s3 = inlined_call_operand.vmem [shape: f32[2,64,128], index: 3, kind: output, shape index: {}]  }
   0x1 LB: > { %s1967_s13 = sadd.s32 4294967295, %s2422_s12   ;;  %p1971_p0 = scmp.ge.s32.totalorder %s2422_s12, 1  ;;  %s2422_s12 = sphi %s2448_s12, %s13_s12  }
   0x2   : > { %p137_p1 = scmp.lt.s32.totalorder %s2422_s12, 3 }
   0x4   : > { %p138_p2 = pnand %p1971_p0, %p137_p1 }
   0x5   : > { %p161_p3 = scmp.lt.s32.totalorder (!%p138_p2), %s1967_s13, 1  ;;  %s2426_s8 = smov (!%p138_p2), 64  }
   0x6   : > { %141 = sbr.rel (%p138_p2) target bundleno = 479 (0x1df), region = 32  ;;  %s2427_s9 = smov (!%p138_p2), 96  }
   0xb   : > { %v2262_v0 = vld [vmem:[%s3429_s1 + $0x48] sm:$0xff]   ;;  %v184_v1 = vlaneseq  ;;  %v2263_v2 = vld [vmem:[%s3429_s1 + $0x40] sm:$0xff]   ;;  %s3446_s13 = smov (!%p161_p3, %s1967_s13), 1  ;;  %vm313_vm0 = vsmask.f32 256  ;;  %v2269_v6 = vld [vmem:[%s3429_s1 + $0x58] sm:$0xff]  }
   0xc   : > { %2137 = vmatprep.subr.bf16.mxu0 %v2262_v0  ;;  %2245 = vmatprep.subr.bf16.mxu1 %v2262_v0  ;;  %s2249_s18 = smul.u32 40, %s3446_s13  ;;  %vm314_vm1 = vsmask.f32 4368  ;;  %vm458_vm2 = vcmask 261120   ;;  %v2424_v12 = vmov 0   ;;  %v2270_v22 = vld [vmem:[%s3429_s1 + $0x50] sm:$0xff]  }
   0xd   : > { %v2465_v3 = vshrl.u32 %v184_v1, 7  ;;  %2138 = vmatpush3.bf16.msra.mxu0 %v2262_v0  ;;  %2247 = vmatpush3.bf16.msra.mxu1 %v2262_v0  ;;  %v2271_v27 = vld [vmem:[%s3429_s1 + $0x38] sm:$0xff]   ;;  %v2272_v32 = vld [vmem:[%s3429_s1 + $0x30] sm:$0xff]   ;;  %vm2540_vm7 = vmor %vm313_vm0, %vm314_vm1  ;;  %s2082_s4 = sshll.u32 %s3446_s13, 6  ;;  %s2425_s13 = smov 32  }
   0xe   : > { %2139 = vmatprep.subr.bf16.mxu0 %v2263_v2  ;;  %2246 = vmatprep.subr.bf16.mxu1 %v2263_v2  ;;  %s2476_s23 = scalar_lea.vmem %s3428_s0, %s2249_s18  ;;  %v2549_v39 = vld [vmem:[%s3429_s1 + $0x18] sm:$0xff]   ;;  %v2275_v55 = vld [vmem:[%s3429_s1 + $0x70] sm:$0xff]   ;;  %s2892_s7 = scalar_lea.vmem %s3431_s3, %s2082_s4 }
   0xf   : > { %v186_v4 = vadd.s32 8, %v2465_v3  ;;  %v197_v5 = vand.u32 7, %v2465_v3  ;;  %v174_v8 = vld [vmem:[%s2476_s23] sm:$0xf]  ;;  %v2480_v9 = vld [vmem:[%s2476_s23 + $0x4] sm:$0xf] }
  0x10   : > { %v187_v10 = vadd.s32 16, %v2465_v3  ;;  %v188_v11 = vadd.s32 24, %v2465_v3  ;;  %v2486_v14 = vcombine.low %v174_v8, %v2480_v9  ;;  %v2489_v15 = vld [vmem:[%s2476_s23 + $0x10] sm:$0xf]  ;;  %v2492_v16 = vld [vmem:[%s2476_s23 + $0x14] sm:$0xf] }
  0x11   : > { %v204_v7 = vand.u32 7, %v186_v4  ;;  %vm289_vm3 = vcmp.lt.s32.totalorder %v197_v5, 7  ;;  %2140 = vmatpush3.bf16.msra.mxu0 %v2263_v2  ;;  %2248 = vmatpush3.bf16.msra.mxu1 %v2263_v2  ;;  %v2496_v19 = vcombine.low %v2489_v15, %v2492_v16  ;;  %v2499_v20 = vld [vmem:[%s2476_s23 + $0x8] sm:$0xf]  ;;  %v2502_v21 = vld [vmem:[%s2476_s23 + $0xc] sm:$0xf] }
  0x12   : > { %vm297_vm4 = vmpackc.low %vm289_vm3, %vm289_vm3  ;;  %2149 = vmatprep.subr.bf16.mxu1 %v2269_v6  ;;  %2141 = vmatprep.mubr.msk.bf16.mxu0 %vm458_vm2, %v2486_v14  ;;  %v2512_v24 = vcombine.low %v2499_v20, %v2502_v21  ;;  %v2515_v25 = vld [vmem:[%s2476_s23 + $0x18] sm:$0xf]  ;;  %v2518_v26 = vld [vmem:[%s2476_s23 + $0x1c] sm:$0xf]  ;;  %v211_v36 = vand.u32 7, %v187_v10  ;;  %v218_v38 = vand.u32 7, %v188_v11 }
  0x13   : > { %vm290_vm5 = vcmp.lt.s32.totalorder %v204_v7, 7  ;;  %v305_v13 = vsel %vm297_vm4, 65537, %v2424_v12  ;;  %2145 = vmatprep.mubr.msk.bf16.mxu1 %vm458_vm2, %v2496_v19  ;;  %v2527_v31 = vcombine.low %v2515_v25, %v2518_v26  ;;  %2161 = vmatprep.subr.bf16.mxu0 %v2271_v27  ;;  %v2273_v41 = vld [vmem:[%s3429_s1 + $0x78] sm:$0xff]   ;;  %v189_v43 = vadd.s32 32, %v2465_v3  ;;  %v2583_v7 = vld [vmem:[%s3429_s1 + $0x28] sm:$0xff]  }
  0x14   : > { %vm298_vm6 = vmpackc.low %vm290_vm5, %vm290_vm5  ;;  %v317_v17 = vshrl.u32 %v305_v13, 16  ;;  %v320_v18 = vshll.u32 %v305_v13, 16  ;;  %2142 = vmatmul.mubr.msk.bf16.vlgmr.msra.gmra.mxu0 %vm458_vm2, %v2512_v24  ;;  %vm291_vm9 = vcmp.lt.s32.totalorder %v211_v36, 7  ;;  %vm292_vm10 = vcmp.lt.s32.totalorder %v218_v38, 7 }
  0x15   : > { %v306_v23 = vsel %vm298_vm6, 65537, %v2424_v12  ;;  %2146 = vmatmul.mubr.msk.bf16.vlgmr.msra.gmra.mxu1 %vm458_vm2, %v2527_v31  ;;  %2162 = vmatpush3.bf16.msra.mxu0 %v2271_v27  ;;  %vm299_vm11 = vmpackc.low %vm291_vm9, %vm291_vm9  ;;  %v190_v46 = vadd.s32 40, %v2465_v3  ;;  %v191_v47 = vadd.s32 48, %v2465_v3  ;;  %v225_v54 = vand.u32 7, %v189_v43 }
  0x16   : > { %v319_v28 = vrot.slane %v317_v17, 7  ;;  %v325_v29 = vshrl.u32 %v306_v23, 16  ;;  %v328_v30 = vshll.u32 %v306_v23, 16  ;;  %2150 = vmatpush3.bf16.msra.mxu1 %v2269_v6  ;;  %2153 = vmatprep.mubr.msk.bf16.mxu1 %vm458_vm2, %v2486_v14  ;;  %vm300_vm12 = vmpackc.low %vm292_vm10, %vm292_vm10  ;;  %v307_v45 = vsel %vm299_vm11, 65537, %v2424_v12 }
  0x17   : > { %2151 = vmatprep.subr.bf16.mxu1 %v2270_v22  ;;  %2163 = vmatprep.subr.bf16.mxu0 %v2272_v32  ;;  %v308_v48 = vsel %vm300_vm12, 65537, %v2424_v12  ;;  %v334_v49 = vshrl.u32 %v307_v45, 16  ;;  %v337_v50 = vshll.u32 %v307_v45, 16  ;;  %v232_v59 = vand.u32 7, %v190_v46 }
  0x18   : > { %v2534_v33 = vor.u32 %v320_v18, %v319_v28  ;;  %v323_v34 = vrot.slane %v319_v28, 4  ;;  %v327_v35 = vrot.slane %v325_v29, 7  ;;  %v343_v52 = vshrl.u32 %v308_v48, 16 }
  0x19   : > { %2164 = vmatpush3.bf16.msra.mxu0 %v2272_v32  ;;  %v346_v53 = vshll.u32 %v308_v48, 16  ;;  %v336_v58 = vrot.slane %v334_v49, 7  ;;  %vm293_vm14 = vcmp.lt.s32.totalorder %v225_v54, 7  ;;  %v192_v61 = vadd.s32 56, %v2465_v3 }
  0x1a   : > { %v330_v40 = vor.u32 %v328_v30, %v327_v35  ;;  %vm387_vm8 = vcmp.ne.s16.totalorder %v2534_v33, 0  ;;  %2152 = vmatpush3.bf16.msra.mxu1 %v2270_v22  ;;  %2185 = vmatprep.subr.bf16.mxu0 %v2549_v39  ;;  %v332_v57 = vrot.slane %v327_v35, 4  ;;  %v345_v60 = vrot.slane %v343_v52, 7  ;;  %vm301_vm15 = vmpackc.low %vm293_vm14, %vm293_vm14 }
  0x1b   : > { %v396_v42 = vsel %vm387_vm8, %v174_v8, 0  ;;  %2173 = vmatprep.subr.bf16.mxu1 %v2273_v41  ;;  %v339_v62 = vor.u32 %v337_v50, %v336_v58  ;;  %v341_v63 = vrot.slane %v336_v58, 4  ;;  %v239_v2 = vand.u32 7, %v191_v47  ;;  %v2280_v58 = vld [vmem:[%s3429_s1 + $0x20] sm:$0xff]  }
  0x1c   : > { %v2560_v44 = vsel %vm2540_vm7, %v323_v34, %v330_v40  ;;  %v348_v4 = vor.u32 %v346_v53, %v345_v60  ;;  %vm294_vm0 = vcmp.lt.s32.totalorder %v232_v59, 7  ;;  %v309_v6 = vsel %vm301_vm15, 65537, %v2424_v12 }
  0x1d   : > { %vm388_vm13 = vcmp.ne.s16.totalorder %v2560_v44, 0  ;;  %2154 = vmatmul.mubr.msk.bf16.vlgmr.msra.gmra.mxu1 %vm458_vm2, %v2512_v24  ;;  %v2587_v3 = vsel %vm2540_vm7, %v332_v57, %v339_v62  ;;  %vm302_vm1 = vmpackc.low %vm294_vm0, %vm294_vm0  ;;  %v350_v8 = vrot.slane %v345_v60, 4  ;;  %v352_v10 = vshrl.u32 %v309_v6, 16  ;;  %v2286_v44 = vld [vmem:[%s3429_s1 + $0x60] sm:$0xff]  }
  0x1e   : > { %v397_v51 = vsel %vm388_vm13, %v2480_v9, 0  ;;  %2157 = vmatprep.mubr.msk.bf16.mxu1 %vm458_vm2, %v2496_v19  ;;  %2174 = vmatpush3.bf16.msra.mxu1 %v2273_v41  ;;  %v355_v11 = vshll.u32 %v309_v6, 16  ;;  %v2591_v13 = vsel %vm2540_vm7, %v341_v63, %v348_v4  ;;  %vm389_vm3 = vcmp.ne.s16.totalorder %v2587_v3, 0  ;;  %v2644_v4 = vld [vmem:[%s2476_s23 + $0x20] sm:$0xf]  ;;  %v2284_v6 = vld [vmem:[%s3429_s1 + $0x68] sm:$0xff]  }
  0x1f   : > { %v2004_v56 = vcombine.low %v396_v42, %v397_v51  ;;  %2175 = vmatprep.subr.bf16.mxu1 %v2275_v55  ;;  %v310_v17 = vsel %vm302_vm1, 65537, %v2424_v12  ;;  %v246_v18 = vand.u32 7, %v192_v61  ;;  %vm390_vm4 = vcmp.ne.s16.totalorder %v2591_v13, 0 }
  0x20   : > { %v398_v22 = vsel %vm389_vm3, %v2499_v20, 0  ;;  %v354_v27 = vrot.slane %v352_v10, 7  ;;  %v399_v28 = vsel %vm390_vm4, %v2502_v21, 0  ;;  %v361_v29 = vshrl.u32 %v310_v17, 16 }
  0x21   : > { %v650_v0 = vshll.u32 %v2004_v56, 16  ;;  %v648_v5 = vshrl.u32 %v2004_v56, 16  ;;  %v364_v30 = vshll.u32 %v310_v17, 16  ;;  %vm295_vm5 = vcmp.lt.s32.totalorder %v239_v2, 7 }
  0x22   : > { %2176 = vmatpush3.bf16.msra.mxu1 %v2275_v55  ;;  %v2005_v32 = vcombine.low %v398_v22, %v399_v28  ;;  %v357_v34 = vor.u32 %v355_v11, %v354_v27  ;;  %vm296_vm6 = vcmp.lt.s32.totalorder %v246_v18, 7  ;;  %vm303_vm9 = vmpackc.low %vm295_vm5, %vm295_vm5  ;;  %v359_v35 = vrot.slane %v354_v27, 4 }
  0x23   : > { %v652_v23 = vrot.slane %v650_v0, 1  ;;  %2197 = vmatprep.subr.bf16.mxu1 %v2583_v7  ;;  %v363_v36 = vrot.slane %v361_v29, 7  ;;  %vm304_vm10 = vmpackc.low %vm296_vm6, %vm296_vm6  ;;  %v311_v38 = vsel %vm303_vm9, 65537, %v2424_v12  ;;  %vm646_vm11 = vsmask.f32 7424 }
  0x24   : > { %v655_v41 = vshll.u32 %v2005_v32, 16  ;;  %v2608_v42 = vsel %vm2540_vm7, %v350_v8, %v357_v34  ;;  %v312_v43 = vsel %vm304_vm10, 65537, %v2424_v12  ;;  %v370_v46 = vshrl.u32 %v311_v38, 16 }
  0x25   : > { %2158 = vmatmul.mubr.msk.bf16.gmra.mxu1 %vm458_vm2, %v2527_v31  ;;  %v653_v40 = vor.u32 %v652_v23, %v648_v5  ;;  %v366_v45 = vor.u32 %v364_v30, %v363_v36  ;;  %vm391_vm12 = vcmp.ne.s16.totalorder %v2608_v42, 0  ;;  %v368_v48 = vrot.slane %v363_v36, 4  ;;  %v2279_v36 = vld [vmem:[%s3429_s1 + $0x8] sm:$0xff]  }
  0x26   : > { %2177 = vmatprep.mubr.msk.bf16.mxu1 %vm458_vm2, %v2486_v14  ;;  %v657_v47 = vrot.slane %v655_v41, 1  ;;  %v373_v49 = vshll.u32 %v311_v38, 16  ;;  %v400_v51 = vsel %vm391_vm12, %v2489_v15, 0  ;;  %v372_v52 = vrot.slane %v370_v46, 7 }
  0x27   : > { %v2616_v50 = vsel %vm2540_vm7, %v359_v35, %v366_v45  ;;  %v379_v53 = vshrl.u32 %v312_v43, 16  ;;  %v659_v54 = vshrl.u32 %v2005_v32, 16  ;;  %v382_v55 = vshll.u32 %v312_v43, 16 }
  0x28   : > { %v2622_v12 = vsel %vm646_vm11, %v653_v40, %v657_v47  ;;  %vm392_vm14 = vcmp.ne.s16.totalorder %v2616_v50, 0  ;;  %v375_v57 = vor.u32 %v373_v49, %v372_v52  ;;  %v377_v60 = vrot.slane %v372_v52, 4  ;;  %v2282_v49 = vld [vmem:[%s3429_s1] sm:$0xff]  }
  0x29   : > { %2165 = vmatprep.mubr.msk.bf16.mxu0 %vm458_vm2, %v2622_v12  ;;  %v401_v56 = vsel %vm392_vm14, %v2492_v16, 0  ;;  %v381_v61 = vrot.slane %v379_v53, 7  ;;  %v661_v63 = vor.u32 %v659_v54, %v657_v47  ;;  %v2029_v29 = vcombine.low %v2480_v9, %v2499_v20 }
  0x2a   : > { %v2006_v59 = vcombine.low %v400_v51, %v401_v56  ;;  %v2637_v62 = vsel %vm2540_vm7, %v368_v48, %v375_v57  ;;  %v406_v41 = vsel %vm388_vm13, %v2499_v20, 0  ;;  %v2030_v47 = vcombine.low %v2502_v21, %v2489_v15  ;;  %v2285_v56 = vld [vmem:[%s3429_s1 + $0x88] sm:$0xff]  }
  0x2b   : > { %v384_v2 = vor.u32 %v382_v55, %v381_v61  ;;  %vm393_vm15 = vcmp.ne.s16.totalorder %v2637_v62, 0  ;;  %v386_v5 = vrot.slane %v381_v61, 4  ;;  %v408_v20 = vsel %vm390_vm4, %v2489_v15, 0 }
  0x2c   : > { %v663_v0 = vshll.u32 %v2006_v59, 16  ;;  %v402_v11 = vsel %vm393_vm15, %v2515_v25, 0  ;;  %v667_v17 = vshrl.u32 %v2006_v59, 16  ;;  %v2031_v48 = vcombine.low %v2492_v16, %v2515_v25 }
  0x2d   : > { %2178 = vmatmul.mubr.msk.bf16.vlgmr.msra.gmra.mxu1 %vm458_vm2, %v2512_v24  ;;  %v385_v10 = vsel %vm2540_vm7, %v377_v60, %v384_v2  ;;  %vm2657_vm1 = vcmp.ne.s16.totalorder %v386_v5, 0  ;;  %v409_v15 = vsel %vm391_vm12, %v2492_v16, 0  ;;  %v410_v13 = vsel %vm392_vm14, %v2515_v25, 0 }
  0x2e   : > { %2181 = vmatprep.mubr.msk.bf16.mxu1 %vm458_vm2, %v2496_v19  ;;  %2198 = vmatpush3.bf16.msra.mxu1 %v2583_v7  ;;  %v665_v8 = vrot.slane %v663_v0, 1  ;;  %vm394_vm0 = vcmp.ne.s16.totalorder %v385_v10, 0  ;;  %v2276_v7 = vld [vmem:[%s3429_s1 + $0x10] sm:$0xff]   ;;  %v404_v23 = vsel %vm2657_vm1, %v2644_v4, 0  ;;  %v411_v54 = vsel %vm393_vm15, %v2518_v26, 0 }
  0x2f   : > { %2199 = vmatprep.subr.bf16.mxu1 %v2280_v58  ;;  %v403_v37 = vsel %vm394_vm0, %v2518_v26, 0  ;;  %v2008_v28 = vcombine.low %v404_v23, %v404_v23  ;;  %v412_v16 = vsel %vm394_vm0, %v2644_v4, 0  ;;  %v2032_v25 = vcombine.low %v2518_v26, %v2644_v4 }
  0x30   : > { %v2662_v22 = vsel %vm646_vm11, %v661_v63, %v665_v8  ;;  %v2007_v27 = vcombine.low %v402_v11, %v403_v37  ;;  %v669_v30 = vor.u32 %v667_v17, %v665_v8  ;;  %v2051_v42 = vcombine.low %v409_v15, %v410_v13  ;;  %v2287_v17 = vld [vmem:[%s3429_s1 + $0x80] sm:$0xff]  }
  0x31   : > { %2166 = vmatmul.mubr.msk.bf16.vlgmr.msra.gmra.mxu0 %vm458_vm2, %v2662_v22  ;;  %v679_v35 = vshll.u32 %v2008_v28, 16  ;;  %v2052_v57 = vcombine.low %v411_v54, %v412_v16  ;;  %v2764_v37 = vld [vmem:[%s3430_s2] ss:$0 sm:$0xff] }
  0x32   : > { %2200 = vmatpush3.bf16.msra.mxu1 %v2280_v58  ;;  %2186 = vmatpush3.bf16.msra.mxu0 %v2549_v39  ;;  %v671_v32 = vshll.u32 %v2007_v27, 16  ;;  %v675_v34 = vshrl.u32 %v2007_v27, 16  ;;  %v405_v39 = vsel %vm387_vm8, %v2480_v9, 0  ;;  %v407_v9 = vsel %vm389_vm3, %v2502_v21, 0  ;;  %v183_v58 = vld [vmem:[%s2476_s23 + $0x24] sm:$0x1] }
  0x33   : > { %2221 = vmatprep.subr.bf16.mxu1 %v2284_v6  ;;  %2187 = vmatprep.subr.bf16.mxu0 %v2276_v7  ;;  %v681_v40 = vrot.slane %v679_v35, 1  ;;  %v2049_v46 = vcombine.low %v405_v39, %v406_v41  ;;  %v2050_v21 = vcombine.low %v407_v9, %v408_v20  ;;  %v1095_v59 = vshll.u32 %v2051_v42, 16 }
  0x34   : > { %v673_v38 = vrot.slane %v671_v32, 1  ;;  %v1099_v61 = vshrl.u32 %v2051_v42, 16  ;;  %v1103_v62 = vshll.u32 %v2052_v57, 16  ;;  %v413_v63 = vsel %vm2657_vm1, %v183_v58, 0 }
  0x35   : > { %2182 = vmatmul.mubr.msk.bf16.gmra.mxu1 %vm458_vm2, %v2527_v31  ;;  %v1082_v3 = vshll.u32 %v2049_v46, 16  ;;  %v1080_v51 = vshrl.u32 %v2049_v46, 16  ;;  %v1087_v53 = vshll.u32 %v2050_v21, 16  ;;  %v1091_v26 = vshrl.u32 %v2050_v21, 16 }
  0x36   : > { %2201 = vmatprep.mubr.msk.bf16.mxu1 %vm458_vm2, %v2029_v29  ;;  %2188 = vmatpush3.bf16.msra.mxu0 %v2276_v7  ;;  %v674_v43 = vsel %vm646_vm11, %v669_v30, %v673_v38  ;;  %v677_v45 = vor.u32 %v675_v34, %v673_v38  ;;  %v1097_v0 = vrot.slane %v1095_v59, 1  ;;  %v2053_v4 = vcombine.low %v413_v63, %v413_v63 }
  0x37   : > { %2209 = vmatprep.subr.bf16.mxu0 %v2279_v36  ;;  %2169 = vmatprep.mubr.msk.bf16.mxu0 %vm458_vm2, %v674_v43  ;;  %v1084_v52 = vrot.slane %v1082_v3, 1  ;;  %v1089_v55 = vrot.slane %v1087_v53, 1  ;;  %v1105_v5 = vrot.slane %v1103_v62, 1  ;;  %v1107_v8 = vshrl.u32 %v2052_v57, 16 }
  0x38   : > { %v2691_v33 = vsel %vm646_vm11, %v677_v45, %v681_v40  ;;  %v1111_v10 = vshll.u32 %v2053_v4, 16 }
  0x39   : > { %2170 = vmatmul.mubr.msk.bf16.gmra.mxu0 %vm458_vm2, %v2691_v33  ;;  %v1085_v50 = vor.u32 %v1084_v52, %v1080_v51  ;;  %v1093_v2 = vor.u32 %v1091_v26, %v1089_v55  ;;  %v1109_v7 = vor.u32 %v1107_v8, %v1105_v5 }
  0x3a   : > { %2189 = vmatprep.mubr.msk.bf16.mxu0 %vm458_vm2, %v2029_v29  ;;  %v1113_v18 = vrot.slane %v1111_v10, 1 }
  0x3b   : > { %v1090_v60 = vsel %vm646_vm11, %v1085_v50, %v1089_v55 }
  0x3d   : > { %2202 = vmatmul.mubr.msk.bf16.vlgmr.msra.gmra.mxu1 %vm458_vm2, %v2030_v47 }
  0x3e   : > { %2205 = vmatprep.mubr.msk.bf16.mxu1 %vm458_vm2, %v2031_v48  ;;  %2222 = vmatpush3.bf16.msra.mxu1 %v2284_v6  ;;  %v1098_v6 = vsel %vm646_vm11, %v1093_v2, %v1097_v0 }
  0x3f   : > { %2223 = vmatprep.subr.bf16.mxu1 %v2286_v44 }
  0x41   : > { %2190 = vmatmul.mubr.msk.bf16.vlgmr.msra.gmra.mxu0 %vm458_vm2, %v2030_v47 }
  0x42   : > { %2224 = vmatpush3.bf16.msra.mxu1 %v2286_v44  ;;  %2210 = vmatpush3.bf16.msra.mxu0 %v2279_v36 }
  0x43   : > { %2193 = vmatprep.mubr.msk.bf16.mxu0 %vm458_vm2, %v2031_v48  ;;  %2211 = vmatprep.subr.bf16.mxu0 %v2282_v49 }
  0x45   : > { %2206 = vmatmul.mubr.msk.bf16.gmra.mxu1 %vm458_vm2, %v2032_v25 }
  0x46   : > { %2225 = vmatprep.mubr.msk.bf16.mxu1 %vm458_vm2, %v2622_v12  ;;  %2212 = vmatpush3.bf16.msra.mxu0 %v2282_v49  ;;  %v1101_v12 = vor.u32 %v1099_v61, %v1097_v0 }
  0x47   : > { %2233 = vmatprep.subr.bf16.mxu0 %v2285_v56 }
  0x48   : > { %v1106_v11 = vsel %vm646_vm11, %v1101_v12, %v1105_v5 }
  0x49   : > { %2194 = vmatmul.mubr.msk.bf16.gmra.mxu0 %vm458_vm2, %v2032_v25 }
  0x4a   : > { %2213 = vmatprep.mubr.msk.bf16.mxu0 %vm458_vm2, %v1090_v60 }
  0x4d   : > { %2226 = vmatmul.mubr.msk.bf16.vlgmr.msra.gmra.mxu1 %vm458_vm2, %v2662_v22  ;;  %v1114_v22 = vsel %vm646_vm11, %v1109_v7, %v1113_v18 }
  0x4e   : > { %2229 = vmatprep.mubr.msk.bf16.mxu1 %vm458_vm2, %v674_v43 }
  0x51   : > { %2214 = vmatmul.mubr.msk.bf16.vlgmr.msra.gmra.mxu0 %vm458_vm2, %v1098_v6 }
  0x52   : > { %2234 = vmatpush3.bf16.msra.mxu0 %v2285_v56  ;;  %2217 = vmatprep.mubr.msk.bf16.mxu0 %vm458_vm2, %v1106_v11 }
  0x53   : > { %2235 = vmatprep.subr.bf16.mxu0 %v2287_v17 }
  0x55   : > { %2230 = vmatmul.mubr.msk.bf16.gmra.mxu1 %vm458_vm2, %v2691_v33 }
  0x56   : > { %2236 = vmatpush3.bf16.msra.mxu0 %v2287_v17 }
  0x59   : > { %2218 = vmatmul.mubr.msk.bf16.gmra.mxu0 %vm458_vm2, %v1114_v22 }
  0x5a   : > { %2237 = vmatprep.mubr.msk.bf16.mxu0 %vm458_vm2, %v2486_v14 }
  0x61   : > { %2238 = vmatmul.mubr.msk.bf16.vlgmr.msra.gmra.mxu0 %vm458_vm2, %v2512_v24 }
  0x62   : > { %2241 = vmatprep.mubr.msk.bf16.mxu0 %vm458_vm2, %v2496_v19 }
  0x69   : > { %2242 = vmatmul.mubr.msk.bf16.gmra.mxu0 %vm458_vm2, %v2527_v31 }
  0xd4   : > { %v2143_v23 = vpop.f32.mrf.mxu0 }
  0xd5   : > { %v2767_v27 = vadd.f32 %v2143_v23, %v2764_v37  ;;  %v2147_v28 = vpop.f32.mrf.mxu1 }
  0xd6   : > { %v2770_v14 = vadd.f32 %v2147_v28, %v2764_v37  ;;  %v505_v24 = vpop.f32.mrf.mxu0 }
  0xd7   : > { %v1399_v29 = vand.u32 2147483647, %v2767_v27  ;;  %v2774_v19 = vadd.f32 %v2764_v37, %v505_v24  ;;  %v521_v31 = vpop.f32.mrf.mxu1 }
  0xd8   : > { %v1403_v30 = vand.u32 2147483647, %v2770_v14  ;;  %v2778_v32 = vadd.f32 %v2764_v37, %v521_v31  ;;  %v2144_v34 = vpop.f32.mrf.mxu0 }
  0xd9   : > { %v1407_v35 = vsub.f32 0.0, %v1399_v29  ;;  %v1397_v36 = vand.u32 2147483647, %v2774_v19  ;;  %v2782_v39 = vadd.f32 %v2144_v34, %v2764_v37  ;;  %v2148_v38 = vpop.f32.mrf.mxu1  ;;  %v1393_v29 = vand.u32 127, %v184_v1 }
  0xda   : > { %v1411_v40 = vsub.f32 0.0, %v1403_v30  ;;  %v1401_v41 = vand.u32 2147483647, %v2778_v32  ;;  %v2786_v43 = vadd.f32 %v2148_v38, %v2764_v37  ;;  %v508_v45 = vpop.f32.mrf.mxu0 }
  0xdb   : > { %v1417_v46 = vmul.f32 1.442695, %v1407_v35  ;;  %v1405_v47 = vsub.f32 0.0, %v1397_v36  ;;  %v1400_v33 = vand.u32 2147483647, %v2782_v39  ;;  %v524_v9 = vpop.f32.mrf.mxu1  ;;  %v2791_v15 = vadd.f32 %v2764_v37, %v508_v45 }
  0xdc   : > { %v1425_v20 = vmul.f32 1.442695, %v1411_v40  ;;  %v1409_v44 = vsub.f32 0.0, %v1401_v41  ;;  %v1404_v48 = vand.u32 2147483647, %v2786_v43  ;;  %v2794_v52 = vadd.f32 %v2764_v37, %v524_v9 }
  0xdd   : > { %2288 = vpow2.f32 %v1417_v46  ;;  %v1413_v21 = vmul.f32 1.442695, %v1405_v47  ;;  %v1408_v3 = vsub.f32 0.0, %v1400_v33  ;;  %v2155_v13 = vpop.f32.mrf.mxu1  ;;  %v1398_v54 = vand.u32 2147483647, %v2791_v15 }
  0xde   : > { %2290 = vpow2.f32 %v1425_v20  ;;  %v1421_v49 = vmul.f32 1.442695, %v1409_v44  ;;  %v1412_v51 = vsub.f32 0.0, %v1404_v48  ;;  %v1402_v42 = vand.u32 2147483647, %v2794_v52 }
  0xdf   : > { %2292 = vpow2.f32 %v1413_v21  ;;  %v1419_v53 = vmul.f32 1.442695, %v1408_v3  ;;  %v2797_v16 = vpop.f32.mrf.mxu1  ;;  %v1406_v50 = vsub.f32 0.0, %v1398_v54  ;;  %vm1394_vm7 = vcmp.ge.s32.totalorder %v1393_v29, 3 }
  0xe0   : > { %2294 = vpow2.f32 %v1421_v49  ;;  %v1427_v25 = vmul.f32 1.442695, %v1412_v51  ;;  %v1410_v56 = vsub.f32 0.0, %v1402_v42  ;;  %vm1395_vm8 = vcmp.lt.s32.totalorder %v1393_v29, 6 }
  0xe1   : > { %2296 = vpow2.f32 %v1419_v53  ;;  %v2800_v55 = vpop.f32.mrf.mxu1  ;;  %v1415_v57 = vmul.f32 1.442695, %v1406_v50  ;;  %v1471_v41 = vmax.f32 %v2767_v27, 0.0  ;;  %v1475_v46 = vmax.f32 %v2770_v14, 0.0  ;;  %vm2876_vm11 = vmand %vm1394_vm7, %vm1395_vm8 }
  0xe2   : > { %2298 = vpow2.f32 %v1427_v25  ;;  %v1423_v59 = vmul.f32 1.442695, %v1410_v56  ;;  %v1469_v47 = vmax.f32 %v2774_v19, 0.0  ;;  %v1473_v33 = vmax.f32 %v2778_v32, 0.0 }
  0xe3   : > { %v2802_v58 = vpop.f32.mrf.mxu1  ;;  %2300 = vpow2.f32 %v1415_v57  ;;  %v1472_v9 = vmax.f32 %v2782_v39, 0.0  ;;  %v1476_v20 = vmax.f32 %v2786_v43, 0.0  ;;  %v1470_v44 = vmax.f32 %v2791_v15, 0.0 }
  0xe4   : > { %2302 = vpow2.f32 %v1423_v59  ;;  %v1474_v48 = vmax.f32 %v2794_v52, 0.0 }
  0xe5   : > { %v2804_v26 = vpop.f32.mrf.mxu1 }
  0xe7   : > { %v2806_v60 = vpop.f32.mrf.mxu1 }
  0xe9   : > { %v2808_v61 = vpop.f32.mrf.mxu1 }
  0xea   : > { %v2810_v62 = vpop.eup %2288 }
  0xeb   : > { %v2812_v63 = vpop.eup %2290  ;;  %v1439_v0 = vadd.f32 1.0, %v2810_v62  ;;  %v2815_v2 = vpop.f32.mrf.mxu1  ;;  %vm1431_vm13 = vcmp.gt.f32.partialorder %v2810_v62, 0.0001 }
  0xec   : > { %v2817_v4 = vpop.eup %2292  ;;  %v1443_v12 = vadd.f32 1.0, %v2812_v63  ;;  %vm1435_vm3 = vcmp.gt.f32.partialorder %v2812_v63, 0.0001 }
  0xed   : > { %v2820_v5 = vpop.eup %2294  ;;  %2304 = vlog2.f32 %v1439_v0  ;;  %v1437_v6 = vadd.f32 1.0, %v2817_v4  ;;  %v2823_v8 = vpop.f32.mrf.mxu1  ;;  %vm1429_vm4 = vcmp.gt.f32.partialorder %v2817_v4, 0.0001 }
  0xee   : > { %v2825_v10 = vpop.eup %2296  ;;  %2306 = vlog2.f32 %v1443_v12  ;;  %v1441_v11 = vadd.f32 1.0, %v2820_v5  ;;  %vm1433_vm5 = vcmp.gt.f32.partialorder %v2820_v5, 0.0001 }
  0xef   : > { %v2828_v17 = vpop.eup %2298  ;;  %2308 = vlog2.f32 %v1437_v6  ;;  %v1440_v7 = vadd.f32 1.0, %v2825_v10  ;;  %v2831_v18 = vpop.f32.mrf.mxu1  ;;  %vm1432_vm6 = vcmp.gt.f32.partialorder %v2825_v10, 0.0001 }
  0xf0   : > { %2310 = vlog2.f32 %v1441_v11  ;;  %v1444_v22 = vadd.f32 1.0, %v2828_v17  ;;  %v2836_v28 = vpop.eup %2300  ;;  %vm1436_vm9 = vcmp.gt.f32.partialorder %v2828_v17, 0.0001 }
  0xf1   : > { %2312 = vlog2.f32 %v1440_v7  ;;  %v2834_v23 = vpop.f32.mrf.mxu1  ;;  %v2838_v24 = vpop.eup %2302  ;;  %v1438_v31 = vadd.f32 1.0, %v2836_v28  ;;  %vm1430_vm10 = vcmp.gt.f32.partialorder %v2836_v28, 0.0001 }
  0xf2   : > { %2314 = vlog2.f32 %v1444_v22  ;;  %v2167_v30 = vpop.f32.mrf.mxu0  ;;  %v1442_v35 = vadd.f32 1.0, %v2838_v24  ;;  %vm1434_vm12 = vcmp.gt.f32.partialorder %v2838_v24, 0.0001 }
  0xf3   : > { %v2842_v34 = vpop.f32.mrf.mxu1  ;;  %2316 = vlog2.f32 %v1438_v31  ;;  %v750_v36 = vadd.f32 %v2167_v30, %v2155_v13 }
  0xf4   : > { %v741_v38 = vpop.f32.mrf.mxu0  ;;  %2318 = vlog2.f32 %v1442_v35 }
  0xf5   : > { %v2845_v40 = vpop.f32.mrf.mxu1  ;;  %v2859_v21 = vadd.f32 %v2764_v37, %v750_v36  ;;  %v742_v51 = vadd.f32 %v741_v38, %v2797_v16 }
  0xf6   : > { %v2168_v45 = vpop.f32.mrf.mxu0 }
  0xf7   : > { %v2848_v1 = vpop.f32.mrf.mxu1  ;;  %v753_v25 = vadd.f32 %v2168_v45, %v2800_v55  ;;  %v1503_v12 = vand.u32 2147483647, %v2859_v21  ;;  %v2898_v31 = vadd.f32 %v2764_v37, %v742_v51 }
  0xf8   : > { %v744_v3 = vpop.f32.mrf.mxu0 }
  0xf9   : > { %v2861_v13 = vpop.f32.mrf.mxu1  ;;  %v745_v6 = vadd.f32 %v744_v3, %v2802_v58 }
  0xfa   : > { %v2305_v49 = vpop.eup %2304  ;;  %v2171_v57 = vpop.f32.mrf.mxu0 }
  0xfb   : > { %v2307_v53 = vpop.eup %2306  ;;  %v1450_v54 = vmul.f32 0.6931472, %v2305_v49  ;;  %v2870_v42 = vpop.f32.mrf.mxu1 }
  0xfc   : > { %v2309_v50 = vpop.eup %2308  ;;  %v1458_v56 = vmul.f32 0.6931472, %v2307_v53  ;;  %v757_v58 = vpop.f32.mrf.mxu0 }
  0xfd   : > { %v2311_v59 = vpop.eup %2310  ;;  %v1463_v55 = vsel %vm1431_vm13, %v1450_v54, %v2810_v62  ;;  %v1446_v0 = vmul.f32 0.6931472, %v2309_v50  ;;  %v2885_v11 = vpop.f32.mrf.mxu1 }
  0xfe   : > { %v2313_v7 = vpop.eup %2312  ;;  %v1479_v22 = vadd.f32 %v1471_v41, %v1463_v55  ;;  %v1467_v62 = vsel %vm1435_vm3, %v1458_v56, %v2812_v63  ;;  %v1454_v29 = vmul.f32 0.6931472, %v2311_v59  ;;  %v2904_v41 = vadd.f32 %v2764_v37, %v753_v25  ;;  %v2172_v51 = vpop.f32.mrf.mxu0 }
  0xff   : > { %v2315_v30 = vpop.eup %2314  ;;  %v1483_v35 = vadd.f32 %v1475_v46, %v1467_v62  ;;  %v1461_v36 = vsel %vm1429_vm4, %v1446_v0, %v2817_v4  ;;  %v1452_v38 = vmul.f32 0.6931472, %v2313_v7  ;;  %v2906_v45 = vpop.f32.mrf.mxu1  ;;  %v1511_v7 = vsub.f32 0.0, %v1503_v12 }
 0x100   : > { %v1487_v63 = vsel %vm2876_vm11, %v1479_v22, %v2767_v27  ;;  %v1477_v3 = vadd.f32 %v1469_v47, %v1461_v36  ;;  %v1465_v46 = vsel %vm1433_vm5, %v1454_v29, %v2820_v5  ;;  %v1460_v49 = vmul.f32 0.6931472, %v2315_v30  ;;  %v2317_v5 = vpop.eup %2316 }
 0x101   : > { %1495 = vst.msk [vmem:[%s2892_s7 + $0x10] sm:$0xff] %vm458_vm2, %v1487_v63  ;;  %v1491_v4 = vsel %vm2876_vm11, %v1483_v35, %v2770_v14  ;;  %v1481_v53 = vadd.f32 %v1473_v33, %v1465_v46  ;;  %v1464_v54 = vsel %vm1432_vm6, %v1452_v38, %v2825_v10  ;;  %v2923_v27 = vadd.f32 %v2764_v37, %v745_v6  ;;  %v2925_v47 = vpop.f32.mrf.mxu1  ;;  %v760_v33 = vpop.f32.mrf.mxu0 }
 0x102   : > { %1499 = vst.msk [vmem:[%s2892_s7 + $0x30] sm:$0xff] %vm458_vm2, %v1491_v4  ;;  %v1485_v25 = vsel %vm2876_vm11, %v1477_v3, %v2774_v19  ;;  %v1480_v50 = vadd.f32 %v1472_v9, %v1464_v54  ;;  %v1468_v14 = vsel %vm1436_vm9, %v1460_v49, %v2828_v17  ;;  %v1501_v10 = vand.u32 2147483647, %v2898_v31  ;;  %v2319_v56 = vpop.eup %2318 }
 0x103   : > { %1493 = vst.msk [vmem:[%s2892_s7] sm:$0xff] %vm458_vm2, %v1485_v25  ;;  %v1489_v59 = vsel %vm2876_vm11, %v1481_v53, %v2778_v32  ;;  %v1484_v19 = vadd.f32 %v1476_v20, %v1468_v14  ;;  %v1448_v9 = vmul.f32 0.6931472, %v2317_v5  ;;  %v1504_v55 = vand.u32 2147483647, %v2904_v41  ;;  %v2944_v0 = vpop.f32.mrf.mxu1  ;;  %v2191_v32 = vpop.f32.mrf.mxu0 }
 0x104   : > { %1497 = vst.msk [vmem:[%s2892_s7 + $0x20] sm:$0xff] %vm458_vm2, %v1489_v59  ;;  %v1488_v17 = vsel %vm2876_vm11, %v1480_v50, %v2782_v39  ;;  %v1456_v6 = vmul.f32 0.6931472, %v2319_v56  ;;  %v1502_v62 = vand.u32 2147483647, %v2923_v27  ;;  %v766_v29 = vadd.f32 %v2171_v57, %v2804_v26 }
 0x105   : > { %1496 = vst.msk [vmem:[%s2892_s7 + $0x18] sm:$0xff] %vm458_vm2, %v1488_v17  ;;  %v1492_v20 = vsel %vm2876_vm11, %v1484_v19, %v2786_v43  ;;  %v1462_v22 = vsel %vm1430_vm10, %v1448_v9, %v2836_v28  ;;  %v1509_v30 = vsub.f32 0.0, %v1501_v10  ;;  %v758_v35 = vadd.f32 %v757_v58, %v2806_v60  ;;  %v931_v43 = vpop.f32.mrf.mxu0  ;;  %v2968_v36 = vpop.f32.mrf.mxu1 }
 0x106   : > { %1500 = vst.msk [vmem:[%s2892_s7 + $0x38] sm:$0xff] %vm458_vm2, %v1492_v20  ;;  %v1478_v39 = vadd.f32 %v1470_v44, %v1462_v22  ;;  %v1466_v12 = vsel %vm1434_vm12, %v1456_v6, %v2838_v24  ;;  %v1512_v38 = vsub.f32 0.0, %v1504_v55  ;;  %v2973_v26 = vadd.f32 %v2764_v37, %v766_v29 }
 0x107   : > { %v1482_v28 = vadd.f32 %v1474_v48, %v1466_v12  ;;  %v769_v57 = vadd.f32 %v2172_v51, %v2808_v61  ;;  %v2980_v44 = vadd.f32 %v2764_v37, %v758_v35  ;;  %v761_v60 = vadd.f32 %v760_v33, %v2815_v2  ;;  %v2192_v63 = vpop.f32.mrf.mxu0  ;;  %v2984_v3 = vpop.f32.mrf.mxu1 }
 0x108   : > { %v1486_v24 = vsel %vm2876_vm11, %v1478_v39, %v2791_v15  ;;  %v940_v58 = vadd.f32 %v2191_v32, %v2823_v8  ;;  %v1521_v48 = vmul.f32 1.442695, %v1511_v7  ;;  %v1510_v46 = vsub.f32 0.0, %v1502_v62 }
 0x109   : > { %1494 = vst.msk [vmem:[%s2892_s7 + $0x8] sm:$0xff] %vm458_vm2, %v1486_v24  ;;  %v1490_v61 = vsel %vm2876_vm11, %v1482_v28, %v2794_v52  ;;  %v1507_v15 = vand.u32 2147483647, %v2973_v26  ;;  %v1517_v49 = vmul.f32 1.442695, %v1509_v30  ;;  %v2996_v8 = vadd.f32 %v2764_v37, %v769_v57  ;;  %v934_v4 = vpop.f32.mrf.mxu0  ;;  %v3001_v53 = vpop.f32.mrf.mxu1 }
 0x10a   : > { %1498 = vst.msk [vmem:[%s2892_s7 + $0x28] sm:$0xff] %vm458_vm2, %v1490_v61  ;;  %v1505_v2 = vand.u32 2147483647, %v2980_v44  ;;  %v2999_v51 = vadd.f32 %v2764_v37, %v761_v60  ;;  %v3004_v52 = vadd.f32 %v2764_v37, %v940_v58  ;;  %v932_v5 = vadd.f32 %v931_v43, %v2831_v18 }
 0x10b   : > { %v1515_v54 = vsub.f32 0.0, %v1507_v15  ;;  %v943_v25 = vadd.f32 %v2192_v63, %v2834_v23  ;;  %v1523_v50 = vmul.f32 1.442695, %v1512_v38  ;;  %v1508_v14 = vand.u32 2147483647, %v2996_v8  ;;  %v2195_v33 = vpop.f32.mrf.mxu0  ;;  %v3010_v56 = vpop.f32.mrf.mxu1 }
 0x10c   : > { %v1506_v10 = vand.u32 2147483647, %v2999_v51  ;;  %2320 = vpow2.f32 %v1521_v48  ;;  %v1519_v59 = vmul.f32 1.442695, %v1510_v46  ;;  %v1513_v19 = vsub.f32 0.0, %v1505_v2 }
 0x10d   : > { %v1640_v9 = vand.u32 2147483647, %v3004_v52  ;;  %v1529_v55 = vmul.f32 1.442695, %v1515_v54  ;;  %v1516_v17 = vsub.f32 0.0, %v1508_v14  ;;  %v3014_v18 = vadd.f32 %v2764_v37, %v932_v5  ;;  %v947_v23 = vpop.f32.mrf.mxu0  ;;  %v3021_v39 = vpop.f32.mrf.mxu1 }
 0x10e   : > { %v1514_v6 = vsub.f32 0.0, %v1506_v10  ;;  %2322 = vpow2.f32 %v1517_v49  ;;  %v3017_v7 = vadd.f32 %v2764_v37, %v943_v25  ;;  %v935_v32 = vadd.f32 %v934_v4, %v2842_v34 }
 0x10f   : > { %2324 = vpow2.f32 %v1523_v50  ;;  %v1531_v20 = vmul.f32 1.442695, %v1516_v17  ;;  %v1648_v22 = vsub.f32 0.0, %v1640_v9  ;;  %v1638_v62 = vand.u32 2147483647, %v3014_v18  ;;  %v2196_v29 = vpop.f32.mrf.mxu0  ;;  %v3031_v48 = vpop.f32.mrf.mxu1 }
 0x110   : > { %2326 = vpow2.f32 %v1519_v59  ;;  %v1525_v12 = vmul.f32 1.442695, %v1513_v19  ;;  %v1641_v30 = vand.u32 2147483647, %v3017_v7  ;;  %v1527_v35 = vmul.f32 1.442695, %v1514_v6 }
 0x111   : > { %2328 = vpow2.f32 %v1529_v55  ;;  %v3025_v43 = vadd.f32 %v2764_v37, %v935_v32  ;;  %v956_v28 = vadd.f32 %v2195_v33, %v2845_v40  ;;  %v950_v34 = vpop.f32.mrf.mxu0  ;;  %v1646_v38 = vsub.f32 0.0, %v1638_v62  ;;  %v2228_v50 = vpop.f32.mrf.mxu1 }
 0x112   : > { %v1649_v57 = vsub.f32 0.0, %v1641_v30  ;;  %v948_v24 = vadd.f32 %v947_v23, %v2848_v1  ;;  %v959_v60 = vadd.f32 %v2196_v29, %v2861_v13  ;;  %2330 = vpow2.f32 %v1531_v20 }
 0x113   : > { %v1658_v58 = vmul.f32 1.442695, %v1648_v22  ;;  %v1639_v63 = vand.u32 2147483647, %v3025_v43  ;;  %v2215_v61 = vpop.f32.mrf.mxu0  ;;  %2332 = vpow2.f32 %v1525_v12  ;;  %v3034_v46 = vadd.f32 %v2764_v37, %v956_v28  ;;  %v1258_v23 = vpop.f32.mrf.mxu1 }
 0x114   : > { %v3037_v40 = vadd.f32 %v2764_v37, %v948_v24  ;;  %v3040_v15 = vadd.f32 %v2764_v37, %v959_v60  ;;  %v1660_v1 = vmul.f32 1.442695, %v1649_v57  ;;  %v951_v13 = vadd.f32 %v950_v34, %v2870_v42 }
 0x115   : > { %v1647_v49 = vsub.f32 0.0, %v1639_v63  ;;  %v1173_v2 = vpop.f32.mrf.mxu0  ;;  %2334 = vpow2.f32 %v1527_v35  ;;  %v1654_v4 = vmul.f32 1.442695, %v1646_v38  ;;  %v1644_v54 = vand.u32 2147483647, %v3034_v46 }
 0x116   : > { %v1642_v5 = vand.u32 2147483647, %v3037_v40  ;;  %2336 = vpow2.f32 %v1658_v58  ;;  %v1645_v33 = vand.u32 2147483647, %v3040_v15  ;;  %v3049_v42 = vadd.f32 %v2764_v37, %v951_v13  ;;  %v2231_v13 = vpop.f32.mrf.mxu1 }
 0x117   : > { %v2216_v25 = vpop.f32.mrf.mxu0  ;;  %v1652_v14 = vsub.f32 0.0, %v1644_v54  ;;  %2338 = vpow2.f32 %v1660_v1  ;;  %v1656_v19 = vmul.f32 1.442695, %v1647_v49  ;;  %v1575_v32 = vmax.f32 %v2859_v21, 0.0 }
 0x118   : > { %v1650_v10 = vsub.f32 0.0, %v1642_v5  ;;  %2340 = vpow2.f32 %v1654_v4  ;;  %v1573_v20 = vmax.f32 %v2898_v31, 0.0  ;;  %v1576_v62 = vmax.f32 %v2904_v41, 0.0 }
 0x119   : > { %v3046_v59 = vpop.eup %2320  ;;  %v1176_v9 = vpop.f32.mrf.mxu0  ;;  %v1666_v55 = vmul.f32 1.442695, %v1652_v14  ;;  %v1653_v30 = vsub.f32 0.0, %v1645_v33  ;;  %2342 = vpow2.f32 %v1656_v19  ;;  %v1643_v34 = vand.u32 2147483647, %v3049_v42 }
 0x11a   : > { %v1662_v12 = vmul.f32 1.442695, %v1650_v10  ;;  %v1543_v57 = vadd.f32 1.0, %v3046_v59  ;;  %v1182_v10 = vadd.f32 %v2215_v61, %v2885_v11  ;;  %v1174_v33 = vadd.f32 %v1173_v2, %v2906_v45  ;;  %v1271_v61 = vpop.f32.mrf.mxu1 }
 0x11b   : > { %v3051_v17 = vpop.eup %2322  ;;  %v2219_v6 = vpop.f32.mrf.mxu0  ;;  %2344 = vpow2.f32 %v1666_v55  ;;  %v1668_v14 = vmul.f32 1.442695, %v1653_v30  ;;  %v1651_v55 = vsub.f32 0.0, %v1643_v34  ;;  %v1185_v58 = vadd.f32 %v2216_v25, %v2925_v47 }
 0x11c   : > { %v3055_v22 = vpop.eup %2324  ;;  %2346 = vlog2.f32 %v1543_v57  ;;  %v1541_v4 = vadd.f32 1.0, %v3051_v17  ;;  %v1177_v11 = vadd.f32 %v1176_v9, %v2944_v0  ;;  %v1286_v45 = vadd.f32 %v3031_v48, %v1174_v33 }
 0x11d   : > { %v3059_v35 = vpop.eup %2326  ;;  %v1189_v38 = vpop.f32.mrf.mxu0  ;;  %v1544_v54 = vadd.f32 1.0, %v3055_v22  ;;  %2348 = vpow2.f32 %v1662_v12  ;;  %v1288_v12 = vadd.f32 %v3021_v39, %v1182_v10  ;;  %v1289_v28 = vadd.f32 %v2228_v50, %v1185_v58 }
 0x11e   : > { %v3064_v24 = vpop.eup %2328  ;;  %2350 = vlog2.f32 %v1541_v4  ;;  %v1542_v1 = vadd.f32 1.0, %v3059_v35  ;;  %v1664_v39 = vmul.f32 1.442695, %v1651_v55  ;;  %v1198_v25 = vadd.f32 %v2219_v6, %v2968_v36 }
 0x11f   : > { %v2220_v49 = vpop.f32.mrf.mxu0  ;;  %v3072_v5 = vpop.eup %2330  ;;  %v1547_v57 = vadd.f32 1.0, %v3064_v24  ;;  %2352 = vlog2.f32 %v1544_v54  ;;  %v1287_v54 = vadd.f32 %v1258_v23, %v1177_v11  ;;  %vm1535_vm2 = vcmp.gt.f32.partialorder %v3046_v59, 0.0001 }
 0x120   : > { %v3076_v19 = vpop.eup %2332  ;;  %2354 = vlog2.f32 %v1542_v1  ;;  %v1548_v34 = vadd.f32 1.0, %v3072_v5  ;;  %v1190_v58 = vadd.f32 %v1189_v38, %v2984_v3  ;;  %v1292_v10 = vadd.f32 %v2231_v13, %v1198_v25 }
 0x121   : > { %v1192_v63 = vpop.f32.mrf.mxu0  ;;  %2356 = vlog2.f32 %v1547_v57  ;;  %v1545_v47 = vadd.f32 1.0, %v3076_v19  ;;  %vm1533_vm14 = vcmp.gt.f32.partialorder %v3051_v17, 0.0001  ;;  %v1201_v57 = vadd.f32 %v2220_v49, %v3001_v53 }
 0x122   : > { %v3083_v30 = vpop.eup %2334  ;;  %2358 = vpow2.f32 %v1668_v14  ;;  %v2232_v14 = vpop.f32.mrf.mxu1  ;;  %v1290_v3 = vadd.f32 %v1271_v61, %v1190_v58  ;;  %vm1536_vm15 = vcmp.gt.f32.partialorder %v3055_v22, 0.0001  ;;  %vm1534_vm0 = vcmp.gt.f32.partialorder %v3059_v35, 0.0001 }
 0x123   : > { %v2239_v2 = vpop.f32.mrf.mxu0  ;;  %v3088_v4 = vpop.eup %2336  ;;  %2360 = vlog2.f32 %v1548_v34  ;;  %v1546_v36 = vadd.f32 1.0, %v3083_v30  ;;  %v1193_v53 = vadd.f32 %v1192_v63, %v3010_v56  ;;  %v3122_v49 = vadd.f32 %v2232_v14, %v1201_v57 }
 0x124   : > { %v1378_v60 = vadd.f32 %v2239_v2, %v1288_v12  ;;  %v3092_v9 = vpop.eup %2338  ;;  %v1680_v6 = vadd.f32 1.0, %v3088_v4  ;;  %2362 = vlog2.f32 %v1545_v47  ;;  %v1274_v61 = vpop.f32.mrf.mxu1  ;;  %vm1539_vm1 = vcmp.gt.f32.partialorder %v3064_v24, 0.0001 }
 0x125   : > { %v1345_v0 = vpop.f32.mrf.mxu0  ;;  %v3098_v50 = vpop.eup %2340  ;;  %2364 = vpow2.f32 %v1664_v39  ;;  %v1681_v13 = vadd.f32 1.0, %v3092_v9  ;;  %v1291_v14 = vadd.f32 %v1274_v61, %v1193_v53  ;;  %vm1540_vm7 = vcmp.gt.f32.partialorder %v3072_v5, 0.0001 }
 0x126   : > { %v3096_v48 = vadd.f32 %v2764_v37, %v1378_v60  ;;  %v1376_v1 = vadd.f32 %v1345_v0, %v1286_v45  ;;  %v3111_v12 = vpop.eup %2342  ;;  %2366 = vlog2.f32 %v1546_v36  ;;  %vm1537_vm8 = vcmp.gt.f32.partialorder %v3076_v19, 0.0001 }
 0x127   : > { %v2240_v33 = vpop.f32.mrf.mxu0  ;;  %2368 = vlog2.f32 %v1680_v6  ;;  %vm1538_vm13 = vcmp.gt.f32.partialorder %v3083_v30, 0.0001  ;;  %vm1672_vm3 = vcmp.gt.f32.partialorder %v3088_v4, 0.0001  ;;  %vm1673_vm4 = vcmp.gt.f32.partialorder %v3092_v9, 0.0001 }
 0x128   : > { %v1777_v23 = vand.u32 2147483647, %v3096_v48  ;;  %v3106_v60 = vadd.f32 %v2764_v37, %v1376_v1  ;;  %v1379_v55 = vadd.f32 %v2240_v33, %v1289_v28  ;;  %v1678_v28 = vadd.f32 1.0, %v3098_v50  ;;  %v3119_v34 = vpop.eup %2344 }
 0x129   : > { %v1348_v38 = vpop.f32.mrf.mxu0  ;;  %v2347_v25 = vpop.eup %2346  ;;  %2370 = vlog2.f32 %v1681_v13  ;;  %vm1670_vm5 = vcmp.gt.f32.partialorder %v3098_v50, 0.0001  ;;  %vm1671_vm6 = vcmp.gt.f32.partialorder %v3111_v12, 0.0001  ;;  %vm1676_vm9 = vcmp.gt.f32.partialorder %v3119_v34, 0.0001 }
 0x12a   : > { %v1785_v11 = vsub.f32 0.0, %v1777_v23  ;;  %v1775_v45 = vand.u32 2147483647, %v3106_v60  ;;  %v3115_v2 = vadd.f32 %v2764_v37, %v1379_v55  ;;  %v1377_v47 = vadd.f32 %v1348_v38, %v1287_v54  ;;  %v3125_v33 = vpop.eup %2348 }
 0x12b   : > { %v2243_v39 = vpop.f32.mrf.mxu0  ;;  %v1554_v23 = vmul.f32 0.6931472, %v2347_v25  ;;  %v2351_v63 = vpop.eup %2350  ;;  %2372 = vlog2.f32 %v1678_v28  ;;  %vm1674_vm12 = vcmp.gt.f32.partialorder %v3125_v33, 0.0001 }
 0x12c   : > { %v1795_v0 = vmul.f32 1.442695, %v1785_v11  ;;  %v1783_v1 = vsub.f32 0.0, %v1775_v45  ;;  %v1778_v58 = vand.u32 2147483647, %v3115_v2  ;;  %v3128_v55 = vadd.f32 %v2764_v37, %v1377_v47  ;;  %v2353_v57 = vpop.eup %2352 }
 0x12d   : > { %v1382_v29 = vadd.f32 %v2243_v39, %v1292_v10  ;;  %v1361_v56 = vpop.f32.mrf.mxu0  ;;  %v1567_v6 = vsel %vm1535_vm2, %v1554_v23, %v3046_v59  ;;  %v1550_v38 = vmul.f32 0.6931472, %v2351_v63  ;;  %v2355_v10 = vpop.eup %2354  ;;  %v1556_v45 = vmul.f32 0.6931472, %v2353_v57 }
 0x12e   : > { %v1791_v54 = vmul.f32 1.442695, %v1783_v1  ;;  %v1786_v36 = vsub.f32 0.0, %v1778_v58  ;;  %2374 = vpow2.f32 %v1795_v0  ;;  %v1776_v11 = vand.u32 2147483647, %v3128_v55  ;;  %v2357_v61 = vpop.eup %2356 }
 0x12f   : > { %v1583_v13 = vadd.f32 %v1575_v32, %v1567_v6  ;;  %v1380_v53 = vadd.f32 %v1361_v56, %v1290_v3  ;;  %v1565_v28 = vsel %vm1533_vm14, %v1550_v38, %v3051_v17  ;;  %v1552_v39 = vmul.f32 0.6931472, %v2355_v10  ;;  %v2244_v0 = vpop.f32.mrf.mxu0  ;;  %v3145_v1 = vpop.eup %2358 }
 0x130   : > { %v1797_v47 = vmul.f32 1.442695, %v1786_v36  ;;  %v1784_v59 = vsub.f32 0.0, %v1776_v11  ;;  %v3142_v25 = vadd.f32 %v2764_v37, %v1382_v29  ;;  %v1581_v3 = vadd.f32 %v1573_v20, %v1565_v28  ;;  %v2361_v58 = vpop.eup %2360 }
 0x131   : > { %v1591_v32 = vsel %vm2876_vm11, %v1583_v13, %v2859_v21  ;;  %2376 = vpow2.f32 %v1791_v54  ;;  %v1568_v17 = vsel %vm1536_vm15, %v1556_v45, %v3055_v22  ;;  %v1566_v23 = vsel %vm1534_vm0, %v1552_v39, %v3059_v35  ;;  %v2363_v36 = vpop.eup %2362 }
 0x132   : > { %1609 = vrot.lane.b32.xlu1 %v1591_v32, %s2425_s13  ;;  %v1584_v29 = vadd.f32 %v1576_v62, %v1568_v17  ;;  %v1793_v21 = vmul.f32 1.442695, %v1784_v59  ;;  %v1781_v56 = vand.u32 2147483647, %v3142_v25  ;;  %v1589_v20 = vsel %vm2876_vm11, %v1581_v3, %v2898_v31  ;;  %v1364_v31 = vpop.f32.mrf.mxu0  ;;  %v3176_v6 = vpop.eup %2364 }
 0x133   : > { %2378 = vpow2.f32 %v1797_v47  ;;  %v3438_v22 = vmax.f32 %v2923_v27, 0.0  ;;  %v1562_v54 = vmul.f32 0.6931472, %v2357_v61  ;;  %1605 = vrot.lane.b32.xlu0 %v1589_v20, %s2425_s13  ;;  %v3173_v57 = vadd.f32 %v2764_v37, %v1380_v53  ;;  %v2367_v61 = vpop.eup %2366 }
 0x134   : > { %v1592_v62 = vsel %vm2876_vm11, %v1584_v29, %v2904_v41  ;;  %2380 = vpow2.f32 %v1793_v21  ;;  %v1789_v35 = vsub.f32 0.0, %v1781_v56  ;;  %v1564_v10 = vmul.f32 0.6931472, %v2361_v58  ;;  %v2369_v39 = vpop.eup %2368 }
 0x135   : > { %v1582_v63 = vadd.f32 %v3438_v22, %v1566_v23  ;;  %v1571_v11 = vsel %vm1539_vm1, %v1562_v54, %v3064_v24  ;;  %v1383_v41 = vadd.f32 %v2244_v0, %v3122_v49  ;;  %v3439_v45 = vmax.f32 %v2973_v26, 0.0 }
 0x136   : > { %1611 = vrot.lane.b32.xlu1 %v1592_v62, %s2425_s13  ;;  %v1803_v13 = vmul.f32 1.442695, %v1789_v35  ;;  %v1779_v53 = vand.u32 2147483647, %v3173_v57  ;;  %v1558_v28 = vmul.f32 0.6931472, %v2363_v36  ;;  %v1381_v49 = vadd.f32 %v1364_v31, %v1291_v14  ;;  %v2371_v17 = vpop.eup %2370 }
 0x137   : > { %v1590_v38 = vsel %vm2876_vm11, %v1582_v63, %v2923_v27  ;;  %v1587_v47 = vadd.f32 %v3439_v45, %v1571_v11  ;;  %v1572_v27 = vsel %vm1540_vm7, %v1564_v10, %v3072_v5  ;;  %v3194_v24 = vadd.f32 %v2764_v37, %v1383_v41 }
 0x138   : > { %1607 = vrot.lane.b32.xlu0 %v1590_v38, %s2425_s13  ;;  %2382 = vpow2.f32 %v1803_v13  ;;  %v1787_v59 = vsub.f32 0.0, %v1779_v53  ;;  %v3440_v0 = vmax.f32 %v2996_v8, 0.0  ;;  %v1679_v3 = vadd.f32 1.0, %v3111_v12  ;;  %v2373_v23 = vpop.eup %2372 }
 0x139   : > { %v1782_v5 = vand.u32 2147483647, %v3194_v24  ;;  %v1569_v58 = vsel %vm1537_vm8, %v1558_v28, %v3076_v19  ;;  %v3206_v14 = vadd.f32 %v2764_v37, %v1381_v49  ;;  %v1684_v29 = vadd.f32 1.0, %v3119_v34 }
 0x13a   : > { %v1588_v32 = vadd.f32 %v3440_v0, %v1572_v27  ;;  %v1799_v21 = vmul.f32 1.442695, %v1787_v59  ;;  %v3441_v20 = vmax.f32 %v2980_v44, 0.0  ;;  %v1560_v63 = vmul.f32 0.6931472, %v2367_v61 }
 0x13b   : > { %v3214_v54 = vpop.eup %2374  ;;  %v1595_v19 = vsel %vm2876_vm11, %v1587_v47, %v2973_v26  ;;  %v1790_v37 = vsub.f32 0.0, %v1782_v5  ;;  %v1780_v36 = vand.u32 2147483647, %v3206_v14  ;;  %v1691_v62 = vmul.f32 0.6931472, %v2369_v39 }
 0x13c   : > { %v1596_v56 = vsel %vm2876_vm11, %v1588_v32, %v2996_v8  ;;  %v1585_v22 = vadd.f32 %v3441_v20, %v1569_v58  ;;  %1617 = vrot.lane.b32.xlu0 %v1595_v19, %s2425_s13  ;;  %2384 = vpow2.f32 %v1799_v21  ;;  %v1570_v35 = vsel %vm1538_vm13, %v1560_v63, %v3083_v30 }
 0x13d   : > { %1619 = vrot.lane.b32.xlu1 %v1596_v56, %s2425_s13  ;;  %v1693_v31 = vmul.f32 0.6931472, %v2371_v17  ;;  %v1805_v38 = vmul.f32 1.442695, %v1790_v37  ;;  %v1788_v26 = vsub.f32 0.0, %v1780_v36  ;;  %v3442_v11 = vmax.f32 %v2999_v51, 0.0 }
 0x13e   : > { %v1593_v8 = vsel %vm2876_vm11, %v1585_v22, %v2980_v44  ;;  %v1704_v41 = vsel %vm1672_vm3, %v1691_v62, %v3088_v4  ;;  %v3233_v13 = vpop.eup %2376  ;;  %v3443_v45 = vmax.f32 %v3004_v52, 0.0  ;;  %v1687_v30 = vmul.f32 0.6931472, %v2373_v23 }
 0x13f   : > { %v1586_v10 = vadd.f32 %v3442_v11, %v1570_v35  ;;  %v1705_v44 = vsel %vm1673_vm4, %v1693_v31, %v3092_v9  ;;  %2386 = vlog2.f32 %v1679_v3  ;;  %v1801_v53 = vmul.f32 1.442695, %v1788_v26 }
 0x140   : > { %v1720_v47 = vadd.f32 %v3443_v45, %v1704_v41  ;;  %2388 = vpow2.f32 %v1805_v38  ;;  %v3444_v27 = vmax.f32 %v3017_v7, 0.0  ;;  %v3245_v28 = vpop.eup %2378  ;;  %1613 = vrot.lane.b32.xlu0 %v1593_v8, %s2425_s13  ;;  %v1702_v9 = vsel %vm1670_vm5, %v1687_v30, %v3098_v50 }
 0x141   : > { %v1594_v61 = vsel %vm2876_vm11, %v1586_v10, %v2999_v51  ;;  %2390 = vlog2.f32 %v1684_v29  ;;  %v3252_v49 = vpop.eup %2380  ;;  %v1710_v39 = vmax.f32 %v3014_v18, 0.0  ;;  %v1685_v59 = vadd.f32 1.0, %v3145_v1 }
 0x142   : > { %v1721_v4 = vadd.f32 %v3444_v27, %v1705_v44  ;;  %1615 = vrot.lane.b32.xlu1 %v1594_v61, %s2425_s13  ;;  %2392 = vpow2.f32 %v1801_v53  ;;  %v1682_v0 = vadd.f32 1.0, %v3125_v33  ;;  %v1683_v32 = vadd.f32 1.0, %v3176_v6 }
 0x143   : > { %v1728_v50 = vsel %vm2876_vm11, %v1720_v47, %v3004_v52  ;;  %v1718_v3 = vadd.f32 %v1710_v39, %v1702_v9  ;;  %2394 = vlog2.f32 %v1685_v59  ;;  %v1817_v17 = vadd.f32 1.0, %v3214_v54 }
 0x144   : > { %v1729_v51 = vsel %vm2876_vm11, %v1721_v4, %v3017_v7  ;;  %1746 = vrot.lane.b32.xlu0 %v1728_v50, %s2426_s8  ;;  %2396 = vlog2.f32 %v1682_v0  ;;  %v1818_v7 = vadd.f32 1.0, %v3245_v28  ;;  %v1815_v58 = vadd.f32 1.0, %v3233_v13 }
 0x145   : > { %v3268_v5 = vpop.eup %2382  ;;  %2398 = vlog2.f32 %v1683_v32  ;;  %v1816_v29 = vadd.f32 1.0, %v3252_v49  ;;  %v1726_v52 = vsel %vm2876_vm11, %v1718_v3, %v3014_v18  ;;  %v1711_v63 = vmax.f32 %v3025_v43, 0.0 }
 0x146   : > { %1748 = vrot.lane.b32.xlu1 %v1729_v51, %s2426_s8  ;;  %2400 = vlog2.f32 %v1817_v17  ;;  %v1821_v23 = vadd.f32 1.0, %v3268_v5  ;;  %v1716_v37 = vmax.f32 %v3034_v46, 0.0  ;;  %v1714_v36 = vmax.f32 %v3037_v40, 0.0 }
 0x147   : > { %2402 = vlog2.f32 %v1818_v7  ;;  %v1717_v35 = vmax.f32 %v3040_v15, 0.0  ;;  %v1715_v31 = vmax.f32 %v3049_v42, 0.0  ;;  %v1849_v45 = vmax.f32 %v3096_v48, 0.0 }
 0x148   : > { %1742 = vrot.lane.b32.xlu0 %v1726_v52, %s2426_s8  ;;  %2404 = vlog2.f32 %v1815_v58  ;;  %v1850_v47 = vmax.f32 %v3115_v2, 0.0  ;;  %vm1677_vm10 = vcmp.gt.f32.partialorder %v3145_v1, 0.0001  ;;  %vm1675_vm2 = vcmp.gt.f32.partialorder %v3176_v6, 0.0001 }
 0x149   : > { %v3277_v21 = vpop.eup %2384  ;;  %2406 = vlog2.f32 %v1816_v29  ;;  %vm1809_vm14 = vcmp.gt.f32.partialorder %v3214_v54, 0.0001  ;;  %vm1810_vm15 = vcmp.gt.f32.partialorder %v3245_v28, 0.0001  ;;  %vm1807_vm0 = vcmp.gt.f32.partialorder %v3233_v13, 0.0001 }
 0x14a   : > { %v1819_v56 = vadd.f32 1.0, %v3277_v21  ;;  %2408 = vlog2.f32 %v1821_v23  ;;  %vm1808_vm1 = vcmp.gt.f32.partialorder %v3252_v49, 0.0001  ;;  %vm1811_vm7 = vcmp.gt.f32.partialorder %v3277_v21, 0.0001 }
 0x14b   : > { %vm1813_vm8 = vcmp.gt.f32.partialorder %v3268_v5, 0.0001  ;;  %vm1629_vm4 = vcmask 523520   ;;  %vm1903_vm5 = vcmask 1048320  }
 0x14c   : > { %v2387_v20 = vpop.eup %2386  ;;  %2410 = vlog2.f32 %v1819_v56 }
 0x14d   : > { %v3280_v22 = vpop.eup %2388  ;;  %v1689_v19 = vmul.f32 0.6931472, %v2387_v20 }
 0x14e   : > { %v2391_v18 = vpop.eup %2390  ;;  %v1822_v62 = vadd.f32 1.0, %v3280_v22  ;;  %vm1814_vm3 = vcmp.gt.f32.partialorder %v3280_v22, 0.0001 }
 0x14f   : > { %v3287_v8 = vpop.eup %2392  ;;  %v1703_v38 = vsel %vm1671_vm6, %v1689_v19, %v3111_v12  ;;  %v1699_v26 = vmul.f32 0.6931472, %v2391_v18 }
 0x150   : > { %v1719_v11 = vadd.f32 %v1711_v63, %v1703_v38  ;;  %v1820_v10 = vadd.f32 1.0, %v3287_v8  ;;  %2412 = vlog2.f32 %v1822_v62  ;;  %v2395_v41 = vpop.eup %2394  ;;  %vm1812_vm13 = vcmp.gt.f32.partialorder %v3287_v8, 0.0001 }
 0x151   : > { %v1708_v44 = vsel %vm1676_vm9, %v1699_v26, %v3119_v34  ;;  %v2397_v30 = vpop.eup %2396  ;;  %v1701_v61 = vmul.f32 0.6931472, %v2395_v41 }
 0x152   : > { %v1727_v12 = vsel %vm2876_vm11, %v1719_v11, %v3025_v43  ;;  %v1724_v53 = vadd.f32 %v1716_v37, %v1708_v44  ;;  %2414 = vlog2.f32 %v1820_v10  ;;  %v2399_v27 = vpop.eup %2398  ;;  %v1695_v4 = vmul.f32 0.6931472, %v2397_v30 }
 0x153   : > { %1744 = vrot.lane.b32.xlu1 %v1727_v12, %s2426_s8  ;;  %v2401_v9 = vpop.eup %2400  ;;  %v1709_v39 = vsel %vm1677_vm10, %v1701_v61, %v3145_v1  ;;  %v1697_v51 = vmul.f32 0.6931472, %v2399_v27  ;;  %v1851_v37 = vmax.f32 %v3173_v57, 0.0 }
 0x154   : > { %v1732_v34 = vsel %vm2876_vm11, %v1724_v53, %v3034_v46  ;;  %v2403_v43 = vpop.eup %2402  ;;  %v1725_v59 = vadd.f32 %v1717_v35, %v1709_v39  ;;  %v1706_v0 = vsel %vm1674_vm12, %v1695_v4, %v3125_v33  ;;  %v1828_v32 = vmul.f32 0.6931472, %v2401_v9 }
 0x155   : > { %1754 = vrot.lane.b32.xlu0 %v1732_v34, %s2426_s8  ;;  %v2405_v50 = vpop.eup %2404  ;;  %v1722_v3 = vadd.f32 %v1714_v36, %v1706_v0  ;;  %v1707_v17 = vsel %vm1675_vm2, %v1697_v51, %v3176_v6  ;;  %v1830_v7 = vmul.f32 0.6931472, %v2403_v43  ;;  %v1848_v35 = vmax.f32 %v3128_v55, 0.0 }
 0x156   : > { %v2407_v46 = vpop.eup %2406  ;;  %v1733_v1 = vsel %vm2876_vm11, %v1725_v59, %v3040_v15  ;;  %v1723_v58 = vadd.f32 %v1715_v31, %v1707_v17  ;;  %v1841_v29 = vsel %vm1809_vm14, %v1828_v32, %v3214_v54  ;;  %v1824_v52 = vmul.f32 0.6931472, %v2405_v50 }
 0x157   : > { %1756 = vrot.lane.b32.xlu1 %v1733_v1, %s2426_s8  ;;  %v1730_v33 = vsel %vm2876_vm11, %v1722_v3, %v3037_v40  ;;  %v1857_v23 = vadd.f32 %v1849_v45, %v1841_v29  ;;  %v1842_v6 = vsel %vm1810_vm15, %v1830_v7, %v3245_v28  ;;  %v1826_v56 = vmul.f32 0.6931472, %v2407_v46  ;;  %v2409_v20 = vpop.eup %2408 }
 0x158   : > { %v1858_v63 = vadd.f32 %v1850_v47, %v1842_v6  ;;  %v1839_v15 = vsel %vm1807_vm0, %v1824_v52, %v3233_v13  ;;  %v1847_v54 = vmax.f32 %v3106_v60, 0.0  ;;  %v1731_v40 = vsel %vm2876_vm11, %v1723_v58, %v3049_v42 }
 0x159   : > { %1750 = vrot.lane.b32.xlu0 %v1730_v33, %s2426_s8  ;;  %v2411_v19 = vpop.eup %2410  ;;  %v1865_v18 = vsel %vm2876_vm11, %v1857_v23, %v3096_v48  ;;  %v1840_v13 = vsel %vm1808_vm1, %v1826_v56, %v3252_v49  ;;  %v1836_v31 = vmul.f32 0.6931472, %v2409_v20  ;;  %v1852_v45 = vmax.f32 %v3206_v14, 0.0 }
 0x15a   : > { %v1832_v28 = vmul.f32 0.6931472, %v2411_v19  ;;  %v1855_v36 = vadd.f32 %v1847_v54, %v1839_v15  ;;  %v1866_v42 = vsel %vm2876_vm11, %v1858_v63, %v3115_v2  ;;  %v1856_v11 = vadd.f32 %v1848_v35, %v1840_v13 }
 0x15b   : > { %1752 = vrot.lane.b32.xlu1 %v1731_v40, %s2426_s8  ;;  %v1845_v2 = vsel %vm1813_vm8, %v1836_v31, %v3268_v5  ;;  %v1854_v53 = vmax.f32 %v3194_v24, 0.0 }
 0x15c   : > { %v1843_v48 = vsel %vm1811_vm7, %v1832_v28, %v3277_v21  ;;  %v1863_v49 = vsel %vm2876_vm11, %v1855_v36, %v3106_v60  ;;  %v1853_v21 = vmax.f32 %v3142_v25, 0.0  ;;  %v1864_v44 = vsel %vm2876_vm11, %v1856_v11, %v3128_v55 }
 0x15d   : > { %v2413_v62 = vpop.eup %2412  ;;  %1883 = vrot.lane.b32.xlu0 %v1865_v18, %s2427_s9  ;;  %v1859_v38 = vadd.f32 %v1851_v37, %v1843_v48 }
 0x15e   : > { %v1838_v41 = vmul.f32 0.6931472, %v2413_v62  ;;  %v1861_v5 = vadd.f32 %v1853_v21, %v1845_v2 }
 0x15f   : > { %v2415_v26 = vpop.eup %2414  ;;  %1885 = vrot.lane.b32.xlu1 %v1866_v42, %s2427_s9  ;;  %v1867_v47 = vsel %vm2876_vm11, %v1859_v38, %v3173_v57 }
 0x160   : > { %v1834_v10 = vmul.f32 0.6931472, %v2415_v26  ;;  %v1846_v12 = vsel %vm1814_vm3, %v1838_v41, %v3280_v22 }
 0x161   : > { %1879 = vrot.lane.b32.xlu0 %v1863_v49, %s2427_s9  ;;  %v1862_v57 = vadd.f32 %v1854_v53, %v1846_v12 }
 0x162   : > { %v1844_v60 = vsel %vm1812_vm13, %v1834_v10, %v3287_v8  ;;  %v1869_v8 = vsel %vm2876_vm11, %v1861_v5, %v3142_v25 }
 0x163   : > { %v1860_v30 = vadd.f32 %v1852_v45, %v1844_v60  ;;  %1881 = vrot.lane.b32.xlu1 %v1864_v44, %s2427_s9  ;;  %v1870_v22 = vsel %vm2876_vm11, %v1862_v57, %v3194_v24 }
 0x165   : > { %1887 = vrot.lane.b32.xlu0 %v1867_v47, %s2427_s9  ;;  %v1868_v55 = vsel %vm2876_vm11, %v1860_v30, %v3206_v14  ;;  %vm1766_vm11 = vcmask 785920  }
 0x167   : > { %1889 = vrot.lane.b32.xlu1 %v1868_v55, %s2427_s9 }
 0x169   : > { %1891 = vrot.lane.b32.xlu0 %v1869_v8, %s2427_s9 }
 0x16b   : > { %1893 = vrot.lane.b32.xlu1 %v1870_v22, %s2427_s9 }
 0x1a4   : > { %v1610_v14 = vpop.permute.xlu1 %1609 }
 0x1a5   : > { %1632 = vst.msk [vmem:[%s2892_s7 + $0x10] sm:$0xff] %vm1629_vm4, %v1610_v14  ;;  %v1606_v61 = vpop.permute.xlu0 %1605 }
 0x1a6   : > { %1630 = vst.msk [vmem:[%s2892_s7] sm:$0xff] %vm1629_vm4, %v1606_v61 }
 0x1a8   : > { %v1612_v25 = vpop.permute.xlu1 %1611 }
 0x1a9   : > { %1633 = vst.msk [vmem:[%s2892_s7 + $0x18] sm:$0xff] %vm1629_vm4, %v1612_v25 }
 0x1aa   : > { %v1608_v27 = vpop.permute.xlu0 %1607 }
 0x1ab   : > { %1631 = vst.msk [vmem:[%s2892_s7 + $0x8] sm:$0xff] %vm1629_vm4, %v1608_v27 }
 0x1ae   : > { %v1618_v24 = vpop.permute.xlu0 %1617 }
 0x1af   : > { %v1620_v16 = vpop.permute.xlu1 %1619  ;;  %1636 = vst.msk [vmem:[%s2892_s7 + $0x30] sm:$0xff] %vm1629_vm4, %v1618_v24 }
 0x1b0   : > { %1637 = vst.msk [vmem:[%s2892_s7 + $0x38] sm:$0xff] %vm1629_vm4, %v1620_v16 }
 0x1b2   : > { %v1614_v4 = vpop.permute.xlu0 %1613 }
 0x1b3   : > { %1634 = vst.msk [vmem:[%s2892_s7 + $0x20] sm:$0xff] %vm1629_vm4, %v1614_v4 }
 0x1b4   : > { %v1616_v9 = vpop.permute.xlu1 %1615 }
 0x1b5   : > { %1635 = vst.msk [vmem:[%s2892_s7 + $0x28] sm:$0xff] %vm1629_vm4, %v1616_v9 }
 0x1b6   : > { %v1747_v34 = vpop.permute.xlu0 %1746 }
 0x1b7   : > { %1769 = vst.msk [vmem:[%s2892_s7 + $0x10] sm:$0xff] %vm1766_vm11, %v1747_v34 }
 0x1b8   : > { %v1749_v39 = vpop.permute.xlu1 %1748 }
 0x1b9   : > { %1770 = vst.msk [vmem:[%s2892_s7 + $0x18] sm:$0xff] %vm1766_vm11, %v1749_v39 }
 0x1ba   : > { %v1743_v51 = vpop.permute.xlu0 %1742 }
 0x1bb   : > { %1767 = vst.msk [vmem:[%s2892_s7] sm:$0xff] %vm1766_vm11, %v1743_v51 }
 0x1c5   : > { %v1745_v43 = vpop.permute.xlu1 %1744 }
 0x1c6   : > { %1768 = vst.msk [vmem:[%s2892_s7 + $0x8] sm:$0xff] %vm1766_vm11, %v1745_v43 }
 0x1c7   : > { %v1755_v59 = vpop.permute.xlu0 %1754 }
 0x1c8   : > { %1773 = vst.msk [vmem:[%s2892_s7 + $0x30] sm:$0xff] %vm1766_vm11, %v1755_v59 }
 0x1c9   : > { %v1757_v0 = vpop.permute.xlu1 %1756 }
 0x1ca   : > { %1774 = vst.msk [vmem:[%s2892_s7 + $0x38] sm:$0xff] %vm1766_vm11, %v1757_v0 }
 0x1cb   : > { %v1751_v32 = vpop.permute.xlu0 %1750 }
 0x1cc   : > { %1771 = vst.msk [vmem:[%s2892_s7 + $0x20] sm:$0xff] %vm1766_vm11, %v1751_v32 }
 0x1cd   : > { %v1753_v50 = vpop.permute.xlu1 %1752 }
 0x1ce   : > { %1772 = vst.msk [vmem:[%s2892_s7 + $0x28] sm:$0xff] %vm1766_vm11, %v1753_v50 }
 0x1cf   : > { %v1884_v3 = vpop.permute.xlu0 %1883 }
 0x1d0   : > { %1906 = vst.msk [vmem:[%s2892_s7 + $0x10] sm:$0xff] %vm1903_vm5, %v1884_v3 }
 0x1d1   : > { %v1886_v17 = vpop.permute.xlu1 %1885 }
 0x1d2   : > { %1907 = vst.msk [vmem:[%s2892_s7 + $0x18] sm:$0xff] %vm1903_vm5, %v1886_v17 }
 0x1d3   : > { %v1880_v7 = vpop.permute.xlu0 %1879 }
 0x1d4   : > { %1904 = vst.msk [vmem:[%s2892_s7] sm:$0xff] %vm1903_vm5, %v1880_v7 }
 0x1d5   : > { %v1882_v46 = vpop.permute.xlu1 %1881 }
 0x1d6   : > { %1905 = vst.msk [vmem:[%s2892_s7 + $0x8] sm:$0xff] %vm1903_vm5, %v1882_v46 }
 0x1d7   : > { %v1888_v1 = vpop.permute.xlu0 %1887 }
 0x1d8   : > { %1908 = vst.msk [vmem:[%s2892_s7 + $0x20] sm:$0xff] %vm1903_vm5, %v1888_v1 }
 0x1d9   : > { %v1890_v58 = vpop.permute.xlu1 %1889 }
 0x1da   : > { %1909 = vst.msk [vmem:[%s2892_s7 + $0x28] sm:$0xff] %vm1903_vm5, %v1890_v58 }
 0x1db   : > { %v1892_v29 = vpop.permute.xlu0 %1891 }
 0x1dc   : > { %1910 = vst.msk [vmem:[%s2892_s7 + $0x30] sm:$0xff] %vm1903_vm5, %v1892_v29 }
 0x1dd   : > { %v1894_v52 = vpop.permute.xlu1 %1893 }
 0x1de   : > { %1911 = vst.msk [vmem:[%s2892_s7 + $0x38] sm:$0xff] %vm1903_vm5, %v1894_v52 }
 0x1df PF: > { %s13_s12 = sadd.s32 1, %s2422_s12  }
 0x1e0   : > { %p10_p4 = scmp.ge.s32.totalorder %s13_s12, 4  }
 0x1e2   :  { %12 = sbr.rel (!%p10_p4) target bundleno = 1 (0x1), region = 70 }

</bundles_post_ra>
